<compile_context>
chip_gen: v7x
topology: tpu7x:2x2x1
jax: 0.10.0
libtpu: 0.0.40
codegen_flags: <defaults>
</compile_context>

<pallas_src>
import functools

import jax
import jax.numpy as jnp
from jax import lax
from jax.experimental import pallas as pl
from jax.experimental.pallas import tpu as pltpu

KSIZE = 5
PAD = (KSIZE - 1) // 2               # padding=2 ("same" conv for 5x5 kernels)
TOP = 8                              # top halo rows (sublane-aligned interior)
F32_PRECISION = lax.Precision.HIGHEST  # only for the small f32 matmuls


# --------------------------------------------------------------------------
# Fused whole-network kernel (one grid step == B batch elements)
# --------------------------------------------------------------------------
def _resnet_kernel(x_ref, bopen_ref, bk_ref, bg_ref, m_ref, wt_ref, rm_ref,
                   sel_ref, o_ref, xinp, xpad, dxpad, *,
                   H, W, nNin, nopen, nhid, nout, nlayer, h, eps, B, S):
    f32 = jnp.float32
    bf16 = jnp.bfloat16
    BS = B * S
    TOT = TOP + BS + PAD

    def fill_zero(ref, lo, hi):
        if hi > lo:
            ref[lo:hi, :] = jnp.zeros((hi - lo, ref.shape[1]), ref.dtype)

    # Zero only halo/tail rows (interiors are fully overwritten by the masked
    # slab stores).  Runs every step on purpose: with the parallel grid axis
    # sharded across TensorCores every core must initialize its own scratch.
    for buf in (xinp, xpad, dxpad):
        fill_zero(buf, 0, TOP)
        fill_zero(buf, TOP + BS, TOT)
    # xinp's inter-image gap rows are never overwritten -> zero them too.
    for b in range(B):
        fill_zero(xinp, TOP + b * S + H, TOP + (b + 1) * S)

    # Place the B input images as vertically stacked strips (stride S rows).
    for b in range(B):
        xinp[TOP + b * S:TOP + b * S + H, :] = x_ref[b]

    rm = rm_ref[...]                     # (BS, 1) f32; 0 on per-strip gap rows

    def conv5(src_ref, w_ref, n_out):
        # src_ref: (TOT, W*Cin) f32 row-padded strips
        # w_ref  : (5, W*Cin, W*Cout) bf16 banded weights
        acc = jnp.zeros((BS, n_out), dtype=f32)
        for dh in range(KSIZE):
            start = TOP - PAD + dh
            lhs = src_ref[start:start + BS, :].astype(bf16)
            acc = acc + jnp.dot(lhs, w_ref[dh], preferred_element_type=f32)
        return acc

    # --- opening conv (Mask = 1.0) ---
    x_int = conv5(xinp, bopen_ref, W * nopen)            # (BS, W*nopen) f32
    xpad[TOP:TOP + BS, :] = (x_int * rm).astype(xpad.dtype)

    m = m_ref[...]                                       # (W*nhid, W*nhid) f32

    for i in range(nlayer):
        # centered conv (mean removal folded into BK on the host)
        xc = conv5(xpad, bk_ref.at[i], W * nhid)         # (BS, W*nhid) f32
        # per-pixel channel sum-of-squares via block-diagonal matmul (f32)
        ss = jnp.dot(xc * xc, m, preferred_element_type=f32,
                     precision=F32_PRECISION)
        dx = jnp.maximum(xc * lax.rsqrt(ss + eps), 0.0)
        dxpad[TOP:TOP + BS, :] = (dx * rm).astype(dxpad.dtype)

        # x = x + h * conv2(dx, G_i)
        g = conv5(dxpad, bg_ref.at[i], W * nopen)        # (BS, W*nopen) f32
        x_int = x_int + h * g
        if i < nlayer - 1:
            xpad[TOP:TOP + BS, :] = (x_int * rm).astype(xpad.dtype)

    # --- per-image spatial sum (selector matmul) + 1x1 projection ---
    colsum = jnp.dot(sel_ref[...], x_int, preferred_element_type=f32,
                     precision=F32_PRECISION)            # (B, W*nopen)
    y = jnp.dot(colsum, wt_ref[...], preferred_element_type=f32,
                precision=F32_PRECISION)                 # (B, nout); /(H*W) folded in
    o_ref[...] = y.reshape(1, B, nout).astype(o_ref.dtype)


# --------------------------------------------------------------------------
# Host-side weight re-layout (one-time, pure JAX)
# --------------------------------------------------------------------------
def _band_weights(Kw, W):
    """HWIO conv weight (5,5,Cin,Cout) -> banded (5, W*Cin, W*Cout).

    Zero-column halo removed: B[dh, u*Cin+ci, w*Cout+co] = Kw[dh, u+PAD-w, ci, co]
    when 0 <= u+PAD-w < 5, else 0, so conv = sum_dh  x_rows[dh] @ B[dh].
    """
    kh, kw, Cin, Cout = Kw.shape
    u = jnp.arange(W)
    w = jnp.arange(W)
    d = jnp.arange(kw)
    ind = ((u[None, :, None] + PAD) == (w[None, None, :] + d[:, None, None])
           ).astype(Kw.dtype)                             # (kw, W, W)
    Bm = jnp.einsum('duw,hdio->huiwo', ind, Kw)           # (kh, W, Cin, W, Cout)
    return Bm.reshape(kh, W * Cin, W * Cout)


def _block_diag_ones(W, C, dtype):
    # (W*C, W*C) block-diagonal ones: matmul sums each pixel's C channels and
    # broadcasts the sum back to those C lanes.
    idx = jnp.arange(W * C) // C
    return (idx[:, None] == idx[None, :]).astype(dtype)


# --------------------------------------------------------------------------
# Full forward pass (mirrors resNet.forward with Mask = 1.0)
# --------------------------------------------------------------------------
def resnet_forward(x_nchw, params, h=0.1, eps=1e-3):
    Kopen, K, G, Wproj = params
    N, nNin, H, W = x_nchw.shape
    nopen = Kopen.shape[-1]
    nhid = K.shape[-1]
    nout = Wproj.shape[-1]
    nlayer = K.shape[0]

    S = H + 2 * PAD                     # per-image strip stride (rows)
    # Images per grid step: fill MXU rows (~256) but keep >= 2 grid steps so a
    # v7x megacore still gets at least one step per TensorCore.
    b_cap = max(1, 256 // S)
    cands = [b for b in range(1, N + 1)
             if N % b == 0 and b <= b_cap and (N // b >= 2 or N == 1)]
    B = max(cands) if cands else 1
    Gsteps = N // B
    BS = B * S
    TOT = TOP + BS + PAD

    # NCHW -> NHWC -> lane-flattened (N, H, W*Cin)
    x = jnp.transpose(x_nchw, (0, 2, 3, 1)).reshape(N, H, W * nNin)
    x = x.astype(jnp.float32)

    # One-time weight re-layouts.  tv_norm mean-centering is folded into the
    # K banded weights; 1/(H*W) is folded into the projection weights.
    cmat = (jnp.eye(W * nhid, dtype=jnp.float32)
            - _block_diag_ones(W, nhid, jnp.float32) / float(nhid))
    Bopen = _band_weights(Kopen.astype(jnp.float32), W).astype(jnp.bfloat16)
    BK = jnp.stack([_band_weights(K[i].astype(jnp.float32), W) @ cmat
                    for i in range(nlayer)]).astype(jnp.bfloat16)
    BG = jnp.stack([_band_weights(G[i].astype(jnp.float32), W)
                    for i in range(nlayer)]).astype(jnp.bfloat16)
    M = _block_diag_ones(W, nhid, jnp.float32)
    WT = jnp.tile(Wproj.astype(jnp.float32), (W, 1)) / float(H * W)

    # Per-strip validity mask and per-image row-sum selector.
    r = jnp.arange(BS)
    rowmask = ((r % S) < H).astype(jnp.float32).reshape(BS, 1)        # (BS, 1)
    sel = (((r[None, :] // S) == jnp.arange(B)[:, None]) &
           ((r[None, :] % S) < H)).astype(jnp.float32)                # (B, BS)

    kern = functools.partial(
        _resnet_kernel, H=H, W=W, nNin=nNin, nopen=nopen, nhid=nhid,
        nout=nout, nlayer=nlayer, h=h, eps=eps, B=B, S=S)

    out = pl.pallas_call(
        kern,
        out_shape=jax.ShapeDtypeStruct((Gsteps, B, nout), jnp.float32),
        grid=(Gsteps,),
        in_specs=[
            pl.BlockSpec((B, H, W * nNin), lambda g: (g, 0, 0)),
            pl.BlockSpec(Bopen.shape, lambda g: (0, 0, 0)),
            pl.BlockSpec(BK.shape, lambda g: (0, 0, 0, 0)),
            pl.BlockSpec(BG.shape, lambda g: (0, 0, 0, 0)),
            pl.BlockSpec(M.shape, lambda g: (0, 0)),
            pl.BlockSpec(WT.shape, lambda g: (0, 0)),
            pl.BlockSpec(rowmask.shape, lambda g: (0, 0)),
            pl.BlockSpec(sel.shape, lambda g: (0, 0)),
        ],
        out_specs=pl.BlockSpec((1, B, nout), lambda g: (g, 0, 0)),
        scratch_shapes=[
            pltpu.VMEM((TOT, W * nNin), jnp.float32),    # stacked padded input
            pltpu.VMEM((TOT, W * nopen), jnp.float32),   # stacked padded x state
            pltpu.VMEM((TOT, W * nhid), jnp.float32),    # stacked padded dx
        ],
        compiler_params=pltpu.CompilerParams(
            dimension_semantics=("parallel",)),
    )(x, Bopen, BK, BG, M, WT, rowmask, sel)
    return out.reshape(N, nout)


# --------------------------------------------------------------------------
# Pure-JAX reference (same math, no Pallas) for verification
# --------------------------------------------------------------------------
def _ref_conv(x, w):
    return jax.lax.conv_general_dilated(
        x, w, window_strides=(1, 1), padding=[(PAD, PAD), (PAD, PAD)],
        dimension_numbers=("NHWC", "HWIO", "NHWC"), precision=F32_PRECISION)


def resnet_reference(x_nchw, params, h=0.1, eps=1e-3):
    Kopen, K, G, Wproj = params
    x = jnp.transpose(x_nchw, (0, 2, 3, 1))
    x = _ref_conv(x, Kopen)
    for i in range(K.shape[0]):
        dx = _ref_conv(x, K[i])
        dx = dx - jnp.mean(dx, axis=-1, keepdims=True)
        dx = dx / jnp.sqrt(jnp.sum(dx * dx, axis=-1, keepdims=True) + eps)
        dx = jnp.maximum(dx, 0.0)
        x = x + h * _ref_conv(dx, G[i])
    y = jnp.einsum("nhwc,co->nhwo", x, Wproj, precision=F32_PRECISION)
    return jnp.mean(y, axis=(1, 2))


# --------------------------------------------------------------------------
if __name__ == "__main__":
    # Small shapes consistent with the module (batch=4 exercises both the
    # multi-image-per-step packing and a >=2-step parallel grid).
    N, nNin, Hs, Ws = 4, 4, 16, 16
    nopen, nhid, nout, nlayer = 8, 8, 4, 2
    h = 0.1
    stdv = 0.01

    key = jax.random.PRNGKey(0)
    kx, k1, k2, k3, k4 = jax.random.split(key, 5)

    # Input in PyTorch's NCHW convention.
    x = jax.random.normal(kx, (N, nNin, Hs, Ws), dtype=jnp.float32)

    # Parameters stored directly in HWIO / (Cin, Cout) layout (same shapes as
    # the torch module, just transposed conventions).
    Kopen = stdv * jax.random.normal(k1, (KSIZE, KSIZE, nNin, nopen), jnp.float32)
    K = stdv * jax.random.normal(k2, (nlayer, KSIZE, KSIZE, nopen, nhid), jnp.float32)
    G = stdv * jax.random.normal(k3, (nlayer, KSIZE, KSIZE, nhid, nopen), jnp.float32)
    Wproj = stdv * jax.random.normal(k4, (nopen, nout), jnp.float32)
    params = (Kopen, K, G, Wproj)

    out = jax.block_until_ready(resnet_forward(x, params, h=h))
    ref = jax.block_until_ready(resnet_reference(x, params, h=h))

    assert out.shape == (N, nout), out.shape
    assert bool(jnp.all(jnp.isfinite(out)))
    max_diff = float(jnp.max(jnp.abs(out - ref)))
    assert jnp.allclose(out, ref, atol=1e-4, rtol=1e-3), (
        f"max abs diff {max_diff}")

    print("KERNEL_OK")
</pallas_src>

<mosaic_0001>
module attributes {stable_mosaic.version = 11 : i64} {
  func.func @_resnet_kernel(%arg0: i32, %arg1: memref<2x16x64xf32, #tpu.memory_space<vmem>>, %arg2: memref<5x64x128xbf16, #tpu.memory_space<vmem>>, %arg3: memref<2x5x128x128xbf16, #tpu.memory_space<vmem>>, %arg4: memref<2x5x128x128xbf16, #tpu.memory_space<vmem>>, %arg5: memref<128x128xf32, #tpu.memory_space<vmem>>, %arg6: memref<128x4xf32, #tpu.memory_space<vmem>>, %arg7: memref<40x1xf32, #tpu.memory_space<vmem>>, %arg8: memref<2x40xf32, #tpu.memory_space<vmem>>, %arg9: memref<1x2x4xf32, #tpu.memory_space<vmem>>, %arg10: memref<50x64xf32, #tpu.memory_space<vmem>>, %arg11: memref<50x128xf32, #tpu.memory_space<vmem>>, %arg12: memref<50x128xf32, #tpu.memory_space<vmem>>) attributes {dimension_semantics = [#tpu.dimension_semantics<parallel>], iteration_bounds = array<i64: 2>, scalar_prefetch = 0 : i64, scratch_operands = 3 : i64, tpu.core_type = #tpu.core_type<tc>, window_params = [{transform_indices = @transform_0, window_bounds = array<i64: 2, 16, 64>}, {pipeline_mode = #tpu.pipeline_mode<synchronous>, transform_indices = @transform_1, window_bounds = array<i64: 5, 64, 128>}, {pipeline_mode = #tpu.pipeline_mode<synchronous>, transform_indices = @transform_2, window_bounds = array<i64: 2, 5, 128, 128>}, {pipeline_mode = #tpu.pipeline_mode<synchronous>, transform_indices = @transform_3, window_bounds = array<i64: 2, 5, 128, 128>}, {pipeline_mode = #tpu.pipeline_mode<synchronous>, transform_indices = @transform_4, window_bounds = array<i64: 128, 128>}, {pipeline_mode = #tpu.pipeline_mode<synchronous>, transform_indices = @transform_5, window_bounds = array<i64: 128, 4>}, {pipeline_mode = #tpu.pipeline_mode<synchronous>, transform_indices = @transform_6, window_bounds = array<i64: 40, 1>}, {pipeline_mode = #tpu.pipeline_mode<synchronous>, transform_indices = @transform_7, window_bounds = array<i64: 2, 40>}, {transform_indices = @transform_8, window_bounds = array<i64: 1, 2, 4>}]} {
    %cst = arith.constant 0.000000e+00 : f32
    %0 = vector.broadcast %cst : f32 to vector<8x64xf32>
    %c0 = arith.constant 0 : index
    %c0_0 = arith.constant 0 : index
    %1 = vector.load %arg10[%c0, %c0_0] : memref<50x64xf32, #tpu.memory_space<vmem>>, vector<8x64xf32>
    tpu.vector_store %arg10[%c0, %c0_0], %0 {strides = array<i32>} : memref<50x64xf32, #tpu.memory_space<vmem>>, vector<8x64xf32>,
    %cst_1 = arith.constant 0.000000e+00 : f32
    %2 = vector.broadcast %cst_1 : f32 to vector<2x64xf32>
    %c48 = arith.constant 48 : index
    %c0_2 = arith.constant 0 : index
    %3 = vector.load %arg10[%c48, %c0_2] : memref<50x64xf32, #tpu.memory_space<vmem>>, vector<2x64xf32>
    tpu.vector_store %arg10[%c48, %c0_2], %2 {strides = array<i32>} : memref<50x64xf32, #tpu.memory_space<vmem>>, vector<2x64xf32>,
    %cst_3 = arith.constant 0.000000e+00 : f32
    %4 = vector.broadcast %cst_3 : f32 to vector<8x128xf32>
    %c0_4 = arith.constant 0 : index
    %c0_5 = arith.constant 0 : index
    %5 = vector.load %arg11[%c0_4, %c0_5] : memref<50x128xf32, #tpu.memory_space<vmem>>, vector<8x128xf32>
    tpu.vector_store %arg11[%c0_4, %c0_5], %4 {strides = array<i32>} : memref<50x128xf32, #tpu.memory_space<vmem>>, vector<8x128xf32>,
    %cst_6 = arith.constant 0.000000e+00 : f32
    %6 = vector.broadcast %cst_6 : f32 to vector<2x128xf32>
    %c48_7 = arith.constant 48 : index
    %c0_8 = arith.constant 0 : index
    %7 = vector.load %arg11[%c48_7, %c0_8] : memref<50x128xf32, #tpu.memory_space<vmem>>, vector<2x128xf32>
    tpu.vector_store %arg11[%c48_7, %c0_8], %6 {strides = array<i32>} : memref<50x128xf32, #tpu.memory_space<vmem>>, vector<2x128xf32>,
    %cst_9 = arith.constant 0.000000e+00 : f32
    %8 = vector.broadcast %cst_9 : f32 to vector<8x128xf32>
    %c0_10 = arith.constant 0 : index
    %c0_11 = arith.constant 0 : index
    %9 = vector.load %arg12[%c0_10, %c0_11] : memref<50x128xf32, #tpu.memory_space<vmem>>, vector<8x128xf32>
    tpu.vector_store %arg12[%c0_10, %c0_11], %8 {strides = array<i32>} : memref<50x128xf32, #tpu.memory_space<vmem>>, vector<8x128xf32>,
    %cst_12 = arith.constant 0.000000e+00 : f32
    %10 = vector.broadcast %cst_12 : f32 to vector<2x128xf32>
    %c48_13 = arith.constant 48 : index
    %c0_14 = arith.constant 0 : index
    %11 = vector.load %arg12[%c48_13, %c0_14] : memref<50x128xf32, #tpu.memory_space<vmem>>, vector<2x128xf32>
    tpu.vector_store %arg12[%c48_13, %c0_14], %10 {strides = array<i32>} : memref<50x128xf32, #tpu.memory_space<vmem>>, vector<2x128xf32>,
    %cst_15 = arith.constant 0.000000e+00 : f32
    %12 = vector.broadcast %cst_15 : f32 to vector<4x64xf32>
    %c24 = arith.constant 24 : index
    %c0_16 = arith.constant 0 : index
    %13 = vector.load %arg10[%c24, %c0_16] : memref<50x64xf32, #tpu.memory_space<vmem>>, vector<4x64xf32>
    tpu.vector_store %arg10[%c24, %c0_16], %12 {strides = array<i32>} : memref<50x64xf32, #tpu.memory_space<vmem>>, vector<4x64xf32>,
    %cst_17 = arith.constant 0.000000e+00 : f32
    %14 = vector.broadcast %cst_17 : f32 to vector<4x64xf32>
    %c44 = arith.constant 44 : index
    %c0_18 = arith.constant 0 : index
    %15 = vector.load %arg10[%c44, %c0_18] : memref<50x64xf32, #tpu.memory_space<vmem>>, vector<4x64xf32>
    tpu.vector_store %arg10[%c44, %c0_18], %14 {strides = array<i32>} : memref<50x64xf32, #tpu.memory_space<vmem>>, vector<4x64xf32>,
    %c0_19 = arith.constant 0 : index
    %c0_20 = arith.constant 0 : index
    %c0_21 = arith.constant 0 : index
    %16 = vector.load %arg1[%c0_19, %c0_20, %c0_21] : memref<2x16x64xf32, #tpu.memory_space<vmem>>, vector<1x16x64xf32>
    %17 = vector.shape_cast %16 : vector<1x16x64xf32> to vector<16x64xf32>
    %c8 = arith.constant 8 : index
    %c0_22 = arith.constant 0 : index
    %18 = vector.load %arg10[%c8, %c0_22] : memref<50x64xf32, #tpu.memory_space<vmem>>, vector<16x64xf32>
    tpu.vector_store %arg10[%c8, %c0_22], %17 {strides = array<i32>} : memref<50x64xf32, #tpu.memory_space<vmem>>, vector<16x64xf32>,
    %c1 = arith.constant 1 : index
    %c0_23 = arith.constant 0 : index
    %c0_24 = arith.constant 0 : index
    %19 = vector.load %arg1[%c1, %c0_23, %c0_24] : memref<2x16x64xf32, #tpu.memory_space<vmem>>, vector<1x16x64xf32>
    %20 = vector.shape_cast %19 : vector<1x16x64xf32> to vector<16x64xf32>
    %c28 = arith.constant 28 : index
    %c0_25 = arith.constant 0 : index
    %21 = vector.load %arg10[%c28, %c0_25] : memref<50x64xf32, #tpu.memory_space<vmem>>, vector<16x64xf32>
    tpu.vector_store %arg10[%c28, %c0_25], %20 {strides = array<i32>} : memref<50x64xf32, #tpu.memory_space<vmem>>, vector<16x64xf32>,
    %c0_26 = arith.constant 0 : index
    %c0_27 = arith.constant 0 : index
    %22 = vector.load %arg7[%c0_26, %c0_27] : memref<40x1xf32, #tpu.memory_space<vmem>>, vector<40x1xf32>
    %cst_28 = arith.constant 0.000000e+00 : f32
    %23 = vector.broadcast %cst_28 : f32 to vector<40x128xf32>
    %c6 = arith.constant 6 : index
    %c0_29 = arith.constant 0 : index
    %24 = vector.load %arg10[%c6, %c0_29] : memref<50x64xf32, #tpu.memory_space<vmem>>, vector<40x64xf32>
    %25 = arith.truncf %24 : vector<40x64xf32> to vector<40x64xbf16>
    %c0_30 = arith.constant 0 : index
    %c0_31 = arith.constant 0 : index
    %c0_32 = arith.constant 0 : index
    %26 = vector.load %arg2[%c0_30, %c0_31, %c0_32] : memref<5x64x128xbf16, #tpu.memory_space<vmem>>, vector<1x64x128xbf16>
    %27 = vector.shape_cast %26 : vector<1x64x128xbf16> to vector<64x128xbf16>
    %cst_33 = arith.constant dense<0.000000e+00> : vector<40x128xf32>
    %28 = tpu.matmul %25, %27, %cst_33 {dimension_numbers = #tpu.dot_dimension_numbers<[1], [0], [0], [1], [0, 0, 1, 1], [], []>} : vector<40x64xbf16>, vector<64x128xbf16>, vector<40x128xf32> -> vector<40x128xf32>
    %29 = arith.addf %23, %28 : vector<40x128xf32>
    %c7 = arith.constant 7 : index
    %c0_34 = arith.constant 0 : index
    %30 = vector.load %arg10[%c7, %c0_34] : memref<50x64xf32, #tpu.memory_space<vmem>>, vector<40x64xf32>
    %31 = arith.truncf %30 : vector<40x64xf32> to vector<40x64xbf16>
    %c1_35 = arith.constant 1 : index
    %c0_36 = arith.constant 0 : index
    %c0_37 = arith.constant 0 : index
    %32 = vector.load %arg2[%c1_35, %c0_36, %c0_37] : memref<5x64x128xbf16, #tpu.memory_space<vmem>>, vector<1x64x128xbf16>
    %33 = vector.shape_cast %32 : vector<1x64x128xbf16> to vector<64x128xbf16>
    %cst_38 = arith.constant dense<0.000000e+00> : vector<40x128xf32>
    %34 = tpu.matmul %31, %33, %cst_38 {dimension_numbers = #tpu.dot_dimension_numbers<[1], [0], [0], [1], [0, 0, 1, 1], [], []>} : vector<40x64xbf16>, vector<64x128xbf16>, vector<40x128xf32> -> vector<40x128xf32>
    %35 = arith.addf %29, %34 : vector<40x128xf32>
    %c8_39 = arith.constant 8 : index
    %c0_40 = arith.constant 0 : index
    %36 = vector.load %arg10[%c8_39, %c0_40] : memref<50x64xf32, #tpu.memory_space<vmem>>, vector<40x64xf32>
    %37 = arith.truncf %36 : vector<40x64xf32> to vector<40x64xbf16>
    %c2 = arith.constant 2 : index
    %c0_41 = arith.constant 0 : index
    %c0_42 = arith.constant 0 : index
    %38 = vector.load %arg2[%c2, %c0_41, %c0_42] : memref<5x64x128xbf16, #tpu.memory_space<vmem>>, vector<1x64x128xbf16>
    %39 = vector.shape_cast %38 : vector<1x64x128xbf16> to vector<64x128xbf16>
    %cst_43 = arith.constant dense<0.000000e+00> : vector<40x128xf32>
    %40 = tpu.matmul %37, %39, %cst_43 {dimension_numbers = #tpu.dot_dimension_numbers<[1], [0], [0], [1], [0, 0, 1, 1], [], []>} : vector<40x64xbf16>, vector<64x128xbf16>, vector<40x128xf32> -> vector<40x128xf32>
    %41 = arith.addf %35, %40 : vector<40x128xf32>
    %c9 = arith.constant 9 : index
    %c0_44 = arith.constant 0 : index
    %42 = vector.load %arg10[%c9, %c0_44] : memref<50x64xf32, #tpu.memory_space<vmem>>, vector<40x64xf32>
    %43 = arith.truncf %42 : vector<40x64xf32> to vector<40x64xbf16>
    %c3 = arith.constant 3 : index
    %c0_45 = arith.constant 0 : index
    %c0_46 = arith.constant 0 : index
    %44 = vector.load %arg2[%c3, %c0_45, %c0_46] : memref<5x64x128xbf16, #tpu.memory_space<vmem>>, vector<1x64x128xbf16>
    %45 = vector.shape_cast %44 : vector<1x64x128xbf16> to vector<64x128xbf16>
    %cst_47 = arith.constant dense<0.000000e+00> : vector<40x128xf32>
    %46 = tpu.matmul %43, %45, %cst_47 {dimension_numbers = #tpu.dot_dimension_numbers<[1], [0], [0], [1], [0, 0, 1, 1], [], []>} : vector<40x64xbf16>, vector<64x128xbf16>, vector<40x128xf32> -> vector<40x128xf32>
    %47 = arith.addf %41, %46 : vector<40x128xf32>
    %c10 = arith.constant 10 : index
    %c0_48 = arith.constant 0 : index
    %48 = vector.load %arg10[%c10, %c0_48] : memref<50x64xf32, #tpu.memory_space<vmem>>, vector<40x64xf32>
    %49 = arith.truncf %48 : vector<40x64xf32> to vector<40x64xbf16>
    %c4 = arith.constant 4 : index
    %c0_49 = arith.constant 0 : index
    %c0_50 = arith.constant 0 : index
    %50 = vector.load %arg2[%c4, %c0_49, %c0_50] : memref<5x64x128xbf16, #tpu.memory_space<vmem>>, vector<1x64x128xbf16>
    %51 = vector.shape_cast %50 : vector<1x64x128xbf16> to vector<64x128xbf16>
    %cst_51 = arith.constant dense<0.000000e+00> : vector<40x128xf32>
    %52 = tpu.matmul %49, %51, %cst_51 {dimension_numbers = #tpu.dot_dimension_numbers<[1], [0], [0], [1], [0, 0, 1, 1], [], []>} : vector<40x64xbf16>, vector<64x128xbf16>, vector<40x128xf32> -> vector<40x128xf32>
    %53 = arith.addf %47, %52 : vector<40x128xf32>
    %54 = vector.broadcast %22 : vector<40x1xf32> to vector<40x128xf32>
    %55 = arith.mulf %53, %54 : vector<40x128xf32>
    %c8_52 = arith.constant 8 : index
    %c0_53 = arith.constant 0 : index
    %56 = vector.load %arg11[%c8_52, %c0_53] : memref<50x128xf32, #tpu.memory_space<vmem>>, vector<40x128xf32>
    tpu.vector_store %arg11[%c8_52, %c0_53], %55 {strides = array<i32>} : memref<50x128xf32, #tpu.memory_space<vmem>>, vector<40x128xf32>,
    %c0_54 = arith.constant 0 : index
    %c0_55 = arith.constant 0 : index
    %57 = vector.load %arg5[%c0_54, %c0_55] : memref<128x128xf32, #tpu.memory_space<vmem>>, vector<128x128xf32>
    %cst_56 = arith.constant 0.000000e+00 : f32
    %58 = vector.broadcast %cst_56 : f32 to vector<40x128xf32>
    %c6_57 = arith.constant 6 : index
    %c0_58 = arith.constant 0 : index
    %59 = vector.load %arg11[%c6_57, %c0_58] : memref<50x128xf32, #tpu.memory_space<vmem>>, vector<40x128xf32>
    %60 = arith.truncf %59 : vector<40x128xf32> to vector<40x128xbf16>
    %c0_i32 = arith.constant 0 : i32
    %c0_i32_59 = arith.constant 0 : i32
    %c0_i32_60 = arith.constant 0 : i32
    %c0_i32_61 = arith.constant 0 : i32
    %61 = tpu.memref_slice %arg3[%c0_i32, %c0_i32_59, %c0_i32_60, %c0_i32_61] : memref<2x5x128x128xbf16, #tpu.memory_space<vmem>> -> memref<1x5x128x128xbf16, #tpu.memory_space<vmem>>
    %62 = tpu.memref_squeeze %61 : memref<1x5x128x128xbf16, #tpu.memory_space<vmem>> -> memref<5x128x128xbf16, #tpu.memory_space<vmem>>
    %c0_62 = arith.constant 0 : index
    %c0_63 = arith.constant 0 : index
    %c0_64 = arith.constant 0 : index
    %63 = vector.load %62[%c0_62, %c0_63, %c0_64] : memref<5x128x128xbf16, #tpu.memory_space<vmem>>, vector<1x128x128xbf16>
    %64 = vector.shape_cast %63 : vector<1x128x128xbf16> to vector<128x128xbf16>
    %cst_65 = arith.constant dense<0.000000e+00> : vector<40x128xf32>
    %65 = tpu.matmul %60, %64, %cst_65 {dimension_numbers = #tpu.dot_dimension_numbers<[1], [0], [0], [1], [0, 0, 1, 1], [], []>} : vector<40x128xbf16>, vector<128x128xbf16>, vector<40x128xf32> -> vector<40x128xf32>
    %66 = arith.addf %58, %65 : vector<40x128xf32>
    %c7_66 = arith.constant 7 : index
    %c0_67 = arith.constant 0 : index
    %67 = vector.load %arg11[%c7_66, %c0_67] : memref<50x128xf32, #tpu.memory_space<vmem>>, vector<40x128xf32>
    %68 = arith.truncf %67 : vector<40x128xf32> to vector<40x128xbf16>
    %c0_i32_68 = arith.constant 0 : i32
    %c0_i32_69 = arith.constant 0 : i32
    %c0_i32_70 = arith.constant 0 : i32
    %c0_i32_71 = arith.constant 0 : i32
    %69 = tpu.memref_slice %arg3[%c0_i32_68, %c0_i32_69, %c0_i32_70, %c0_i32_71] : memref<2x5x128x128xbf16, #tpu.memory_space<vmem>> -> memref<1x5x128x128xbf16, #tpu.memory_space<vmem>>
    %70 = tpu.memref_squeeze %69 : memref<1x5x128x128xbf16, #tpu.memory_space<vmem>> -> memref<5x128x128xbf16, #tpu.memory_space<vmem>>
    %c1_72 = arith.constant 1 : index
    %c0_73 = arith.constant 0 : index
    %c0_74 = arith.constant 0 : index
    %71 = vector.load %70[%c1_72, %c0_73, %c0_74] : memref<5x128x128xbf16, #tpu.memory_space<vmem>>, vector<1x128x128xbf16>
    %72 = vector.shape_cast %71 : vector<1x128x128xbf16> to vector<128x128xbf16>
    %cst_75 = arith.constant dense<0.000000e+00> : vector<40x128xf32>
    %73 = tpu.matmul %68, %72, %cst_75 {dimension_numbers = #tpu.dot_dimension_numbers<[1], [0], [0], [1], [0, 0, 1, 1], [], []>} : vector<40x128xbf16>, vector<128x128xbf16>, vector<40x128xf32> -> vector<40x128xf32>
    %74 = arith.addf %66, %73 : vector<40x128xf32>
    %c8_76 = arith.constant 8 : index
    %c0_77 = arith.constant 0 : index
    %75 = vector.load %arg11[%c8_76, %c0_77] : memref<50x128xf32, #tpu.memory_space<vmem>>, vector<40x128xf32>
    %76 = arith.truncf %75 : vector<40x128xf32> to vector<40x128xbf16>
    %c0_i32_78 = arith.constant 0 : i32
    %c0_i32_79 = arith.constant 0 : i32
    %c0_i32_80 = arith.constant 0 : i32
    %c0_i32_81 = arith.constant 0 : i32
    %77 = tpu.memref_slice %arg3[%c0_i32_78, %c0_i32_79, %c0_i32_80, %c0_i32_81] : memref<2x5x128x128xbf16, #tpu.memory_space<vmem>> -> memref<1x5x128x128xbf16, #tpu.memory_space<vmem>>
    %78 = tpu.memref_squeeze %77 : memref<1x5x128x128xbf16, #tpu.memory_space<vmem>> -> memref<5x128x128xbf16, #tpu.memory_space<vmem>>
    %c2_82 = arith.constant 2 : index
    %c0_83 = arith.constant 0 : index
    %c0_84 = arith.constant 0 : index
    %79 = vector.load %78[%c2_82, %c0_83, %c0_84] : memref<5x128x128xbf16, #tpu.memory_space<vmem>>, vector<1x128x128xbf16>
    %80 = vector.shape_cast %79 : vector<1x128x128xbf16> to vector<128x128xbf16>
    %cst_85 = arith.constant dense<0.000000e+00> : vector<40x128xf32>
    %81 = tpu.matmul %76, %80, %cst_85 {dimension_numbers = #tpu.dot_dimension_numbers<[1], [0], [0], [1], [0, 0, 1, 1], [], []>} : vector<40x128xbf16>, vector<128x128xbf16>, vector<40x128xf32> -> vector<40x128xf32>
    %82 = arith.addf %74, %81 : vector<40x128xf32>
    %c9_86 = arith.constant 9 : index
    %c0_87 = arith.constant 0 : index
    %83 = vector.load %arg11[%c9_86, %c0_87] : memref<50x128xf32, #tpu.memory_space<vmem>>, vector<40x128xf32>
    %84 = arith.truncf %83 : vector<40x128xf32> to vector<40x128xbf16>
    %c0_i32_88 = arith.constant 0 : i32
    %c0_i32_89 = arith.constant 0 : i32
    %c0_i32_90 = arith.constant 0 : i32
    %c0_i32_91 = arith.constant 0 : i32
    %85 = tpu.memref_slice %arg3[%c0_i32_88, %c0_i32_89, %c0_i32_90, %c0_i32_91] : memref<2x5x128x128xbf16, #tpu.memory_space<vmem>> -> memref<1x5x128x128xbf16, #tpu.memory_space<vmem>>
    %86 = tpu.memref_squeeze %85 : memref<1x5x128x128xbf16, #tpu.memory_space<vmem>> -> memref<5x128x128xbf16, #tpu.memory_space<vmem>>
    %c3_92 = arith.constant 3 : index
    %c0_93 = arith.constant 0 : index
    %c0_94 = arith.constant 0 : index
    %87 = vector.load %86[%c3_92, %c0_93, %c0_94] : memref<5x128x128xbf16, #tpu.memory_space<vmem>>, vector<1x128x128xbf16>
    %88 = vector.shape_cast %87 : vector<1x128x128xbf16> to vector<128x128xbf16>
    %cst_95 = arith.constant dense<0.000000e+00> : vector<40x128xf32>
    %89 = tpu.matmul %84, %88, %cst_95 {dimension_numbers = #tpu.dot_dimension_numbers<[1], [0], [0], [1], [0, 0, 1, 1], [], []>} : vector<40x128xbf16>, vector<128x128xbf16>, vector<40x128xf32> -> vector<40x128xf32>
    %90 = arith.addf %82, %89 : vector<40x128xf32>
    %c10_96 = arith.constant 10 : index
    %c0_97 = arith.constant 0 : index
    %91 = vector.load %arg11[%c10_96, %c0_97] : memref<50x128xf32, #tpu.memory_space<vmem>>, vector<40x128xf32>
    %92 = arith.truncf %91 : vector<40x128xf32> to vector<40x128xbf16>
    %c0_i32_98 = arith.constant 0 : i32
    %c0_i32_99 = arith.constant 0 : i32
    %c0_i32_100 = arith.constant 0 : i32
    %c0_i32_101 = arith.constant 0 : i32
    %93 = tpu.memref_slice %arg3[%c0_i32_98, %c0_i32_99, %c0_i32_100, %c0_i32_101] : memref<2x5x128x128xbf16, #tpu.memory_space<vmem>> -> memref<1x5x128x128xbf16, #tpu.memory_space<vmem>>
    %94 = tpu.memref_squeeze %93 : memref<1x5x128x128xbf16, #tpu.memory_space<vmem>> -> memref<5x128x128xbf16, #tpu.memory_space<vmem>>
    %c4_102 = arith.constant 4 : index
    %c0_103 = arith.constant 0 : index
    %c0_104 = arith.constant 0 : index
    %95 = vector.load %94[%c4_102, %c0_103, %c0_104] : memref<5x128x128xbf16, #tpu.memory_space<vmem>>, vector<1x128x128xbf16>
    %96 = vector.shape_cast %95 : vector<1x128x128xbf16> to vector<128x128xbf16>
    %cst_105 = arith.constant dense<0.000000e+00> : vector<40x128xf32>
    %97 = tpu.matmul %92, %96, %cst_105 {dimension_numbers = #tpu.dot_dimension_numbers<[1], [0], [0], [1], [0, 0, 1, 1], [], []>} : vector<40x128xbf16>, vector<128x128xbf16>, vector<40x128xf32> -> vector<40x128xf32>
    %98 = arith.addf %90, %97 : vector<40x128xf32>
    %99 = arith.mulf %98, %98 : vector<40x128xf32>
    %cst_106 = arith.constant dense<0.000000e+00> : vector<40x128xf32>
    %100 = tpu.matmul %99, %57, %cst_106 {dimension_numbers = #tpu.dot_dimension_numbers<[1], [0], [0], [1], [0, 0, 1, 1], [], []>, precision = #tpu.contract_precision<fp32>} : vector<40x128xf32>, vector<128x128xf32>, vector<40x128xf32> -> vector<40x128xf32>
    %cst_107 = arith.constant 1.000000e-03 : f32
    %101 = vector.broadcast %cst_107 : f32 to vector<40x128xf32>
    %102 = arith.addf %100, %101 : vector<40x128xf32>
    %103 = math.rsqrt %102 : vector<40x128xf32>
    %104 = arith.mulf %98, %103 : vector<40x128xf32>
    %cst_108 = arith.constant 0.000000e+00 : f32
    %105 = vector.broadcast %cst_108 : f32 to vector<40x128xf32>
    %106 = arith.maximumf %104, %105 : vector<40x128xf32>
    %107 = vector.broadcast %22 : vector<40x1xf32> to vector<40x128xf32>
    %108 = arith.mulf %106, %107 : vector<40x128xf32>
    %c8_109 = arith.constant 8 : index
    %c0_110 = arith.constant 0 : index
    %109 = vector.load %arg12[%c8_109, %c0_110] : memref<50x128xf32, #tpu.memory_space<vmem>>, vector<40x128xf32>
    tpu.vector_store %arg12[%c8_109, %c0_110], %108 {strides = array<i32>} : memref<50x128xf32, #tpu.memory_space<vmem>>, vector<40x128xf32>,
    %cst_111 = arith.constant 0.000000e+00 : f32
    %110 = vector.broadcast %cst_111 : f32 to vector<40x128xf32>
    %c6_112 = arith.constant 6 : index
    %c0_113 = arith.constant 0 : index
    %111 = vector.load %arg12[%c6_112, %c0_113] : memref<50x128xf32, #tpu.memory_space<vmem>>, vector<40x128xf32>
    %112 = arith.truncf %111 : vector<40x128xf32> to vector<40x128xbf16>
    %c0_i32_114 = arith.constant 0 : i32
    %c0_i32_115 = arith.constant 0 : i32
    %c0_i32_116 = arith.constant 0 : i32
    %c0_i32_117 = arith.constant 0 : i32
    %113 = tpu.memref_slice %arg4[%c0_i32_114, %c0_i32_115, %c0_i32_116, %c0_i32_117] : memref<2x5x128x128xbf16, #tpu.memory_space<vmem>> -> memref<1x5x128x128xbf16, #tpu.memory_space<vmem>>
    %114 = tpu.memref_squeeze %113 : memref<1x5x128x128xbf16, #tpu.memory_space<vmem>> -> memref<5x128x128xbf16, #tpu.memory_space<vmem>>
    %c0_118 = arith.constant 0 : index
    %c0_119 = arith.constant 0 : index
    %c0_120 = arith.constant 0 : index
    %115 = vector.load %114[%c0_118, %c0_119, %c0_120] : memref<5x128x128xbf16, #tpu.memory_space<vmem>>, vector<1x128x128xbf16>
    %116 = vector.shape_cast %115 : vector<1x128x128xbf16> to vector<128x128xbf16>
    %cst_121 = arith.constant dense<0.000000e+00> : vector<40x128xf32>
    %117 = tpu.matmul %112, %116, %cst_121 {dimension_numbers = #tpu.dot_dimension_numbers<[1], [0], [0], [1], [0, 0, 1, 1], [], []>} : vector<40x128xbf16>, vector<128x128xbf16>, vector<40x128xf32> -> vector<40x128xf32>
    %118 = arith.addf %110, %117 : vector<40x128xf32>
    %c7_122 = arith.constant 7 : index
    %c0_123 = arith.constant 0 : index
    %119 = vector.load %arg12[%c7_122, %c0_123] : memref<50x128xf32, #tpu.memory_space<vmem>>, vector<40x128xf32>
    %120 = arith.truncf %119 : vector<40x128xf32> to vector<40x128xbf16>
    %c0_i32_124 = arith.constant 0 : i32
    %c0_i32_125 = arith.constant 0 : i32
    %c0_i32_126 = arith.constant 0 : i32
    %c0_i32_127 = arith.constant 0 : i32
    %121 = tpu.memref_slice %arg4[%c0_i32_124, %c0_i32_125, %c0_i32_126, %c0_i32_127] : memref<2x5x128x128xbf16, #tpu.memory_space<vmem>> -> memref<1x5x128x128xbf16, #tpu.memory_space<vmem>>
    %122 = tpu.memref_squeeze %121 : memref<1x5x128x128xbf16, #tpu.memory_space<vmem>> -> memref<5x128x128xbf16, #tpu.memory_space<vmem>>
    %c1_128 = arith.constant 1 : index
    %c0_129 = arith.constant 0 : index
    %c0_130 = arith.constant 0 : index
    %123 = vector.load %122[%c1_128, %c0_129, %c0_130] : memref<5x128x128xbf16, #tpu.memory_space<vmem>>, vector<1x128x128xbf16>
    %124 = vector.shape_cast %123 : vector<1x128x128xbf16> to vector<128x128xbf16>
    %cst_131 = arith.constant dense<0.000000e+00> : vector<40x128xf32>
    %125 = tpu.matmul %120, %124, %cst_131 {dimension_numbers = #tpu.dot_dimension_numbers<[1], [0], [0], [1], [0, 0, 1, 1], [], []>} : vector<40x128xbf16>, vector<128x128xbf16>, vector<40x128xf32> -> vector<40x128xf32>
    %126 = arith.addf %118, %125 : vector<40x128xf32>
    %c8_132 = arith.constant 8 : index
    %c0_133 = arith.constant 0 : index
    %127 = vector.load %arg12[%c8_132, %c0_133] : memref<50x128xf32, #tpu.memory_space<vmem>>, vector<40x128xf32>
    %128 = arith.truncf %127 : vector<40x128xf32> to vector<40x128xbf16>
    %c0_i32_134 = arith.constant 0 : i32
    %c0_i32_135 = arith.constant 0 : i32
    %c0_i32_136 = arith.constant 0 : i32
    %c0_i32_137 = arith.constant 0 : i32
    %129 = tpu.memref_slice %arg4[%c0_i32_134, %c0_i32_135, %c0_i32_136, %c0_i32_137] : memref<2x5x128x128xbf16, #tpu.memory_space<vmem>> -> memref<1x5x128x128xbf16, #tpu.memory_space<vmem>>
    %130 = tpu.memref_squeeze %129 : memref<1x5x128x128xbf16, #tpu.memory_space<vmem>> -> memref<5x128x128xbf16, #tpu.memory_space<vmem>>
    %c2_138 = arith.constant 2 : index
    %c0_139 = arith.constant 0 : index
    %c0_140 = arith.constant 0 : index
    %131 = vector.load %130[%c2_138, %c0_139, %c0_140] : memref<5x128x128xbf16, #tpu.memory_space<vmem>>, vector<1x128x128xbf16>
    %132 = vector.shape_cast %131 : vector<1x128x128xbf16> to vector<128x128xbf16>
    %cst_141 = arith.constant dense<0.000000e+00> : vector<40x128xf32>
    %133 = tpu.matmul %128, %132, %cst_141 {dimension_numbers = #tpu.dot_dimension_numbers<[1], [0], [0], [1], [0, 0, 1, 1], [], []>} : vector<40x128xbf16>, vector<128x128xbf16>, vector<40x128xf32> -> vector<40x128xf32>
    %134 = arith.addf %126, %133 : vector<40x128xf32>
    %c9_142 = arith.constant 9 : index
    %c0_143 = arith.constant 0 : index
    %135 = vector.load %arg12[%c9_142, %c0_143] : memref<50x128xf32, #tpu.memory_space<vmem>>, vector<40x128xf32>
    %136 = arith.truncf %135 : vector<40x128xf32> to vector<40x128xbf16>
    %c0_i32_144 = arith.constant 0 : i32
    %c0_i32_145 = arith.constant 0 : i32
    %c0_i32_146 = arith.constant 0 : i32
    %c0_i32_147 = arith.constant 0 : i32
    %137 = tpu.memref_slice %arg4[%c0_i32_144, %c0_i32_145, %c0_i32_146, %c0_i32_147] : memref<2x5x128x128xbf16, #tpu.memory_space<vmem>> -> memref<1x5x128x128xbf16, #tpu.memory_space<vmem>>
    %138 = tpu.memref_squeeze %137 : memref<1x5x128x128xbf16, #tpu.memory_space<vmem>> -> memref<5x128x128xbf16, #tpu.memory_space<vmem>>
    %c3_148 = arith.constant 3 : index
    %c0_149 = arith.constant 0 : index
    %c0_150 = arith.constant 0 : index
    %139 = vector.load %138[%c3_148, %c0_149, %c0_150] : memref<5x128x128xbf16, #tpu.memory_space<vmem>>, vector<1x128x128xbf16>
    %140 = vector.shape_cast %139 : vector<1x128x128xbf16> to vector<128x128xbf16>
    %cst_151 = arith.constant dense<0.000000e+00> : vector<40x128xf32>
    %141 = tpu.matmul %136, %140, %cst_151 {dimension_numbers = #tpu.dot_dimension_numbers<[1], [0], [0], [1], [0, 0, 1, 1], [], []>} : vector<40x128xbf16>, vector<128x128xbf16>, vector<40x128xf32> -> vector<40x128xf32>
    %142 = arith.addf %134, %141 : vector<40x128xf32>
    %c10_152 = arith.constant 10 : index
    %c0_153 = arith.constant 0 : index
    %143 = vector.load %arg12[%c10_152, %c0_153] : memref<50x128xf32, #tpu.memory_space<vmem>>, vector<40x128xf32>
    %144 = arith.truncf %143 : vector<40x128xf32> to vector<40x128xbf16>
    %c0_i32_154 = arith.constant 0 : i32
    %c0_i32_155 = arith.constant 0 : i32
    %c0_i32_156 = arith.constant 0 : i32
    %c0_i32_157 = arith.constant 0 : i32
    %145 = tpu.memref_slice %arg4[%c0_i32_154, %c0_i32_155, %c0_i32_156, %c0_i32_157] : memref<2x5x128x128xbf16, #tpu.memory_space<vmem>> -> memref<1x5x128x128xbf16, #tpu.memory_space<vmem>>
    %146 = tpu.memref_squeeze %145 : memref<1x5x128x128xbf16, #tpu.memory_space<vmem>> -> memref<5x128x128xbf16, #tpu.memory_space<vmem>>
    %c4_158 = arith.constant 4 : index
    %c0_159 = arith.constant 0 : index
    %c0_160 = arith.constant 0 : index
    %147 = vector.load %146[%c4_158, %c0_159, %c0_160] : memref<5x128x128xbf16, #tpu.memory_space<vmem>>, vector<1x128x128xbf16>
    %148 = vector.shape_cast %147 : vector<1x128x128xbf16> to vector<128x128xbf16>
    %cst_161 = arith.constant dense<0.000000e+00> : vector<40x128xf32>
    %149 = tpu.matmul %144, %148, %cst_161 {dimension_numbers = #tpu.dot_dimension_numbers<[1], [0], [0], [1], [0, 0, 1, 1], [], []>} : vector<40x128xbf16>, vector<128x128xbf16>, vector<40x128xf32> -> vector<40x128xf32>
    %150 = arith.addf %142, %149 : vector<40x128xf32>
    %cst_162 = arith.constant 1.000000e-01 : f32
    %151 = vector.broadcast %cst_162 : f32 to vector<40x128xf32>
    %152 = arith.mulf %151, %150 : vector<40x128xf32>
    %153 = arith.addf %53, %152 : vector<40x128xf32>
    %154 = vector.broadcast %22 : vector<40x1xf32> to vector<40x128xf32>
    %155 = arith.mulf %153, %154 : vector<40x128xf32>
    %c8_163 = arith.constant 8 : index
    %c0_164 = arith.constant 0 : index
    %156 = vector.load %arg11[%c8_163, %c0_164] : memref<50x128xf32, #tpu.memory_space<vmem>>, vector<40x128xf32>
    tpu.vector_store %arg11[%c8_163, %c0_164], %155 {strides = array<i32>} : memref<50x128xf32, #tpu.memory_space<vmem>>, vector<40x128xf32>,
    %cst_165 = arith.constant 0.000000e+00 : f32
    %157 = vector.broadcast %cst_165 : f32 to vector<40x128xf32>
    %c6_166 = arith.constant 6 : index
    %c0_167 = arith.constant 0 : index
    %158 = vector.load %arg11[%c6_166, %c0_167] : memref<50x128xf32, #tpu.memory_space<vmem>>, vector<40x128xf32>
    %159 = arith.truncf %158 : vector<40x128xf32> to vector<40x128xbf16>
    %c1_i32 = arith.constant 1 : i32
    %c0_i32_168 = arith.constant 0 : i32
    %c0_i32_169 = arith.constant 0 : i32
    %c0_i32_170 = arith.constant 0 : i32
    %160 = tpu.memref_slice %arg3[%c1_i32, %c0_i32_168, %c0_i32_169, %c0_i32_170] : memref<2x5x128x128xbf16, #tpu.memory_space<vmem>> -> memref<1x5x128x128xbf16, #tpu.memory_space<vmem>>
    %161 = tpu.memref_squeeze %160 : memref<1x5x128x128xbf16, #tpu.memory_space<vmem>> -> memref<5x128x128xbf16, #tpu.memory_space<vmem>>
    %c0_171 = arith.constant 0 : index
    %c0_172 = arith.constant 0 : index
    %c0_173 = arith.constant 0 : index
    %162 = vector.load %161[%c0_171, %c0_172, %c0_173] : memref<5x128x128xbf16, #tpu.memory_space<vmem>>, vector<1x128x128xbf16>
    %163 = vector.shape_cast %162 : vector<1x128x128xbf16> to vector<128x128xbf16>
    %cst_174 = arith.constant dense<0.000000e+00> : vector<40x128xf32>
    %164 = tpu.matmul %159, %163, %cst_174 {dimension_numbers = #tpu.dot_dimension_numbers<[1], [0], [0], [1], [0, 0, 1, 1], [], []>} : vector<40x128xbf16>, vector<128x128xbf16>, vector<40x128xf32> -> vector<40x128xf32>
    %165 = arith.addf %157, %164 : vector<40x128xf32>
    %c7_175 = arith.constant 7 : index
    %c0_176 = arith.constant 0 : index
    %166 = vector.load %arg11[%c7_175, %c0_176] : memref<50x128xf32, #tpu.memory_space<vmem>>, vector<40x128xf32>
    %167 = arith.truncf %166 : vector<40x128xf32> to vector<40x128xbf16>
    %c1_i32_177 = arith.constant 1 : i32
    %c0_i32_178 = arith.constant 0 : i32
    %c0_i32_179 = arith.constant 0 : i32
    %c0_i32_180 = arith.constant 0 : i32
    %168 = tpu.memref_slice %arg3[%c1_i32_177, %c0_i32_178, %c0_i32_179, %c0_i32_180] : memref<2x5x128x128xbf16, #tpu.memory_space<vmem>> -> memref<1x5x128x128xbf16, #tpu.memory_space<vmem>>
    %169 = tpu.memref_squeeze %168 : memref<1x5x128x128xbf16, #tpu.memory_space<vmem>> -> memref<5x128x128xbf16, #tpu.memory_space<vmem>>
    %c1_181 = arith.constant 1 : index
    %c0_182 = arith.constant 0 : index
    %c0_183 = arith.constant 0 : index
    %170 = vector.load %169[%c1_181, %c0_182, %c0_183] : memref<5x128x128xbf16, #tpu.memory_space<vmem>>, vector<1x128x128xbf16>
    %171 = vector.shape_cast %170 : vector<1x128x128xbf16> to vector<128x128xbf16>
    %cst_184 = arith.constant dense<0.000000e+00> : vector<40x128xf32>
    %172 = tpu.matmul %167, %171, %cst_184 {dimension_numbers = #tpu.dot_dimension_numbers<[1], [0], [0], [1], [0, 0, 1, 1], [], []>} : vector<40x128xbf16>, vector<128x128xbf16>, vector<40x128xf32> -> vector<40x128xf32>
    %173 = arith.addf %165, %172 : vector<40x128xf32>
    %c8_185 = arith.constant 8 : index
    %c0_186 = arith.constant 0 : index
    %174 = vector.load %arg11[%c8_185, %c0_186] : memref<50x128xf32, #tpu.memory_space<vmem>>, vector<40x128xf32>
    %175 = arith.truncf %174 : vector<40x128xf32> to vector<40x128xbf16>
    %c1_i32_187 = arith.constant 1 : i32
    %c0_i32_188 = arith.constant 0 : i32
    %c0_i32_189 = arith.constant 0 : i32
    %c0_i32_190 = arith.constant 0 : i32
    %176 = tpu.memref_slice %arg3[%c1_i32_187, %c0_i32_188, %c0_i32_189, %c0_i32_190] : memref<2x5x128x128xbf16, #tpu.memory_space<vmem>> -> memref<1x5x128x128xbf16, #tpu.memory_space<vmem>>
    %177 = tpu.memref_squeeze %176 : memref<1x5x128x128xbf16, #tpu.memory_space<vmem>> -> memref<5x128x128xbf16, #tpu.memory_space<vmem>>
    %c2_191 = arith.constant 2 : index
    %c0_192 = arith.constant 0 : index
    %c0_193 = arith.constant 0 : index
    %178 = vector.load %177[%c2_191, %c0_192, %c0_193] : memref<5x128x128xbf16, #tpu.memory_space<vmem>>, vector<1x128x128xbf16>
    %179 = vector.shape_cast %178 : vector<1x128x128xbf16> to vector<128x128xbf16>
    %cst_194 = arith.constant dense<0.000000e+00> : vector<40x128xf32>
    %180 = tpu.matmul %175, %179, %cst_194 {dimension_numbers = #tpu.dot_dimension_numbers<[1], [0], [0], [1], [0, 0, 1, 1], [], []>} : vector<40x128xbf16>, vector<128x128xbf16>, vector<40x128xf32> -> vector<40x128xf32>
    %181 = arith.addf %173, %180 : vector<40x128xf32>
    %c9_195 = arith.constant 9 : index
    %c0_196 = arith.constant 0 : index
    %182 = vector.load %arg11[%c9_195, %c0_196] : memref<50x128xf32, #tpu.memory_space<vmem>>, vector<40x128xf32>
    %183 = arith.truncf %182 : vector<40x128xf32> to vector<40x128xbf16>
    %c1_i32_197 = arith.constant 1 : i32
    %c0_i32_198 = arith.constant 0 : i32
    %c0_i32_199 = arith.constant 0 : i32
    %c0_i32_200 = arith.constant 0 : i32
    %184 = tpu.memref_slice %arg3[%c1_i32_197, %c0_i32_198, %c0_i32_199, %c0_i32_200] : memref<2x5x128x128xbf16, #tpu.memory_space<vmem>> -> memref<1x5x128x128xbf16, #tpu.memory_space<vmem>>
    %185 = tpu.memref_squeeze %184 : memref<1x5x128x128xbf16, #tpu.memory_space<vmem>> -> memref<5x128x128xbf16, #tpu.memory_space<vmem>>
    %c3_201 = arith.constant 3 : index
    %c0_202 = arith.constant 0 : index
    %c0_203 = arith.constant 0 : index
    %186 = vector.load %185[%c3_201, %c0_202, %c0_203] : memref<5x128x128xbf16, #tpu.memory_space<vmem>>, vector<1x128x128xbf16>
    %187 = vector.shape_cast %186 : vector<1x128x128xbf16> to vector<128x128xbf16>
    %cst_204 = arith.constant dense<0.000000e+00> : vector<40x128xf32>
    %188 = tpu.matmul %183, %187, %cst_204 {dimension_numbers = #tpu.dot_dimension_numbers<[1], [0], [0], [1], [0, 0, 1, 1], [], []>} : vector<40x128xbf16>, vector<128x128xbf16>, vector<40x128xf32> -> vector<40x128xf32>
    %189 = arith.addf %181, %188 : vector<40x128xf32>
    %c10_205 = arith.constant 10 : index
    %c0_206 = arith.constant 0 : index
    %190 = vector.load %arg11[%c10_205, %c0_206] : memref<50x128xf32, #tpu.memory_space<vmem>>, vector<40x128xf32>
    %191 = arith.truncf %190 : vector<40x128xf32> to vector<40x128xbf16>
    %c1_i32_207 = arith.constant 1 : i32
    %c0_i32_208 = arith.constant 0 : i32
    %c0_i32_209 = arith.constant 0 : i32
    %c0_i32_210 = arith.constant 0 : i32
    %192 = tpu.memref_slice %arg3[%c1_i32_207, %c0_i32_208, %c0_i32_209, %c0_i32_210] : memref<2x5x128x128xbf16, #tpu.memory_space<vmem>> -> memref<1x5x128x128xbf16, #tpu.memory_space<vmem>>
    %193 = tpu.memref_squeeze %192 : memref<1x5x128x128xbf16, #tpu.memory_space<vmem>> -> memref<5x128x128xbf16, #tpu.memory_space<vmem>>
    %c4_211 = arith.constant 4 : index
    %c0_212 = arith.constant 0 : index
    %c0_213 = arith.constant 0 : index
    %194 = vector.load %193[%c4_211, %c0_212, %c0_213] : memref<5x128x128xbf16, #tpu.memory_space<vmem>>, vector<1x128x128xbf16>
    %195 = vector.shape_cast %194 : vector<1x128x128xbf16> to vector<128x128xbf16>
    %cst_214 = arith.constant dense<0.000000e+00> : vector<40x128xf32>
    %196 = tpu.matmul %191, %195, %cst_214 {dimension_numbers = #tpu.dot_dimension_numbers<[1], [0], [0], [1], [0, 0, 1, 1], [], []>} : vector<40x128xbf16>, vector<128x128xbf16>, vector<40x128xf32> -> vector<40x128xf32>
    %197 = arith.addf %189, %196 : vector<40x128xf32>
    %198 = arith.mulf %197, %197 : vector<40x128xf32>
    %cst_215 = arith.constant dense<0.000000e+00> : vector<40x128xf32>
    %199 = tpu.matmul %198, %57, %cst_215 {dimension_numbers = #tpu.dot_dimension_numbers<[1], [0], [0], [1], [0, 0, 1, 1], [], []>, precision = #tpu.contract_precision<fp32>} : vector<40x128xf32>, vector<128x128xf32>, vector<40x128xf32> -> vector<40x128xf32>
    %cst_216 = arith.constant 1.000000e-03 : f32
    %200 = vector.broadcast %cst_216 : f32 to vector<40x128xf32>
    %201 = arith.addf %199, %200 : vector<40x128xf32>
    %202 = math.rsqrt %201 : vector<40x128xf32>
    %203 = arith.mulf %197, %202 : vector<40x128xf32>
    %cst_217 = arith.constant 0.000000e+00 : f32
    %204 = vector.broadcast %cst_217 : f32 to vector<40x128xf32>
    %205 = arith.maximumf %203, %204 : vector<40x128xf32>
    %206 = vector.broadcast %22 : vector<40x1xf32> to vector<40x128xf32>
    %207 = arith.mulf %205, %206 : vector<40x128xf32>
    %c8_218 = arith.constant 8 : index
    %c0_219 = arith.constant 0 : index
    %208 = vector.load %arg12[%c8_218, %c0_219] : memref<50x128xf32, #tpu.memory_space<vmem>>, vector<40x128xf32>
    tpu.vector_store %arg12[%c8_218, %c0_219], %207 {strides = array<i32>} : memref<50x128xf32, #tpu.memory_space<vmem>>, vector<40x128xf32>,
    %cst_220 = arith.constant 0.000000e+00 : f32
    %209 = vector.broadcast %cst_220 : f32 to vector<40x128xf32>
    %c6_221 = arith.constant 6 : index
    %c0_222 = arith.constant 0 : index
    %210 = vector.load %arg12[%c6_221, %c0_222] : memref<50x128xf32, #tpu.memory_space<vmem>>, vector<40x128xf32>
    %211 = arith.truncf %210 : vector<40x128xf32> to vector<40x128xbf16>
    %c1_i32_223 = arith.constant 1 : i32
    %c0_i32_224 = arith.constant 0 : i32
    %c0_i32_225 = arith.constant 0 : i32
    %c0_i32_226 = arith.constant 0 : i32
    %212 = tpu.memref_slice %arg4[%c1_i32_223, %c0_i32_224, %c0_i32_225, %c0_i32_226] : memref<2x5x128x128xbf16, #tpu.memory_space<vmem>> -> memref<1x5x128x128xbf16, #tpu.memory_space<vmem>>
    %213 = tpu.memref_squeeze %212 : memref<1x5x128x128xbf16, #tpu.memory_space<vmem>> -> memref<5x128x128xbf16, #tpu.memory_space<vmem>>
    %c0_227 = arith.constant 0 : index
    %c0_228 = arith.constant 0 : index
    %c0_229 = arith.constant 0 : index
    %214 = vector.load %213[%c0_227, %c0_228, %c0_229] : memref<5x128x128xbf16, #tpu.memory_space<vmem>>, vector<1x128x128xbf16>
    %215 = vector.shape_cast %214 : vector<1x128x128xbf16> to vector<128x128xbf16>
    %cst_230 = arith.constant dense<0.000000e+00> : vector<40x128xf32>
    %216 = tpu.matmul %211, %215, %cst_230 {dimension_numbers = #tpu.dot_dimension_numbers<[1], [0], [0], [1], [0, 0, 1, 1], [], []>} : vector<40x128xbf16>, vector<128x128xbf16>, vector<40x128xf32> -> vector<40x128xf32>
    %217 = arith.addf %209, %216 : vector<40x128xf32>
    %c7_231 = arith.constant 7 : index
    %c0_232 = arith.constant 0 : index
    %218 = vector.load %arg12[%c7_231, %c0_232] : memref<50x128xf32, #tpu.memory_space<vmem>>, vector<40x128xf32>
    %219 = arith.truncf %218 : vector<40x128xf32> to vector<40x128xbf16>
    %c1_i32_233 = arith.constant 1 : i32
    %c0_i32_234 = arith.constant 0 : i32
    %c0_i32_235 = arith.constant 0 : i32
    %c0_i32_236 = arith.constant 0 : i32
    %220 = tpu.memref_slice %arg4[%c1_i32_233, %c0_i32_234, %c0_i32_235, %c0_i32_236] : memref<2x5x128x128xbf16, #tpu.memory_space<vmem>> -> memref<1x5x128x128xbf16, #tpu.memory_space<vmem>>
    %221 = tpu.memref_squeeze %220 : memref<1x5x128x128xbf16, #tpu.memory_space<vmem>> -> memref<5x128x128xbf16, #tpu.memory_space<vmem>>
    %c1_237 = arith.constant 1 : index
    %c0_238 = arith.constant 0 : index
    %c0_239 = arith.constant 0 : index
    %222 = vector.load %221[%c1_237, %c0_238, %c0_239] : memref<5x128x128xbf16, #tpu.memory_space<vmem>>, vector<1x128x128xbf16>
    %223 = vector.shape_cast %222 : vector<1x128x128xbf16> to vector<128x128xbf16>
    %cst_240 = arith.constant dense<0.000000e+00> : vector<40x128xf32>
    %224 = tpu.matmul %219, %223, %cst_240 {dimension_numbers = #tpu.dot_dimension_numbers<[1], [0], [0], [1], [0, 0, 1, 1], [], []>} : vector<40x128xbf16>, vector<128x128xbf16>, vector<40x128xf32> -> vector<40x128xf32>
    %225 = arith.addf %217, %224 : vector<40x128xf32>
    %c8_241 = arith.constant 8 : index
    %c0_242 = arith.constant 0 : index
    %226 = vector.load %arg12[%c8_241, %c0_242] : memref<50x128xf32, #tpu.memory_space<vmem>>, vector<40x128xf32>
    %227 = arith.truncf %226 : vector<40x128xf32> to vector<40x128xbf16>
    %c1_i32_243 = arith.constant 1 : i32
    %c0_i32_244 = arith.constant 0 : i32
    %c0_i32_245 = arith.constant 0 : i32
    %c0_i32_246 = arith.constant 0 : i32
    %228 = tpu.memref_slice %arg4[%c1_i32_243, %c0_i32_244, %c0_i32_245, %c0_i32_246] : memref<2x5x128x128xbf16, #tpu.memory_space<vmem>> -> memref<1x5x128x128xbf16, #tpu.memory_space<vmem>>
    %229 = tpu.memref_squeeze %228 : memref<1x5x128x128xbf16, #tpu.memory_space<vmem>> -> memref<5x128x128xbf16, #tpu.memory_space<vmem>>
    %c2_247 = arith.constant 2 : index
    %c0_248 = arith.constant 0 : index
    %c0_249 = arith.constant 0 : index
    %230 = vector.load %229[%c2_247, %c0_248, %c0_249] : memref<5x128x128xbf16, #tpu.memory_space<vmem>>, vector<1x128x128xbf16>
    %231 = vector.shape_cast %230 : vector<1x128x128xbf16> to vector<128x128xbf16>
    %cst_250 = arith.constant dense<0.000000e+00> : vector<40x128xf32>
    %232 = tpu.matmul %227, %231, %cst_250 {dimension_numbers = #tpu.dot_dimension_numbers<[1], [0], [0], [1], [0, 0, 1, 1], [], []>} : vector<40x128xbf16>, vector<128x128xbf16>, vector<40x128xf32> -> vector<40x128xf32>
    %233 = arith.addf %225, %232 : vector<40x128xf32>
    %c9_251 = arith.constant 9 : index
    %c0_252 = arith.constant 0 : index
    %234 = vector.load %arg12[%c9_251, %c0_252] : memref<50x128xf32, #tpu.memory_space<vmem>>, vector<40x128xf32>
    %235 = arith.truncf %234 : vector<40x128xf32> to vector<40x128xbf16>
    %c1_i32_253 = arith.constant 1 : i32
    %c0_i32_254 = arith.constant 0 : i32
    %c0_i32_255 = arith.constant 0 : i32
    %c0_i32_256 = arith.constant 0 : i32
    %236 = tpu.memref_slice %arg4[%c1_i32_253, %c0_i32_254, %c0_i32_255, %c0_i32_256] : memref<2x5x128x128xbf16, #tpu.memory_space<vmem>> -> memref<1x5x128x128xbf16, #tpu.memory_space<vmem>>
    %237 = tpu.memref_squeeze %236 : memref<1x5x128x128xbf16, #tpu.memory_space<vmem>> -> memref<5x128x128xbf16, #tpu.memory_space<vmem>>
    %c3_257 = arith.constant 3 : index
    %c0_258 = arith.constant 0 : index
    %c0_259 = arith.constant 0 : index
    %238 = vector.load %237[%c3_257, %c0_258, %c0_259] : memref<5x128x128xbf16, #tpu.memory_space<vmem>>, vector<1x128x128xbf16>
    %239 = vector.shape_cast %238 : vector<1x128x128xbf16> to vector<128x128xbf16>
    %cst_260 = arith.constant dense<0.000000e+00> : vector<40x128xf32>
    %240 = tpu.matmul %235, %239, %cst_260 {dimension_numbers = #tpu.dot_dimension_numbers<[1], [0], [0], [1], [0, 0, 1, 1], [], []>} : vector<40x128xbf16>, vector<128x128xbf16>, vector<40x128xf32> -> vector<40x128xf32>
    %241 = arith.addf %233, %240 : vector<40x128xf32>
    %c10_261 = arith.constant 10 : index
    %c0_262 = arith.constant 0 : index
    %242 = vector.load %arg12[%c10_261, %c0_262] : memref<50x128xf32, #tpu.memory_space<vmem>>, vector<40x128xf32>
    %243 = arith.truncf %242 : vector<40x128xf32> to vector<40x128xbf16>
    %c1_i32_263 = arith.constant 1 : i32
    %c0_i32_264 = arith.constant 0 : i32
    %c0_i32_265 = arith.constant 0 : i32
    %c0_i32_266 = arith.constant 0 : i32
    %244 = tpu.memref_slice %arg4[%c1_i32_263, %c0_i32_264, %c0_i32_265, %c0_i32_266] : memref<2x5x128x128xbf16, #tpu.memory_space<vmem>> -> memref<1x5x128x128xbf16, #tpu.memory_space<vmem>>
    %245 = tpu.memref_squeeze %244 : memref<1x5x128x128xbf16, #tpu.memory_space<vmem>> -> memref<5x128x128xbf16, #tpu.memory_space<vmem>>
    %c4_267 = arith.constant 4 : index
    %c0_268 = arith.constant 0 : index
    %c0_269 = arith.constant 0 : index
    %246 = vector.load %245[%c4_267, %c0_268, %c0_269] : memref<5x128x128xbf16, #tpu.memory_space<vmem>>, vector<1x128x128xbf16>
    %247 = vector.shape_cast %246 : vector<1x128x128xbf16> to vector<128x128xbf16>
    %cst_270 = arith.constant dense<0.000000e+00> : vector<40x128xf32>
    %248 = tpu.matmul %243, %247, %cst_270 {dimension_numbers = #tpu.dot_dimension_numbers<[1], [0], [0], [1], [0, 0, 1, 1], [], []>} : vector<40x128xbf16>, vector<128x128xbf16>, vector<40x128xf32> -> vector<40x128xf32>
    %249 = arith.addf %241, %248 : vector<40x128xf32>
    %cst_271 = arith.constant 1.000000e-01 : f32
    %250 = vector.broadcast %cst_271 : f32 to vector<40x128xf32>
    %251 = arith.mulf %250, %249 : vector<40x128xf32>
    %252 = arith.addf %153, %251 : vector<40x128xf32>
    %c0_272 = arith.constant 0 : index
    %c0_273 = arith.constant 0 : index
    %253 = vector.load %arg8[%c0_272, %c0_273] : memref<2x40xf32, #tpu.memory_space<vmem>>, vector<2x40xf32>
    %cst_274 = arith.constant dense<0.000000e+00> : vector<2x128xf32>
    %254 = tpu.matmul %253, %252, %cst_274 {dimension_numbers = #tpu.dot_dimension_numbers<[1], [0], [0], [1], [0, 0, 1, 1], [], []>, precision = #tpu.contract_precision<fp32>} : vector<2x40xf32>, vector<40x128xf32>, vector<2x128xf32> -> vector<2x128xf32>
    %c0_275 = arith.constant 0 : index
    %c0_276 = arith.constant 0 : index
    %255 = vector.load %arg6[%c0_275, %c0_276] : memref<128x4xf32, #tpu.memory_space<vmem>>, vector<128x4xf32>
    %cst_277 = arith.constant dense<0.000000e+00> : vector<2x4xf32>
    %256 = tpu.matmul %254, %255, %cst_277 {dimension_numbers = #tpu.dot_dimension_numbers<[1], [0], [0], [1], [0, 0, 1, 1], [], []>, precision = #tpu.contract_precision<fp32>} : vector<2x128xf32>, vector<128x4xf32>, vector<2x4xf32> -> vector<2x4xf32>
    %257 = vector.shape_cast %256 : vector<2x4xf32> to vector<1x2x4xf32>
    %c0_278 = arith.constant 0 : index
    %c0_279 = arith.constant 0 : index
    %c0_280 = arith.constant 0 : index
    %258 = vector.load %arg9[%c0_278, %c0_279, %c0_280] : memref<1x2x4xf32, #tpu.memory_space<vmem>>, vector<1x2x4xf32>
    tpu.vector_store %arg9[%c0_278, %c0_279, %c0_280], %257 {strides = array<i32>} : memref<1x2x4xf32, #tpu.memory_space<vmem>>, vector<1x2x4xf32>,
    return
  }
  func.func @transform_0(%arg0: i32) -> (i32, i32, i32) {
    %c0_i32 = arith.constant 0 : i32
    %c0_i32_0 = arith.constant 0 : i32
    %c0_i32_1 = arith.constant 0 : i32
    return %arg0, %c0_i32, %c0_i32_0 : i32, i32, i32
  }
  func.func @transform_1(%arg0: i32) -> (i32, i32, i32) {
    %c0_i32 = arith.constant 0 : i32
    %c0_i32_0 = arith.constant 0 : i32
    %c0_i32_1 = arith.constant 0 : i32
    %c0_i32_2 = arith.constant 0 : i32
    return %c0_i32, %c0_i32_0, %c0_i32_1 : i32, i32, i32
  }
  func.func @transform_2(%arg0: i32) -> (i32, i32, i32, i32) {
    %c0_i32 = arith.constant 0 : i32
    %c0_i32_0 = arith.constant 0 : i32
    %c0_i32_1 = arith.constant 0 : i32
    %c0_i32_2 = arith.constant 0 : i32
    %c0_i32_3 = arith.constant 0 : i32
    return %c0_i32, %c0_i32_0, %c0_i32_1, %c0_i32_2 : i32, i32, i32, i32
  }
  func.func @transform_3(%arg0: i32) -> (i32, i32, i32, i32) {
    %c0_i32 = arith.constant 0 : i32
    %c0_i32_0 = arith.constant 0 : i32
    %c0_i32_1 = arith.constant 0 : i32
    %c0_i32_2 = arith.constant 0 : i32
    %c0_i32_3 = arith.constant 0 : i32
    return %c0_i32, %c0_i32_0, %c0_i32_1, %c0_i32_2 : i32, i32, i32, i32
  }
  func.func @transform_4(%arg0: i32) -> (i32, i32) {
    %c0_i32 = arith.constant 0 : i32
    %c0_i32_0 = arith.constant 0 : i32
    %c0_i32_1 = arith.constant 0 : i32
    return %c0_i32, %c0_i32_0 : i32, i32
  }
  func.func @transform_5(%arg0: i32) -> (i32, i32) {
    %c0_i32 = arith.constant 0 : i32
    %c0_i32_0 = arith.constant 0 : i32
    %c0_i32_1 = arith.constant 0 : i32
    return %c0_i32, %c0_i32_0 : i32, i32
  }
  func.func @transform_6(%arg0: i32) -> (i32, i32) {
    %c0_i32 = arith.constant 0 : i32
    %c0_i32_0 = arith.constant 0 : i32
    %c0_i32_1 = arith.constant 0 : i32
    return %c0_i32, %c0_i32_0 : i32, i32
  }
  func.func @transform_7(%arg0: i32) -> (i32, i32) {
    %c0_i32 = arith.constant 0 : i32
    %c0_i32_0 = arith.constant 0 : i32
    %c0_i32_1 = arith.constant 0 : i32
    return %c0_i32, %c0_i32_0 : i32, i32
  }
  func.func @transform_8(%arg0: i32) -> (i32, i32, i32) {
    %c0_i32 = arith.constant 0 : i32
    %c0_i32_0 = arith.constant 0 : i32
    %c0_i32_1 = arith.constant 0 : i32
    return %arg0, %c0_i32, %c0_i32_0 : i32, i32, i32
  }
}

</mosaic_0001>

<bundles_post_ra>
// kernel: tpu_custom_call.1
= control target key start
LH: loop header
LB: loop body
LE: loop exit
PB: predicated region body
PF: predicated region fallthrough
CT: control target
= control target key end

     0   :  { %13 = vsyncpa [#allocation6], 0  ;;  %s12479_s0 = inlined_call_operand.hbm [shape: f32[4,16,64], index: 0, kind: input, shape index: {}]   ;;  %s12480_s1 = inlined_call_operand.vmem [shape: bf16[5,64,128], index: 1, kind: input, shape index: {}]   ;;  %s12481_s2 = inlined_call_operand.hbm [shape: bf16[2,5,128,128], index: 2, kind: input, shape index: {}]   ;;  %s12482_s3 = inlined_call_operand.hbm [shape: bf16[2,5,128,128], index: 3, kind: input, shape index: {}]   ;;  %s12483_s4 = inlined_call_operand.hbm [shape: f32[128,128], index: 4, kind: input, shape index: {}]   ;;  %s12484_s5 = inlined_call_operand.vmem [shape: f32[128,4], index: 5, kind: input, shape index: {}]   ;;  %s12485_s6 = inlined_call_operand.vmem [shape: f32[40,1], index: 6, kind: input, shape index: {}]   ;;  %s12486_s7 = inlined_call_operand.vmem [shape: f32[2,40], index: 7, kind: input, shape index: {}]   ;;  %s12487_s8 = inlined_call_operand.hbm [shape: f32[2,2,4], index: 8, kind: output, shape index: {}]  }
   0x1   :  { %15 = vsyncpa [#allocation6 + $0x1], 0 }
   0x2   :  { %16 = vsyncpa [#allocation9], 0 }
   0x3   :  { %17 = vsyncpa [#allocation12], 0 }
   0x4   :  { %18 = vsyncpa [#allocation7], 0 }
   0x5   :  { %20 = vsyncpa [#allocation7 + $0x1], 0  ;;  %s10406_s27 = smov 0   ;;  %s10408_s28 = smov 0  }
   0x6   :  { %s10410_s29 = smov 0   ;;  %s10412_s30 = smov 0  }
   0x7 LB: > { %12541 = sst [smem:[#allocation18_spill]] %s10334_s27  ;;  %s10427_s9 = sadd.s32 4294967295, %s10346_s30   ;;  %s10346_s30 = sphi %s10412_s30, %s12622_s30   ;;  %s10342_s29 = sphi %s10410_s29, %s12621_s29   ;;  %s10338_s28 = sphi %s10408_s28, %s12620_s28   ;;  %s10334_s27 = sphi %s10406_s27, %s12619_s27  }
   0x8   : > { %s6628_s10 = sadd.s32 4294967294, %s10346_s30   ;;  %p46_p0 = scmp.ne.s32.totalorder %s10338_s28, %s10334_s27 }
   0x9   : > { %p12488_p1 = scmp.eq.s32.totalorder %s10427_s9, 0  ;;  %p223_p3 = scmp.eq.s32.totalorder %s6628_s10, 1 }
   0xa   : > { %p6629_p5 = scmp.ge.s32.totalorder %s10346_s30, 1  ;;  %p230_p7 = scmp.lt.s32.totalorder %s10346_s30, 3 }
   0xb   : > { %p10436_p4 = por %p12488_p1, %p46_p0  ;;  %p10441_p6 = por %p223_p3, %p46_p0 }
   0xc   : > { %p10446_p8 = pnand %p6629_p5, %p230_p7  ;;  %s10348_s14 = smov [#allocation8]  }
   0xd   : > { %s12542_s11 = scalar_select %p10436_p4, 1, 0 }
   0xe   : > { %s12543_s12 = scalar_select %p10441_p6, 1, 0 }
   0xf   : > { %s12545_s13 = scalar_select %p10446_p8, 1, 0 }
  0x10   : > { %12544 = sst [smem:[#allocation19_spill]] %s12543_s12  ;;  %s245_s15 = sshll.u32 %s10348_s14, 4  ;;  %s10450_s15 = int_to_ptr.vmem [resolvable:$true] %s245_s15 }
  0x11   : > { %p9883_p9 = pneg %p10446_p8  ;;  %s10349_s17 = smov [#allocation10]  }
  0x12   : > { %s258_s18 = sshll.u32 %s10349_s17, 4  ;;  %s10350_s19 = smov [#allocation11]   ;;  %s10461_s18 = int_to_ptr.vmem [resolvable:$true] %s258_s18 }
  0x13   : > { %p10457_p11 = pnand %p9883_p9, %p12488_p1  ;;  %s10463_s20 = sshll.u32 %s10350_s19, 4  ;;  %s272_s20 = int_to_ptr.vmem [resolvable:$true] %s10463_s20 }
  0x14   : > { %s10158_s23 = scalar_lea.hbm %s12481_s2, 10240 }
  0x15   : > { %p10159_p12 = scmp.ne.s32.totalorder %s12481_s2, %s10158_s23  ;;  %p10473_p13 = pneg %p10457_p11 }
  0x16   : > { %p10165_p5 = scmp.lt.u32.totalorder %s10158_s23, %s12481_s2 }
  0x17   : > { %p10161_p0 = pnand %p10473_p13, %p10159_p12 }
  0x19   : > { %p10162_p3 = pneg %p10161_p0 }
  0x1b   : > { %p10167_p7 = pnand %p10165_p5, %p10162_p3 }
  0x1d   : > { %10170 = shalt.err (!%p10167_p7)
}
  0x1e   : > { %s10171_s17 = scalar_lea.vmem %s10450_s15, 10240  ;;  %p10179_p2 = scmp.lt.s32.totalorder %s10450_s15, %s10450_s15 }
  0x1f   : > { %p10172_p9 = scmp.ne.s32.totalorder %s10450_s15, %s10171_s17  ;;  %p10180_p6 = scmp.lt.s32.totalorder %s10171_s17, %s10171_s17 }
  0x21   : > { %p10174_p10 = pnand %p10172_p9, %p10473_p13  ;;  %p10181_p12 = por %p10180_p6, %p10179_p2 }
  0x23   : > { %p10175_p1 = pneg %p10174_p10 }
  0x25   : > { %p10182_p0 = pnand %p10181_p12, %p10175_p1 }
  0x27   : > { %10185 = shalt.err (!%p10182_p0)
}
  0x28   : > { %s10351_s19 = smov 64   ;;  %s10352_s21 = smov 4  }
  0x29   : > { %9886 = dma.hbm_to_vmem [thread:$0]  (!%p10457_p11), %s12481_s2, 10240, %s10450_s15, [#allocation9], %s10351_s19, %s10351_s19, %s10352_s21  }
  0x2a   : > { %s10186_s10 = scalar_lea.hbm %s12482_s3, 10240 }
  0x2b   : > { %p10187_p2 = scmp.ne.s32.totalorder %s12482_s3, %s10186_s10  ;;  %p10193_p10 = scmp.lt.u32.totalorder %s10186_s10, %s12482_s3 }
  0x2d   : > { %p10189_p1 = pnand %p10187_p2, %p10473_p13 }
  0x2f   : > { %p10190_p6 = pneg %p10189_p1 }
  0x31   : > { %p10195_p3 = pnand %p10193_p10, %p10190_p6 }
  0x33   : > { %10198 = shalt.err (!%p10195_p3)
}
  0x34   : > { %s10199_s15 = scalar_lea.vmem %s10461_s18, 10240  ;;  %p10207_p12 = scmp.lt.s32.totalorder %s10461_s18, %s10461_s18 }
  0x35   : > { %p10200_p5 = scmp.ne.s32.totalorder %s10461_s18, %s10199_s15  ;;  %p10208_p0 = scmp.lt.s32.totalorder %s10199_s15, %s10199_s15 }
  0x37   : > { %p10202_p7 = pnand %p10200_p5, %p10473_p13  ;;  %p10209_p2 = por %p10208_p0, %p10207_p12 }
  0x39   : > { %p10203_p9 = pneg %p10202_p7 }
  0x3b   : > { %p10210_p1 = pnand %p10209_p2, %p10203_p9 }
  0x3d   : > { %10213 = shalt.err (!%p10210_p1)
}
  0x3e   : > { %9889 = dma.hbm_to_vmem [thread:$0]  (!%p10457_p11), %s12482_s3, 10240, %s10461_s18, [#allocation9], %s10351_s19, %s10351_s19, %s10352_s21  }
  0x3f   : > { %s10214_s24 = scalar_lea.hbm %s12483_s4, 2048 }
  0x40   : > { %p10215_p6 = scmp.ne.s32.totalorder %s12483_s4, %s10214_s24  ;;  %p10221_p5 = scmp.lt.u32.totalorder %s10214_s24, %s12483_s4 }
  0x42   : > { %p10217_p10 = pnand %p10215_p6, %p10473_p13 }
  0x44   : > { %p10218_p3 = pneg %p10217_p10 }
  0x46   : > { %p10223_p7 = pnand %p10221_p5, %p10218_p3 }
  0x48   : > { %10226 = shalt.err (!%p10223_p7)
}
  0x49   : > { %s10227_s15 = scalar_lea.vmem %s272_s20, 2048  ;;  %p10235_p2 = scmp.lt.s32.totalorder %s272_s20, %s272_s20 }
  0x4a   : > { %p10228_p9 = scmp.ne.s32.totalorder %s272_s20, %s10227_s15  ;;  %p10236_p1 = scmp.lt.s32.totalorder %s10227_s15, %s10227_s15 }
  0x4c   : > { %p10230_p12 = pnand %p10228_p9, %p10473_p13  ;;  %p10237_p4 = por %p10236_p1, %p10235_p2 }
  0x4e   : > { %p10231_p0 = pneg %p10230_p12 }
  0x50   : > { %p10238_p8 = pnand %p10237_p4, %p10231_p0 }
  0x52   : > { %10241 = shalt.err (!%p10238_p8)
}
  0x53   : > { %s10353_s18 = smov 128   ;;  %s10354_s26 = smov 8  }
  0x54   : > { %9892 = dma.hbm_to_vmem [thread:$0]  (!%p10457_p11), %s12483_s4, 2048, %s272_s20, [#allocation12], %s10353_s18, %s10353_s18, %s10354_s26  }
  0x55   : > { %s10540_s27 = sadd.s32 1, %s10346_s30   ;;  %s33_s22 = sadd.s32 1, %s10342_s29 }
  0x56   : > { %s30_s12 = ssub.s32 %s10346_s30, %s10540_s27  ;;  %p40_p8 = scmp.ne.s32.totalorder %s10342_s29, %s10338_s28 }
  0x57   : > { %p31_p4 = scmp.eq.s32.totalorder %s30_s12, 0  ;;  %p41_p13 = scmp.eq.s32.totalorder %s10346_s30, 0 }
  0x58   : > { %p9904_p6 = scmp.lt.s32.totalorder %s10346_s30, 2  ;;  %p12548_p3 = scmp.eq.s32.totalorder %s10427_s9, 1 }
  0x59   : > { %s10550_s23 = scalar_select %p31_p4, %s10342_s29, %s33_s22  }
  0x5a   : > { %p42_p10 = por %p41_p13, %p40_p8  ;;  %p10554_p5 = por %p12548_p3, %p40_p8 }
  0x5b   : > { %s294_s24 = sand.u32 1, %s10342_s29   ;;  %s6878_s25 = sshll.u32 %s10346_s30, 9 }
  0x5c   : > { %s6634_s20 = sshll.u32 %s294_s24, 5  ;;  %s10563_s17 = scalar_lea.hbm %s12479_s0, %s6878_s25 }
  0x5d   : > { %s298_s15 = scalar_lea.vmem [#allocation5], %s6634_s20  ;;  %p10565_p11 = pnand %p9904_p6, %p42_p10 }
  0x5e   : > { %s306_s19 = sshll.u32 %s298_s15, 4  ;;  %s10571_s12 = scalar_lea.sflag [#allocation6], %s294_s24  ;;  %s10569_s19 = int_to_ptr.vmem [resolvable:$true] %s306_s19 }
  0x5f   : > { %s10242_s22 = scalar_lea.hbm %s10563_s17, 512  ;;  %p10244_p9 = pneg %p10565_p11 }
  0x60   : > { %p10243_p7 = scmp.ne.s32.totalorder %s10563_s17, %s10242_s22  ;;  %s10247_s10 = scalar_lea.hbm %s12479_s0, 1024 }
  0x61   : > { %p10248_p2 = scmp.lt.u32.totalorder %s10563_s17, %s12479_s0  ;;  %p10249_p1 = scmp.lt.u32.totalorder %s10247_s10, %s10242_s22 }
  0x62   : > { %p10245_p12 = pnand %p10244_p9, %p10243_p7  ;;  %p10251_p8 = scmp.lt.u32.totalorder %s10242_s22, %s10563_s17 }
  0x63   : > { %p10250_p4 = por %p10249_p1, %p10248_p2 }
  0x64   : > { %p10246_p0 = pneg %p10245_p12 }
  0x65   : > { %p10252_p13 = por %p10251_p8, %p10250_p4 }
  0x67   : > { %p10253_p6 = pnand %p10252_p13, %p10246_p0 }
  0x69   : > { %10256 = shalt.err (!%p10253_p6)
}
  0x6a   : > { %s10257_s24 = scalar_lea.vmem %s10569_s19, 512  ;;  %s10355_s25 = smov [#allocation5]  }
  0x6b   : > { %p10258_p10 = scmp.ne.s32.totalorder %s10569_s19, %s10257_s24  ;;  %s10262_s20 = sshll.u32 %s10355_s25, 4  ;;  %s10263_s20 = int_to_ptr.vmem [resolvable:$false] %s10262_s20 }
  0x6c   : > { %s10264_s14 = scalar_lea.vmem %s10263_s20, 1024  ;;  %p10265_p12 = scmp.lt.s32.totalorder %s10569_s19, %s10263_s20 }
  0x6d   : > { %p10260_p3 = pnand %p10258_p10, %p10244_p9  ;;  %p10266_p2 = scmp.lt.s32.totalorder %s10264_s14, %s10257_s24 }
  0x6f   : > { %p10261_p7 = pneg %p10260_p3  ;;  %p10267_p1 = por %p10266_p2, %p10265_p12 }
  0x71   : > { %p10268_p4 = pnand %p10267_p1, %p10261_p7 }
  0x73   : > { %10271 = shalt.err (!%p10268_p4)
}
  0x74   : > { %9896 = dma.hbm_to_vmem [thread:$0]  (!%p10565_p11), %s10563_s17, 512, %s10569_s19, %s10571_s12, %s10353_s18, %s10353_s18, %s10354_s26  }
  0x75   : > { %p12551_p9 = scmp.ne.s32.totalorder %s12545_s13, 0 }
  0x77   : > { %318 = sbr.rel (%p12551_p9) target bundleno = 3301 (0xce5), region = 52 }
  0x7e   : > { %s10605_s22 = sand.u32 1, %s10338_s28   ;;  %p12552_p0 = scmp.ne.s32.totalorder %s12542_s11, 0 }
  0x7f   : > { %s6639_s10 = sshll.u32 %s10605_s22, 5  ;;  %s321_s15 = scalar_lea.sflag [#allocation6], %s10605_s22 }
  0x80   : > { %s10609_s24 = scalar_lea.vmem [#allocation5], %s6639_s10 }
  0x81   : > { %10317 = dma.done.wait (%p12552_p0), %s321_s15, 512  }
  0x82   : > { %10319 = vsyncadd (%p12552_p0), %s321_s15, 4294966784  ;;  %p12553_p11 = scmp.eq.s32.totalorder %s10427_s9, 0 }
  0x84   : > { %10321 = dma.done.wait (%p12553_p11), [#allocation9], 20480   ;;  %p12554_p8 = pmov %p12553_p11 }
  0x86   : > { %10323 = vsyncadd (%p12554_p8), [#allocation9], 4294946816  ;;  %p12555_p13 = pmov %p12554_p8 }
  0x87   : > { %p12556_p6 = pmov %p12554_p8 }
  0x88   : > { %10325 = dma.done.wait (%p12555_p13), [#allocation12], 2048  }
  0x89   : > { %10327 = vsyncadd (%p12556_p6), [#allocation12], 4294965248  ;;  %vm371_vm0 = vcmask 523264   ;;  %vm379_vm1 = vcmask 519168   ;;  %v10356_v0 = vmov 0.0   ;;  %vm10357_vm2 = vmmov 0  }
  0x8a   : > { %7524 = vmatprep.subr.bf16.mxu0 %v10356_v0  ;;  %375 = vst [vmem:[#allocation3] sm:$0xff] %v10356_v0  ;;  %376 = vst [vmem:[#allocation3 + $0x30] sm:$0x3] %v10356_v0  ;;  %7532 = vmatprep.mubr.msk.bf16.mxu0 %vm10357_vm2, %v10356_v0  ;;  %vm373_vm3 = vcmask 517120   ;;  %v9954_v1 = vld [vmem:[%s12480_s1 + $0x20] sm:$0xff]   ;;  %v9955_v2 = vld [vmem:[%s12480_s1 + $0x28] sm:$0xff]  }
  0x8b   : > { %377 = vst [vmem:[#allocation4] sm:$0xff] %v10356_v0  ;;  %378 = vst [vmem:[#allocation4 + $0x30] sm:$0x3] %v10356_v0  ;;  %7680 = vmatprep.subr.bf16.mxu1 %v10356_v0  ;;  %7696 = vmatprep.mubr.msk.bf16.mxu1 %vm10357_vm2, %v10356_v0  ;;  %v10358_v3 = vmov 0   ;;  %v382_v4 = vld [vmem:[%s10609_s24] sm:$0xff]  ;;  %v383_v5 = vld [vmem:[%s10609_s24 + $0x8] sm:$0xff] }
  0x8c   : > { %372 = vst.msk [vmem:[#allocation2] sm:$0xff] %vm371_vm0, %v10356_v0  ;;  %7525 = vmatpush3.bf16.msra.mxu0 %v9954_v1  ;;  %9952 = vset.pattern.permute.xlu0 %v10358_v3  ;;  %v9956_v6 = vld [vmem:[%s12480_s1 + $0x30] sm:$0xff]   ;;  %384 = vst.msk [vmem:[#allocation2 + $0x8] sm:$0xff] %vm371_vm0, %v382_v4  ;;  %v6644_v7 = vld [vmem:[%s10609_s24 + $0x10] sm:$0xff]  ;;  %vm5346_vm4 = vcmask 326656   ;;  %s6643_s11 = sshll.u32 %s10605_s22, 1 }
  0x8d   : > { %380 = vst.msk [vmem:[#allocation2 + $0x18] sm:$0xf] %vm379_vm1, %v10356_v0  ;;  %381 = vst.msk [vmem:[#allocation2 + $0x2c] sm:$0xf] %vm379_vm1, %v10356_v0  ;;  %7526 = vmatprep.subr.bf16.mxu0 %v10356_v0  ;;  %9953 = vset.pattern.permute.xlu1 %v10358_v3  ;;  %v6645_v8 = vld [vmem:[%s10609_s24 + $0x18] sm:$0xff]  ;;  %v9957_v9 = vld [vmem:[%s12480_s1 + $0x38] sm:$0xff]  }
  0x8e   : > { %374 = vst.msk [vmem:[#allocation2 + $0x30] sm:$0x3] %vm373_vm3, %v10356_v0  ;;  %v9958_v13 = vld [vmem:[%s12480_s1] sm:$0xff]   ;;  %v9959_v16 = vld [vmem:[%s12480_s1 + $0x8] sm:$0xff]   ;;  %v9960_v18 = vld [vmem:[%s12480_s1 + $0x10] sm:$0xff]   ;;  %s6874_s13 = sshll.u32 %s10427_s9, 5 }
  0x8f   : > { %385 = vst.msk [vmem:[#allocation2 + $0x10] sm:$0xff] %vm371_vm0, %v383_v5  ;;  %389 = vst.msk [vmem:[#allocation2 + $0x1c] sm:$0xff] %vm371_vm0, %v6644_v7  ;;  %v9961_v19 = vld [vmem:[%s12480_s1 + $0x18] sm:$0xff]   ;;  %v391_v22 = vld [vmem:[%s12485_s6] sm:$0xff]  ;;  %s368_s18 = scalar_lea.vmem [#allocation13], %s6643_s11  ;;  %vm6505_vm5 = vcmask 25600   ;;  %s12435_s21 = scalar_lea.hbm %s12487_s8, %s6874_s13 }
  0x90   : > { %7527 = vmatpush3.bf16.msra.mxu0 %v9955_v2  ;;  %390 = vst.msk [vmem:[#allocation2 + $0x24] sm:$0xff] %vm371_vm0, %v6645_v8  ;;  %942 = vperm.xlu0 %9952, %v391_v22   ;;  %v393_v23 = vld [vmem:[%s12485_s6 + $0x10] sm:$0xff]  ;;  %v392_v24 = vld [vmem:[%s12485_s6 + $0x8] sm:$0xff]  ;;  %v394_v27 = vld [vmem:[%s12485_s6 + $0x18] sm:$0xff]  ;;  %s6521_s26 = sshll.u32 %s368_s18, 4  ;;  %s6508_s12 = scalar_lea.sflag [#allocation7], %s10605_s22  ;;  %s12437_s26 = int_to_ptr.vmem [resolvable:$true] %s6521_s26 }
  0x91   : > { %7528 = vmatprep.subr.bf16.mxu0 %v10356_v0  ;;  %952 = vperm.xlu1 %9953, %v393_v23   ;;  %v9975_v28 = vld [vmem:[#allocation8 + $0x80] sm:$0xff]   ;;  %v395_v29 = vld [vmem:[%s12485_s6 + $0x20] sm:$0xff]  ;;  %v9977_v30 = vld [vmem:[#allocation8 + $0x88] sm:$0xff]   ;;  %s10272_s25 = scalar_lea.vmem %s12437_s26, 32  ;;  %s10360_s9 = smov [#allocation13]  }
  0x92   : > { %7681 = vmatpush3.bf16.msra.mxu1 %v9975_v28  ;;  %v9962_v32 = vld [vmem:[%s12480_s1 + $0x40] sm:$0xff]   ;;  %v9979_v33 = vld [vmem:[#allocation8 + $0x90] sm:$0xff]   ;;  %v9963_v36 = vld [vmem:[%s12480_s1 + $0x48] sm:$0xff]   ;;  %p10273_p10 = scmp.ne.s32.totalorder %s12437_s26, %s10272_s25  ;;  %s10276_s20 = sshll.u32 %s10360_s9, 4  ;;  %s10277_s20 = int_to_ptr.vmem [resolvable:$false] %s10276_s20 }
  0x93   : > { %v412_v10 = vld [vmem:[#allocation2 + $0x7] sm:$0xff]  ;;  %7682 = vmatprep.subr.bf16.mxu1 %v10356_v0  ;;  %v9964_v38 = vld [vmem:[%s12480_s1 + $0x50] sm:$0xff]   ;;  %v9965_v42 = vld [vmem:[%s12480_s1 + $0x58] sm:$0xff]   ;;  %s10278_s14 = scalar_lea.vmem %s10277_s20, 64  ;;  %p10279_p12 = scmp.lt.s32.totalorder %s12437_s26, %s10277_s20 }
  0x94   : > { %7529 = vmatpush3.bf16.msra.mxu0 %v9956_v6  ;;  %v396_v25 = vld [vmem:[#allocation2 + $0x6] sm:$0xff]  ;;  %947 = vperm.xlu0 %9952, %v392_v24   ;;  %v9968_v51 = vld [vmem:[%s12480_s1 + $0x70] sm:$0xff]   ;;  %v9969_v54 = vld [vmem:[%s12480_s1 + $0x78] sm:$0xff]   ;;  %p10274_p3 = pnand %p10273_p10, %p10554_p5  ;;  %p10280_p2 = scmp.lt.s32.totalorder %s10278_s14, %s10272_s25 }
  0x95   : > { %7530 = vmatprep.subr.bf16.mxu0 %v10356_v0  ;;  %957 = vperm.xlu1 %9953, %v394_v27   ;;  %v9981_v37 = vld [vmem:[#allocation8 + $0x98] sm:$0xff]   ;;  %v9983_v40 = vld [vmem:[#allocation8 + $0xa0] sm:$0xff]   ;;  %v9972_v63 = vld [vmem:[%s12480_s1 + $0x90] sm:$0xff]  }
  0x96   : > { %v413_v11 = vld [vmem:[#allocation2 + $0xf] sm:$0xff]  ;;  %v414_v14 = vld [vmem:[#allocation2 + $0x17] sm:$0xff]  ;;  %7683 = vmatpush3.bf16.msra.mxu1 %v9977_v30  ;;  %v9966_v46 = vld [vmem:[%s12480_s1 + $0x60] sm:$0xff]   ;;  %p10275_p7 = pneg %p10274_p3  ;;  %p10281_p1 = por %p10280_p2, %p10279_p12 }
  0x97   : > { %v417_v12 = vpack.c.bf16 %v413_v11, %v412_v10  ;;  %v415_v15 = vld [vmem:[#allocation2 + $0x1f] sm:$0xff]  ;;  %v416_v20 = vld [vmem:[#allocation2 + $0x27] sm:$0xff]  ;;  %v398_v34 = vld [vmem:[#allocation2 + $0x16] sm:$0xff]  ;;  %7684 = vmatprep.subr.bf16.mxu1 %v10356_v0 }
  0x98   : > { %7531 = vmatpush3.bf16.msra.mxu0 %v9957_v9  ;;  %v418_v17 = vpack.c.bf16 %v415_v15, %v414_v14  ;;  %v419_v21 = vpack.c.bf16 %v416_v20, %v416_v20  ;;  %v397_v26 = vld [vmem:[#allocation2 + $0xe] sm:$0xff]  ;;  %962 = vperm.xlu0 %9952, %v395_v29   ;;  %v399_v35 = vld [vmem:[#allocation2 + $0x1e] sm:$0xff]  ;;  %v400_v41 = vld [vmem:[#allocation2 + $0x26] sm:$0xff]  ;;  %p10282_p4 = pnand %p10281_p1, %p10275_p7 }
  0x99   : > { %7544 = vmatprep.subr.bf16.mxu0 %v10356_v0  ;;  %v401_v31 = vpack.c.bf16 %v397_v26, %v396_v25  ;;  %v402_v39 = vpack.c.bf16 %v399_v35, %v398_v34  ;;  %v403_v43 = vpack.c.bf16 %v400_v41, %v400_v41  ;;  %v607_v44 = vld [vmem:[#allocation2 + $0x8] sm:$0xff]  ;;  %v608_v45 = vld [vmem:[#allocation2 + $0x10] sm:$0xff]  ;;  %v609_v48 = vld [vmem:[#allocation2 + $0x18] sm:$0xff] }
  0x9a   : > { %7685 = vmatpush3.bf16.msra.mxu1 %v9979_v33  ;;  %v612_v47 = vpack.c.bf16 %v608_v45, %v607_v44  ;;  %v610_v49 = vld [vmem:[#allocation2 + $0x20] sm:$0xff]  ;;  %v9967_v50 = vld [vmem:[%s12480_s1 + $0x68] sm:$0xff]   ;;  %v719_v57 = vld [vmem:[#allocation2 + $0x11] sm:$0xff] }
  0x9b   : > { %7533 = vmatmul.mubr.msk.bf16.vlgmr.msra.gmra.mrb[0].mxu0 %vm371_vm0, %v417_v12  ;;  %7686 = vmatprep.subr.bf16.mxu1 %v10356_v0  ;;  %v613_v52 = vpack.c.bf16 %v610_v49, %v609_v48  ;;  %v611_v53 = vld [vmem:[#allocation2 + $0x28] sm:$0xff]  ;;  %v9970_v58 = vld [vmem:[%s12480_s1 + $0x80] sm:$0xff]   ;;  %v9973_v3 = vld [vmem:[%s12480_s1 + $0x98] sm:$0xff]  }
  0x9c   : > { %7536 = vmatprep.mubr.msk.bf16.mxu0 %vm10357_vm2, %v10356_v0  ;;  %7545 = vmatpush3.bf16.msra.mxu0 %v9958_v13  ;;  %v614_v55 = vpack.c.bf16 %v611_v53, %v611_v53  ;;  %v718_v56 = vld [vmem:[#allocation2 + $0x9] sm:$0xff]  ;;  %v720_v60 = vld [vmem:[#allocation2 + $0x19] sm:$0xff]  ;;  %v721_v61 = vld [vmem:[#allocation2 + $0x21] sm:$0xff] }
  0x9d   : > { %7546 = vmatprep.subr.bf16.mxu0 %v10356_v0  ;;  %v723_v59 = vpack.c.bf16 %v719_v57, %v718_v56  ;;  %v9971_v62 = vld [vmem:[%s12480_s1 + $0x88] sm:$0xff]   ;;  %v724_v1 = vpack.c.bf16 %v721_v61, %v720_v60  ;;  %v830_v6 = vld [vmem:[#allocation2 + $0x12] sm:$0xff]  ;;  %v831_v9 = vld [vmem:[#allocation2 + $0x1a] sm:$0xff] }
  0x9e   : > { %7687 = vmatpush3.bf16.msra.mxu1 %v9981_v37  ;;  %v722_v2 = vld [vmem:[#allocation2 + $0x29] sm:$0xff]  ;;  %v9978_v12 = vld [vmem:[#allocation8 + $0x50] sm:$0xff]   ;;  %v9980_v15 = vld [vmem:[#allocation8 + $0x58] sm:$0xff]  }
  0x9f   : > { %7688 = vmatprep.subr.bf16.mxu1 %v10356_v0  ;;  %v725_v4 = vpack.c.bf16 %v722_v2, %v722_v2  ;;  %v829_v5 = vld [vmem:[#allocation2 + $0xa] sm:$0xff]  ;;  %v832_v10 = vld [vmem:[#allocation2 + $0x22] sm:$0xff]  ;;  %v9987_v20 = vld [vmem:[#allocation8 + $0xb0] sm:$0xff]  }
  0xa0   : > { %7547 = vmatpush3.bf16.msra.mxu0 %v9959_v16  ;;  %v9974_v7 = vld [vmem:[#allocation8 + $0x40] sm:$0xff]   ;;  %v834_v8 = vpack.c.bf16 %v830_v6, %v829_v5  ;;  %v9976_v11 = vld [vmem:[#allocation8 + $0x48] sm:$0xff]   ;;  %v835_v13 = vpack.c.bf16 %v832_v10, %v831_v9  ;;  %v9986_v22 = vld [vmem:[#allocation8 + $0x70] sm:$0xff]  }
  0xa1   : > { %7548 = vmatprep.subr.bf16.mxu0 %v10356_v0  ;;  %v833_v14 = vld [vmem:[#allocation2 + $0x2a] sm:$0xff]  ;;  %v9988_v23 = vld [vmem:[#allocation8 + $0x78] sm:$0xff]   ;;  %v9995_v48 = vld [vmem:[#allocation8 + $0xd0] sm:$0xff]  }
  0xa2   : > { %7689 = vmatpush3.bf16.msra.mxu1 %v9983_v40  ;;  %v9982_v16 = vld [vmem:[#allocation8 + $0x60] sm:$0xff]   ;;  %v9993_v37 = vld [vmem:[#allocation8 + $0xc8] sm:$0xff]   ;;  %v10003_v5 = vld [vmem:[#allocation8 + $0xf0] sm:$0xff]  }
  0xa3   : > { %7537 = vmatmul.mubr.msk.bf16.gmra.mrb[4].mxu0 %vm371_vm0, %v418_v17  ;;  %7690 = vmatprep.subr.bf16.mxu1 %v10356_v0  ;;  %v836_v17 = vpack.c.bf16 %v833_v14, %v833_v14  ;;  %v9991_v33 = vld [vmem:[#allocation8 + $0xc0] sm:$0xff]   ;;  %v10000_v6 = vld [vmem:[#allocation8 + $0x28] sm:$0xff]   ;;  %v10002_v9 = vld [vmem:[#allocation8 + $0x30] sm:$0xff]  }
  0xa4   : > { %7540 = vmatprep.mubr.msk.bf16.mxu0 %vm10357_vm2, %v10356_v0  ;;  %7549 = vmatpush3.bf16.msra.mxu0 %v9960_v18  ;;  %v10793_v18 = vld [vmem:[#allocation3] sm:$0xff]  ;;  %v9990_v45 = vld [vmem:[#allocation8] sm:$0xff]   ;;  %v10007_v14 = vld [vmem:[#allocation8 + $0x108] sm:$0xff]  }
  0xa5   : > { %7550 = vmatprep.subr.bf16.mxu0 %v10356_v0 }
  0xa8   : > { %7551 = vmatpush3.bf16.msra.mxu0 %v9961_v19  ;;  %v9985_v19 = vld [vmem:[#allocation8 + $0xa8] sm:$0xff]  }
  0xa9   : > { %7564 = vmatprep.subr.bf16.mxu0 %v10356_v0  ;;  %7691 = vmatpush3.bf16.msra.mxu1 %v9985_v19 }
  0xaa   : > { %7692 = vmatprep.subr.bf16.mxu1 %v10793_v18 }
  0xab   : > { %7541 = vmatmul.mubr.msk.bf16.gmra.mrb[8].mxu0 %vm371_vm0, %v419_v21  ;;  %v9984_v21 = vld [vmem:[#allocation8 + $0x68] sm:$0xff]  }
  0xac   : > { %7552 = vmatprep.mubr.msk.bf16.mxu0 %vm10357_vm2, %v10356_v0 }
  0xad   : > { %7693 = vmatpush3.bf16.msra.mxu1 %v9987_v20 }
  0xae   : > { %7694 = vmatprep.subr.bf16.mxu1 %v10793_v18 }
  0xb3   : > { %7553 = vmatmul.mubr.msk.bf16.vlgmr.msra.gmra.mrb[0].mxu0 %vm371_vm0, %v401_v31 }
  0xb4   : > { %7556 = vmatprep.mubr.msk.bf16.mxu0 %vm10357_vm2, %v10356_v0  ;;  %7565 = vmatpush3.bf16.msra.mxu0 %v9962_v32 }
  0xb5   : > { %7566 = vmatprep.subr.bf16.mxu0 %v10356_v0 }
  0xb8   : > { %7567 = vmatpush3.bf16.msra.mxu0 %v9963_v36 }
  0xb9   : > { %7568 = vmatprep.subr.bf16.mxu0 %v10356_v0 }
  0xbb   : > { %7557 = vmatmul.mubr.msk.bf16.gmra.mrb[4].mxu0 %vm371_vm0, %v402_v39 }
  0xbc   : > { %7560 = vmatprep.mubr.msk.bf16.mxu0 %vm10357_vm2, %v10356_v0  ;;  %7569 = vmatpush3.bf16.msra.mxu0 %v9964_v38 }
  0xbd   : > { %7570 = vmatprep.subr.bf16.mxu0 %v10356_v0 }
  0xc0   : > { %7571 = vmatpush3.bf16.msra.mxu0 %v9965_v42 }
  0xc1   : > { %7584 = vmatprep.subr.bf16.mxu0 %v10356_v0 }
  0xc3   : > { %7561 = vmatmul.mubr.msk.bf16.gmra.mrb[8].mxu0 %vm371_vm0, %v403_v43 }
  0xc4   : > { %7572 = vmatprep.mubr.msk.bf16.mxu0 %vm10357_vm2, %v10356_v0 }
  0xcb   : > { %7573 = vmatmul.mubr.msk.bf16.vlgmr.msra.gmra.mrb[0].mxu0 %vm371_vm0, %v612_v47 }
  0xcc   : > { %7576 = vmatprep.mubr.msk.bf16.mxu0 %vm10357_vm2, %v10356_v0  ;;  %7585 = vmatpush3.bf16.msra.mxu0 %v9966_v46 }
  0xcd   : > { %7586 = vmatprep.subr.bf16.mxu0 %v10356_v0 }
  0xd0   : > { %7587 = vmatpush3.bf16.msra.mxu0 %v9967_v50 }
  0xd1   : > { %7588 = vmatprep.subr.bf16.mxu0 %v10356_v0 }
  0xd3   : > { %7577 = vmatmul.mubr.msk.bf16.gmra.mrb[4].mxu0 %vm371_vm0, %v613_v52 }
  0xd4   : > { %7580 = vmatprep.mubr.msk.bf16.mxu0 %vm10357_vm2, %v10356_v0  ;;  %7589 = vmatpush3.bf16.msra.mxu0 %v9968_v51  ;;  %v9992_v51 = vld [vmem:[#allocation8 + $0x8] sm:$0xff]  }
  0xd5   : > { %7590 = vmatprep.subr.bf16.mxu0 %v10356_v0 }
  0xd8   : > { %7591 = vmatpush3.bf16.msra.mxu0 %v9969_v54  ;;  %v9997_v54 = vld [vmem:[#allocation8 + $0xd8] sm:$0xff]  }
  0xd9   : > { %7604 = vmatprep.subr.bf16.mxu0 %v10356_v0 }
  0xdb   : > { %7581 = vmatmul.mubr.msk.bf16.gmra.mrb[8].mxu0 %vm371_vm0, %v614_v55 }
  0xdc   : > { %7592 = vmatprep.mubr.msk.bf16.mxu0 %vm10357_vm2, %v10356_v0 }
  0xe3   : > { %7593 = vmatmul.mubr.msk.bf16.vlgmr.msra.gmra.mrb[0].mxu0 %vm371_vm0, %v723_v59  ;;  %v9994_v59 = vld [vmem:[#allocation8 + $0x10] sm:$0xff]  }
  0xe4   : > { %7596 = vmatprep.mubr.msk.bf16.mxu0 %vm10357_vm2, %v10356_v0  ;;  %7605 = vmatpush3.bf16.msra.mxu0 %v9970_v58 }
  0xe5   : > { %7606 = vmatprep.subr.bf16.mxu0 %v10356_v0 }
  0xe8   : > { %7607 = vmatpush3.bf16.msra.mxu0 %v9971_v62  ;;  %v9999_v62 = vld [vmem:[#allocation8 + $0xe0] sm:$0xff]  }
  0xe9   : > { %7608 = vmatprep.subr.bf16.mxu0 %v10356_v0 }
  0xeb   : > { %7597 = vmatmul.mubr.msk.bf16.gmra.mrb[4].mxu0 %vm371_vm0, %v724_v1  ;;  %v10001_v1 = vld [vmem:[#allocation8 + $0xe8] sm:$0xff]  }
  0xec   : > { %7600 = vmatprep.mubr.msk.bf16.mxu0 %vm10357_vm2, %v10356_v0  ;;  %7609 = vmatpush3.bf16.msra.mxu0 %v9972_v63  ;;  %v9996_v63 = vld [vmem:[#allocation8 + $0x18] sm:$0xff]  }
  0xed   : > { %7610 = vmatprep.subr.bf16.mxu0 %v10356_v0 }
  0xf0   : > { %7611 = vmatpush3.bf16.msra.mxu0 %v9973_v3  ;;  %v9998_v3 = vld [vmem:[#allocation8 + $0x20] sm:$0xff]  }
  0xf1   : > { %7624 = vmatprep.subr.bf16.mxu0 %v10356_v0 }
  0xf3   : > { %7601 = vmatmul.mubr.msk.bf16.gmra.mrb[8].mxu0 %vm371_vm0, %v725_v4 }
  0xf4   : > { %7612 = vmatprep.mubr.msk.bf16.mxu0 %vm10357_vm2, %v10356_v0 }
  0xfb   : > { %7613 = vmatmul.mubr.msk.bf16.vlgmr.msra.gmra.mrb[0].mxu0 %vm371_vm0, %v834_v8 }
  0xfc   : > { %7616 = vmatprep.mubr.msk.bf16.mxu0 %vm10357_vm2, %v10356_v0  ;;  %7625 = vmatpush3.bf16.msra.mxu0 %v9974_v7  ;;  %v10005_v7 = vld [vmem:[#allocation8 + $0xf8] sm:$0xff]  }
  0xfd   : > { %7626 = vmatprep.subr.bf16.mxu0 %v10356_v0 }
 0x100   : > { %7627 = vmatpush3.bf16.msra.mxu0 %v9976_v11  ;;  %v10006_v11 = vld [vmem:[#allocation8 + $0x100] sm:$0xff]  }
 0x101   : > { %7628 = vmatprep.subr.bf16.mxu0 %v10356_v0 }
 0x103   : > { %7617 = vmatmul.mubr.msk.bf16.gmra.mrb[4].mxu0 %vm371_vm0, %v835_v13  ;;  %v10004_v13 = vld [vmem:[#allocation8 + $0x38] sm:$0xff]  }
 0x104   : > { %7620 = vmatprep.mubr.msk.bf16.mxu0 %vm10357_vm2, %v10356_v0  ;;  %7629 = vmatpush3.bf16.msra.mxu0 %v9978_v12 }
 0x105   : > { %7630 = vmatprep.subr.bf16.mxu0 %v10356_v0 }
 0x108   : > { %7631 = vmatpush3.bf16.msra.mxu0 %v9980_v15 }
 0x109   : > { %7632 = vmatprep.subr.bf16.mxu0 %v10356_v0  ;;  %v9989_v0 = vld [vmem:[#allocation8 + $0xb8] sm:$0xff]  }
 0x10a   : > { %7695 = vmatpush3.bf16.msra.mxu1 %v9989_v0 }
 0x10b   : > { %7621 = vmatmul.mubr.msk.bf16.gmra.mrb[8].mxu0 %vm371_vm0, %v836_v17  ;;  %7708 = vmatprep.subr.bf16.mxu1 %v10793_v18 }
 0x10c   : > { %7633 = vmatpush3.bf16.msra.mxu0 %v9982_v16  ;;  %7640 = vmatprep.mubr.msk.bf16.mxu0 %vm10357_vm2, %v10793_v18 }
 0x10d   : > { %7634 = vmatprep.subr.bf16.mxu0 %v10793_v18 }
 0x10f   : > { %v10804_v24 = vpop.permute.xlu0 %942 }
 0x110   : > { %7635 = vmatpush3.bf16.msra.mxu0 %v9984_v21  ;;  %v10814_v30 = vpop.permute.xlu1 %952  ;;  %v10008_v21 = vld [vmem:[#allocation8 + $0x110] sm:$0xff]  }
 0x111   : > { %7636 = vmatprep.subr.bf16.mxu0 %v10793_v18  ;;  %12560 = vst [vmem:[#allocation23_spill] sm:$0xff] %v10814_v30 }
 0x113   : > { %v10808_v26 = vpop.permute.xlu0 %947 }
 0x114   : > { %7637 = vmatpush3.bf16.msra.mxu0 %v9986_v22  ;;  %12558 = vst [vmem:[#allocation21_spill] sm:$0xff] %v10808_v26  ;;  %v10820_v36 = vpop.permute.xlu1 %957  ;;  %v10009_v22 = vld [vmem:[#allocation8 + $0x118] sm:$0xff]  }
 0x115   : > { %7638 = vmatprep.subr.bf16.mxu0 %v10793_v18  ;;  %12562 = vst [vmem:[#allocation25_spill] sm:$0xff] %v10820_v36 }
 0x117   : > { %v10832_v49 = vpop.permute.xlu0 %962 }
 0x118   : > { %7639 = vmatpush3.bf16.msra.mxu0 %v9988_v23  ;;  %12564 = vst [vmem:[#allocation27_spill] sm:$0xff] %v10832_v49 }
 0x119   : > { %7652 = vmatprep.subr.bf16.mxu0 %v10793_v18 }
 0x1ce   : > { %v10806_v25 = vpop.f32.mrb[0].mxu0 }
 0x1cf   : > { %12557 = vst [vmem:[#allocation20_spill] sm:$0xff] %v10806_v25  ;;  %v965_v27 = vmul.f32 %v10804_v24, %v10806_v25  ;;  %v7614_v28 = vpop.f32.mrb[1].mxu0 }
 0x1d0   : > { %v10812_v29 = vpop.f32.mrb[2].mxu0 }
 0x1d1   : > { %12559 = vst [vmem:[#allocation22_spill] sm:$0xff] %v10812_v29  ;;  %970 = vst [vmem:[#allocation3 + $0x8] sm:$0xff] %v965_v27  ;;  %v966_v31 = vmul.f32 %v10808_v26, %v10812_v29  ;;  %v7615_v32 = vpop.f32.mrb[3].mxu0 }
 0x1d2   : > { %v10010_v32 = vld [vmem:[#allocation8 + $0x120] sm:$0xff]  }
 0x1d3   : > { %971 = vst [vmem:[#allocation3 + $0x10] sm:$0xff] %v966_v31  ;;  %v1253_v34 = vpack.c.bf16 %v966_v31, %v965_v27 }
 0x1d5   : > { %7697 = vmatmul.mubr.bf16.vlgmr.msra.gmra.mrb[0].mxu1 %v1253_v34  ;;  %v10011_v34 = vld [vmem:[#allocation8 + $0x128] sm:$0xff]  }
 0x1d6   : > { %v10818_v35 = vpop.f32.mrb[4].mxu0  ;;  %7709 = vmatpush3.bf16.msra.mxu1 %v9991_v33  ;;  %7700 = vmatprep.mubr.msk.bf16.mxu1 %vm10357_vm2, %v10793_v18 }
 0x1d7   : > { %12561 = vst [vmem:[#allocation24_spill] sm:$0xff] %v10818_v35  ;;  %v967_v38 = vmul.f32 %v10814_v30, %v10818_v35  ;;  %v7618_v39 = vpop.f32.mrb[5].mxu0  ;;  %7710 = vmatprep.subr.bf16.mxu1 %v10793_v18 }
 0x1d8   : > { %v10827_v40 = vpop.f32.mrb[6].mxu0  ;;  %v1015_v43 = vld [vmem:[#allocation3 + $0x7] sm:$0xff] }
 0x1d9   : > { %12563 = vst [vmem:[#allocation26_spill] sm:$0xff] %v10827_v40  ;;  %972 = vst [vmem:[#allocation3 + $0x18] sm:$0xff] %v967_v38  ;;  %v968_v41 = vmul.f32 %v10820_v36, %v10827_v40  ;;  %v7619_v42 = vpop.f32.mrb[7].mxu0  ;;  %v991_v17 = vld [vmem:[#allocation3 + $0x6] sm:$0xff] }
 0x1da   : > { %v1016_v44 = vld [vmem:[#allocation3 + $0xf] sm:$0xff]  ;;  %7711 = vmatpush3.bf16.msra.mxu1 %v9993_v37  ;;  %v10012_v39 = vld [vmem:[#allocation8 + $0x130] sm:$0xff]  }
 0x1db   : > { %973 = vst [vmem:[#allocation3 + $0x20] sm:$0xff] %v968_v41  ;;  %v1020_v46 = vpack.c.bf16 %v1016_v44, %v1015_v43  ;;  %7712 = vmatprep.subr.bf16.mxu1 %v10793_v18  ;;  %v1254_v47 = vpack.c.bf16 %v968_v41, %v967_v38  ;;  %v1382_v10 = vld [vmem:[#allocation3 + $0x9] sm:$0xff] }
 0x1dc   : > { %v992_v15 = vld [vmem:[#allocation3 + $0xe] sm:$0xff] }
 0x1dd   : > { %7641 = vmatmul.mubr.bf16.vlgmr.msra.gmra.mrb[12].mxu0 %v1020_v46  ;;  %7701 = vmatmul.mubr.bf16.gmra.mrb[4].mxu1 %v1254_v47  ;;  %v996_v19 = vpack.c.bf16 %v992_v15, %v991_v17  ;;  %v10013_v41 = vld [vmem:[#allocation8 + $0x138] sm:$0xff]   ;;  %v10906_v15 = vld [vmem:[#allocation11 + $0x50] sm:$0xff] }
 0x1de   : > { %7653 = vmatpush3.bf16.msra.mxu0 %v9990_v45  ;;  %v10834_v50 = vpop.f32.mrb[8].mxu0  ;;  %7644 = vmatprep.mubr.msk.bf16.mxu0 %vm10357_vm2, %v10793_v18  ;;  %v1516_v43 = vld [vmem:[#allocation3 + $0xa] sm:$0xff]  ;;  %v1686_v17 = vand.u32 4294901760, %v10906_v15 }
 0x1df   : > { %12565 = vst [vmem:[#allocation28_spill] sm:$0xff] %v10834_v50  ;;  %v969_v52 = vmul.f32 %v10832_v49, %v10834_v50  ;;  %v7622_v53 = vpop.f32.mrb[9].mxu0  ;;  %7654 = vmatprep.subr.bf16.mxu0 %v10793_v18  ;;  %7713 = vmatpush3.bf16.msra.mxu1 %v9995_v48 }
 0x1e0   : > { %v932_v55 = vpop.f32.mrb[10].mxu0  ;;  %7714 = vmatprep.subr.bf16.mxu1 %v10793_v18  ;;  %7704 = vmatprep.mubr.msk.bf16.mxu1 %vm10357_vm2, %v10793_v18  ;;  %v1017_v57 = vld [vmem:[#allocation3 + $0x17] sm:$0xff] }
 0x1e1   : > { %974 = vst [vmem:[#allocation3 + $0x28] sm:$0xff] %v969_v52  ;;  %v7623_v56 = vpop.f32.mrb[11].mxu0  ;;  %v1255_v61 = vpack.c.bf16 %v969_v52, %v969_v52  ;;  %v1383_v8 = vld [vmem:[#allocation3 + $0x11] sm:$0xff] }
 0x1e2   : > { %7655 = vmatpush3.bf16.msra.mxu0 %v9992_v51  ;;  %v1018_v58 = vld [vmem:[#allocation3 + $0x1f] sm:$0xff]  ;;  %v1387_v12 = vpack.c.bf16 %v1383_v8, %v1382_v10  ;;  %v993_v28 = vld [vmem:[#allocation3 + $0x16] sm:$0xff] }
 0x1e3   : > { %7656 = vmatprep.subr.bf16.mxu0 %v10793_v18  ;;  %v1021_v60 = vpack.c.bf16 %v1018_v58, %v1017_v57  ;;  %7715 = vmatpush3.bf16.msra.mxu1 %v9997_v54  ;;  %v1384_v20 = vld [vmem:[#allocation3 + $0x19] sm:$0xff]  ;;  %v975_v52 = vld [vmem:[#allocation11] sm:$0xff]  ;;  %v12509_v57 = vmov 0.0|0.0  }
 0x1e4   : > { %7716 = vmatprep.subr.bf16.mxu1 %v10793_v18  ;;  %v994_v23 = vld [vmem:[#allocation3 + $0x1e] sm:$0xff]  ;;  %v1517_v42 = vld [vmem:[#allocation3 + $0x12] sm:$0xff]  ;;  %v1656_v54 = vand.u32 4294901760, %v975_v52 }
 0x1e5   : > { %7645 = vmatmul.mubr.bf16.gmra.mrb[16].mxu0 %v1021_v60  ;;  %7705 = vmatmul.mubr.bf16.gmra.mrb[8].mxu1 %v1255_v61  ;;  %v997_v31 = vpack.c.bf16 %v994_v23, %v993_v28  ;;  %v1521_v44 = vpack.c.bf16 %v1517_v42, %v1516_v43  ;;  %v1518_v46 = vld [vmem:[#allocation3 + $0x1a] sm:$0xff]  ;;  %v983_v10 = vld [vmem:[#allocation11 + $0x40] sm:$0xff] }
 0x1e6   : > { %7657 = vmatpush3.bf16.msra.mxu0 %v9994_v59  ;;  %7648 = vmatprep.mubr.msk.bf16.mxu0 %vm10357_vm2, %v10793_v18  ;;  %v976_v53 = vld [vmem:[#allocation11 + $0x8] sm:$0xff]  ;;  %v977_v58 = vld [vmem:[#allocation11 + $0x10] sm:$0xff]  ;;  %v978_v59 = vld [vmem:[#allocation11 + $0x18] sm:$0xff]  ;;  %v10930_v28 = vsub.f32 %v975_v52, %v1656_v54 }
 0x1e7   : > { %7658 = vmatprep.subr.bf16.mxu0 %v10793_v18  ;;  %7717 = vmatpush3.bf16.msra.mxu1 %v9999_v62  ;;  %v1659_v55 = vand.u32 4294901760, %v976_v53  ;;  %v1662_v60 = vand.u32 4294901760, %v977_v58  ;;  %v1665_v61 = vand.u32 4294901760, %v978_v59 }
 0x1e8   : > { %v1019_v2 = vld [vmem:[#allocation3 + $0x27] sm:$0xff]  ;;  %7718 = vmatprep.subr.bf16.mxu1 %v10793_v18  ;;  %7724 = vmatprep.mubr.msk.bf16.mxu1 %vm10357_vm2, %v10793_v18 }
 0x1e9   : > { %v1022_v4 = vpack.c.bf16 %v1019_v2, %v1019_v2  ;;  %v1385_v16 = vld [vmem:[#allocation3 + $0x21] sm:$0xff]  ;;  %v1386_v27 = vld [vmem:[#allocation3 + $0x29] sm:$0xff]  ;;  %v10887_v56 = vpack.c.bf16 %v1659_v55, %v1656_v54  ;;  %v10892_v62 = vpack.c.bf16 %v1665_v61, %v1662_v60 }
 0x1ea   : > { %7659 = vmatpush3.bf16.msra.mxu0 %v9996_v63  ;;  %v1388_v0 = vpack.c.bf16 %v1385_v16, %v1384_v20  ;;  %v1389_v33 = vpack.c.bf16 %v1386_v27, %v1386_v27  ;;  %v995_v37 = vld [vmem:[#allocation3 + $0x26] sm:$0xff]  ;;  %v979_v63 = vld [vmem:[#allocation11 + $0x20] sm:$0xff] }
 0x1eb   : > { %7660 = vmatprep.subr.bf16.mxu0 %v10793_v18  ;;  %7719 = vmatpush3.bf16.msra.mxu1 %v10001_v1  ;;  %v998_v38 = vpack.c.bf16 %v995_v37, %v995_v37  ;;  %v1519_v45 = vld [vmem:[#allocation3 + $0x22] sm:$0xff]  ;;  %v1520_v48 = vld [vmem:[#allocation3 + $0x2a] sm:$0xff]  ;;  %v980_v1 = vld [vmem:[#allocation11 + $0x28] sm:$0xff]  ;;  %v1668_v2 = vand.u32 4294901760, %v979_v63 }
 0x1ec   : > { %7720 = vmatprep.subr.bf16.mxu1 %v10793_v18  ;;  %v1522_v47 = vpack.c.bf16 %v1519_v45, %v1518_v46  ;;  %v1523_v51 = vpack.c.bf16 %v1520_v48, %v1520_v48  ;;  %v10908_v16 = vld [vmem:[#allocation11 + $0x58] sm:$0xff]  ;;  %v10958_v45 = vsub.f32 %v978_v59, %v1665_v61 }
 0x1ed   : > { %7649 = vmatmul.mubr.bf16.gmra.mrb[20].mxu0 %v1022_v4 }
 0x1ee   : > { %7661 = vmatpush3.bf16.msra.mxu0 %v9998_v3  ;;  %7668 = vmatprep.mubr.msk.bf16.mxu0 %vm10357_vm2, %v10793_v18  ;;  %v1671_v3 = vand.u32 4294901760, %v980_v1 }
 0x1ef   : > { %7662 = vmatprep.subr.bf16.mxu0 %v10793_v18  ;;  %7721 = vmatpush3.bf16.msra.mxu1 %v10003_v5  ;;  %v981_v5 = vld [vmem:[#allocation11 + $0x30] sm:$0xff] }
 0x1f0   : > { %7722 = vmatprep.subr.bf16.mxu1 %v10793_v18  ;;  %v10896_v4 = vpack.c.bf16 %v1671_v3, %v1668_v2 }
 0x1f2   : > { %7663 = vmatpush3.bf16.msra.mxu0 %v10000_v6  ;;  %v982_v6 = vld [vmem:[#allocation11 + $0x38] sm:$0xff] }
 0x1f3   : > { %7664 = vmatprep.subr.bf16.mxu0 %v10793_v18  ;;  %7723 = vmatpush3.bf16.msra.mxu1 %v10005_v7  ;;  %v1674_v7 = vand.u32 4294901760, %v981_v5  ;;  %v1677_v8 = vand.u32 4294901760, %v982_v6 }
 0x1f4   : > { %7736 = vmatprep.subr.bf16.mxu1 %v10793_v18 }
 0x1f6   : > { %7665 = vmatpush3.bf16.msra.mxu0 %v10002_v9  ;;  %7725 = vmatmul.mubr.bf16.vlgmr.msra.gmra.mrb[0].mxu1 %v1387_v12  ;;  %v10900_v9 = vpack.c.bf16 %v1677_v8, %v1674_v7  ;;  %v1680_v12 = vand.u32 4294901760, %v983_v10 }
 0x1f7   : > { %7666 = vmatprep.subr.bf16.mxu0 %v10793_v18  ;;  %7737 = vmatpush3.bf16.msra.mxu1 %v10006_v11  ;;  %v984_v11 = vld [vmem:[#allocation11 + $0x48] sm:$0xff] }
 0x1f8   : > { %7738 = vmatprep.subr.bf16.mxu1 %v10793_v18  ;;  %7728 = vmatprep.mubr.msk.bf16.mxu1 %vm10357_vm2, %v10793_v18 }
 0x1fa   : > { %7667 = vmatpush3.bf16.msra.mxu0 %v10004_v13  ;;  %v1683_v13 = vand.u32 4294901760, %v984_v11 }
 0x1fb   : > { %7739 = vmatpush3.bf16.msra.mxu1 %v10007_v14  ;;  %9036 = vmatprep.subr.bf16.mxu0 %v12509_v57 }
 0x1fc   : > { %7740 = vmatprep.subr.bf16.mxu1 %v10793_v18  ;;  %v10904_v14 = vpack.c.bf16 %v1683_v13, %v1680_v12 }
 0x1fd   : > { %7669 = vmatmul.mubr.bf16.vlgmr.msra.gmra.mrb[12].mxu0 %v996_v19  ;;  %v1689_v19 = vand.u32 4294901760, %v10908_v16 }
 0x1fe   : > { %7672 = vmatprep.mubr.msk.bf16.mxu0 %vm10357_vm2, %v10793_v18  ;;  %7729 = vmatmul.mubr.bf16.gmra.mrb[4].mxu1 %v1388_v0  ;;  %v10918_v0 = vld [vmem:[#allocation11 + $0x68] sm:$0xff] }
 0x1ff   : > { %7741 = vmatpush3.bf16.msra.mxu1 %v10008_v21  ;;  %7732 = vmatprep.mubr.msk.bf16.mxu1 %vm10357_vm2, %v10793_v18  ;;  %v10914_v20 = vpack.c.bf16 %v1689_v19, %v1686_v17  ;;  %v10916_v21 = vld [vmem:[#allocation11 + $0x60] sm:$0xff]  ;;  %v1695_v23 = vand.u32 4294901760, %v10918_v0 }
 0x200   : > { %7742 = vmatprep.subr.bf16.mxu1 %v10793_v18  ;;  %9038 = vmatpush3.bf16.msra.mxu0 %v10887_v56 }
 0x201   : > { %9039 = vmatprep.subr.bf16.mxu0 %v12509_v57 }
 0x203   : > { %7743 = vmatpush3.bf16.msra.mxu1 %v10009_v22  ;;  %v1692_v22 = vand.u32 4294901760, %v10916_v21 }
 0x204   : > { %7744 = vmatprep.subr.bf16.mxu1 %v10793_v18  ;;  %9041 = vmatpush3.bf16.msra.mxu0 %v10892_v62 }
 0x205   : > { %7673 = vmatmul.mubr.bf16.gmra.mrb[16].mxu0 %v997_v31  ;;  %9042 = vmatprep.subr.bf16.mxu0 %v12509_v57  ;;  %v10928_v27 = vpack.c.bf16 %v1695_v23, %v1692_v22  ;;  %v10932_v31 = vsub.f32 %v976_v53, %v1659_v55  ;;  %v10972_v55 = vsub.f32 %v979_v63, %v1668_v2 }
 0x206   : > { %7676 = vmatprep.mubr.msk.bf16.mxu0 %vm10357_vm2, %v10793_v18  ;;  %7733 = vmatmul.mubr.bf16.gmra.mrb[8].mxu1 %v1389_v33  ;;  %v10936_v33 = vld [vmem:[#allocation11 + $0x78] sm:$0xff]  ;;  %v10986_v63 = vsub.f32 %v981_v5, %v1674_v7 }
 0x207   : > { %7745 = vmatpush3.bf16.msra.mxu1 %v10010_v32  ;;  %7752 = vmatprep.mubr.msk.bf16.mxu1 %vm10357_vm2, %v10793_v18  ;;  %v10934_v32 = vld [vmem:[#allocation11 + $0x70] sm:$0xff]  ;;  %v1701_v37 = vand.u32 4294901760, %v10936_v33  ;;  %v12493_v61 = vand.u32 4294901760, %v10972_v55 }
 0x208   : > { %7746 = vmatprep.subr.bf16.mxu1 %v10793_v18  ;;  %9044 = vmatpush3.bf16.msra.mxu0 %v10896_v4 }
 0x209   : > { %9045 = vmatprep.subr.bf16.mxu0 %v12509_v57 }
 0x20b   : > { %7747 = vmatpush3.bf16.msra.mxu1 %v10011_v34  ;;  %v1698_v34 = vand.u32 4294901760, %v10934_v32 }
 0x20c   : > { %7748 = vmatprep.subr.bf16.mxu1 %v10793_v18  ;;  %9047 = vmatpush3.bf16.msra.mxu0 %v10900_v9 }
 0x20d   : > { %7677 = vmatmul.mubr.bf16.gmra.mrb[20].mxu0 %v998_v38  ;;  %9048 = vmatprep.subr.bf16.mxu0 %v12509_v57  ;;  %v12508_v38 = vand.u32 4294901760, %v10930_v28 }
 0x20e   : > { %7796 = vmatprep.mubr.msk.f32.mxu0 %vm10357_vm2, %v10793_v18 }
 0x20f   : > { %7749 = vmatpush3.bf16.msra.mxu1 %v10012_v39  ;;  %v12507_v39 = vand.u32 4294901760, %v10932_v31  ;;  %v1790_v42 = vsub.f32 %v10930_v28, %v12508_v38 }
 0x210   : > { %7750 = vmatprep.subr.bf16.mxu1 %v10793_v18  ;;  %9050 = vmatpush3.bf16.msra.mxu0 %v10904_v14 }
 0x211   : > { %9051 = vmatprep.subr.bf16.mxu0 %v12509_v57  ;;  %v1797_v43 = vsub.f32 %v10932_v31, %v12507_v39  ;;  %v1791_v46 = vand.u32 4294901760, %v1790_v42 }
 0x213   : > { %7751 = vmatpush3.bf16.msra.mxu1 %v10013_v41  ;;  %v10948_v41 = vpack.c.bf16 %v1701_v37, %v1698_v34 }
 0x214   : > { %8046 = vmatprep.subr.bf16.mxu1 %v10793_v18  ;;  %9053 = vmatpush3.bf16.msra.mxu0 %v10914_v20 }
 0x215   : > { %9054 = vmatprep.subr.bf16.mxu0 %v12509_v57 }
 0x216   : > { %7753 = vmatmul.mubr.bf16.vlgmr.msra.gmra.mrb[0].mxu1 %v1521_v44  ;;  %v10956_v44 = vsub.f32 %v977_v58, %v1662_v60  ;;  %v10974_v58 = vsub.f32 %v980_v1, %v1671_v3  ;;  %v10988_v1 = vsub.f32 %v982_v6, %v1677_v8 }
 0x217   : > { %7756 = vmatprep.mubr.msk.bf16.mxu1 %vm10357_vm2, %v10793_v18 }
 0x218   : > { %9056 = vmatpush3.bf16.msra.mxu0 %v10928_v27  ;;  %v12506_v48 = vand.u32 4294901760, %v10956_v44  ;;  %v12505_v42 = vand.u32 4294901760, %v10974_v58 }
 0x219   : > { %9057 = vmatprep.subr.bf16.mxu0 %v12509_v57 }
 0x21a   : > { %v1804_v53 = vsub.f32 %v10956_v44, %v12506_v48 }
 0x21c   : > { %9059 = vmatpush3.bf16.msra.mxu0 %v10948_v41  ;;  %v1805_v59 = vand.u32 4294901760, %v1804_v53  ;;  %v12504_v53 = vand.u32 4294901760, %v10986_v63 }
 0x21d   : > { %9060 = vmatprep.subr.bf16.mxu0 %v12509_v57 }
 0x21e   : > { %7757 = vmatmul.mubr.bf16.gmra.mrb[4].mxu1 %v1522_v47  ;;  %v1798_v47 = vand.u32 4294901760, %v1797_v43 }
 0x21f   : > { %7760 = vmatprep.mubr.msk.bf16.mxu1 %vm10357_vm2, %v10793_v18 }
 0x220   : > { %v10964_v52 = vpack.c.bf16 %v1798_v47, %v1791_v46  ;;  %v1818_v46 = vsub.f32 %v10972_v55, %v12493_v61  ;;  %v1825_v47 = vsub.f32 %v10974_v58, %v12505_v42  ;;  %v10997_v61 = vsub.f32 %v983_v10, %v1680_v12 }
 0x221   : > { %v11016_v12 = vsub.f32 %v10908_v16, %v1689_v19  ;;  %v11033_v16 = vsub.f32 %v10916_v21, %v1692_v22  ;;  %v11050_v21 = vsub.f32 %v10934_v32, %v1698_v34 }
 0x222   : > { %12566 = vst [vmem:[#allocation29_spill] sm:$0xff] %v10964_v52  ;;  %v1819_v2 = vand.u32 4294901760, %v1818_v46  ;;  %v1826_v3 = vand.u32 4294901760, %v1825_v47  ;;  %v12503_v7 = vand.u32 4294901760, %v10997_v61 }
 0x224   : > { %v1846_v47 = vsub.f32 %v10997_v61, %v12503_v7 }
 0x226   : > { %7761 = vmatmul.mubr.bf16.gmra.mrb[8].mxu1 %v1523_v51  ;;  %v12494_v51 = vand.u32 4294901760, %v10958_v45 }
 0x227   : > { %8062 = vmatprep.mubr.msk.bf16.mxu1 %vm10357_vm2, %v10793_v18 }
 0x228   : > { %v1811_v54 = vsub.f32 %v10958_v45, %v12494_v51  ;;  %v10999_v51 = vsub.f32 %v984_v11, %v1683_v13  ;;  %v11013_v11 = vsub.f32 %v10906_v15, %v1686_v17  ;;  %v11038_v17 = vsub.f32 %v10918_v0, %v1695_v23 }
 0x229   : > { %v11055_v0 = vsub.f32 %v10936_v33, %v1701_v37 }
 0x22a   : > { %v1812_v60 = vand.u32 4294901760, %v1811_v54  ;;  %v12495_v54 = vand.u32 4294901760, %v10988_v1  ;;  %v12496_v8 = vand.u32 4294901760, %v10999_v51 }
 0x22c   : > { %v10978_v43 = vpack.c.bf16 %v1812_v60, %v1805_v59  ;;  %v10992_v59 = vpack.c.bf16 %v1826_v3, %v1819_v2  ;;  %v1832_v60 = vsub.f32 %v10986_v63, %v12504_v53  ;;  %v1839_v5 = vsub.f32 %v10988_v1, %v12495_v54 }
 0x22d   : > { %v1853_v10 = vsub.f32 %v10999_v51, %v12496_v8  ;;  %v1847_v2 = vand.u32 4294901760, %v1846_v47  ;;  %v12499_v47 = vand.u32 4294901760, %v11038_v17 }
 0x22e   : > { %v1833_v6 = vand.u32 4294901760, %v1832_v60  ;;  %v1840_v46 = vand.u32 4294901760, %v1839_v5  ;;  %v12502_v60 = vand.u32 4294901760, %v11013_v11  ;;  %v12501_v5 = vand.u32 4294901760, %v11016_v12 }
 0x22f   : > { %v1854_v3 = vand.u32 4294901760, %v1853_v10  ;;  %v1881_v22 = vsub.f32 %v11038_v17, %v12499_v47 }
 0x230   : > { %v11018_v13 = vpack.c.bf16 %v1840_v46, %v1833_v6  ;;  %v1860_v8 = vsub.f32 %v11013_v11, %v12502_v60  ;;  %v1867_v15 = vsub.f32 %v11016_v12, %v12501_v5  ;;  %v12500_v46 = vand.u32 4294901760, %v11033_v16 }
 0x231   : > { %v11022_v54 = vpack.c.bf16 %v1854_v3, %v1847_v2  ;;  %v12498_v3 = vand.u32 4294901760, %v11055_v0 }
 0x232   : > { %v1861_v19 = vand.u32 4294901760, %v1860_v8  ;;  %v1868_v6 = vand.u32 4294901760, %v1867_v15  ;;  %v1874_v2 = vsub.f32 %v11033_v16, %v12500_v46  ;;  %v12497_v8 = vand.u32 4294901760, %v11050_v21 }
 0x233   : > { %v1882_v15 = vand.u32 4294901760, %v1881_v22  ;;  %v1895_v34 = vsub.f32 %v11055_v0, %v12498_v3  ;;  %v11078_v22 = vpack.c.bf16 %v10958_v45, %v10956_v44 }
 0x234   : > { %v11042_v10 = vpack.c.bf16 %v1868_v6, %v1861_v19  ;;  %v1875_v23 = vand.u32 4294901760, %v1874_v2  ;;  %v1888_v32 = vsub.f32 %v11050_v21, %v12497_v8  ;;  %v11074_v2 = vpack.c.bf16 %v10932_v31, %v10930_v28 }
 0x235   : > { %v1896_v19 = vand.u32 4294901760, %v1895_v34  ;;  %v11082_v8 = vpack.c.bf16 %v10974_v58, %v10972_v55  ;;  %v11098_v34 = vpack.c.bf16 %v11038_v17, %v11033_v16 }
 0x236   : > { %v11068_v33 = vpack.c.bf16 %v1882_v15, %v1875_v23  ;;  %v1889_v37 = vand.u32 4294901760, %v1888_v32  ;;  %v11086_v23 = vpack.c.bf16 %v10988_v1, %v10986_v63  ;;  %v11090_v15 = vpack.c.bf16 %v10999_v51, %v10997_v61 }
 0x237   : > { %v11094_v32 = vpack.c.bf16 %v11016_v12, %v11013_v11 }
 0x238   : > { %v11070_v6 = vpack.c.bf16 %v1896_v19, %v1889_v37  ;;  %v11102_v37 = vpack.c.bf16 %v11055_v0, %v11050_v21 }
 0x2d0   : > { %v1226_v19 = vpop.f32.mrb[12].mxu0 }
 0x2d1   : > { %v7670_v3 = vpop.f32.mrb[13].mxu0 }
 0x2d2   : > { %v1229_v47 = vpop.f32.mrb[14].mxu0 }
 0x2d3   : > { %v7671_v46 = vpop.f32.mrb[15].mxu0 }
 0x2d8   : > { %v1234_v5 = vpop.f32.mrb[16].mxu0 }
 0x2d9   : > { %v7674_v60 = vpop.f32.mrb[17].mxu0 }
 0x2da   : > { %v1237_v7 = vpop.f32.mrb[18].mxu0 }
 0x2db   : > { %v7675_v53 = vpop.f32.mrb[19].mxu0 }
 0x2e0   : > { %v1242_v42 = vpop.f32.mrb[20].mxu0 }
 0x2e1   : > { %v7678_v48 = vpop.f32.mrb[21].mxu0 }
 0x2e2   : > { %v1245_v39 = vpop.f32.mrb[22].mxu0 }
 0x2e3   : > { %v7679_v38 = vpop.f32.mrb[23].mxu0 }
 0x2e9   : > { %v1623_v57 = vpop.f32.mrb[0].mxu1 }
 0x2ea   : > { %v11104_v50 = vadd.f32 %v1623_v57, %v1226_v19  ;;  %v7754_v40 = vpop.f32.mrb[1].mxu1 }
 0x2eb   : > { %v1626_v35 = vpop.f32.mrb[2].mxu1 }
 0x2ec   : > { %v1650_v29 = vmul.f32 %v11104_v50, %v11104_v50  ;;  %v11108_v25 = vadd.f32 %v1626_v35, %v1229_v47  ;;  %v7755_v3 = vpop.f32.mrb[3].mxu1 }
 0x2ee   : > { %v11110_v46 = vand.u32 4294901760, %v1650_v29  ;;  %v1651_v53 = vmul.f32 %v11108_v25, %v11108_v25 }
 0x2f0   : > { %v11115_v48 = vsub.f32 %v1650_v29, %v11110_v46  ;;  %v11117_v38 = vand.u32 4294901760, %v1651_v53 }
 0x2f1   : > { %v1631_v57 = vpop.f32.mrb[4].mxu1 }
 0x2f2   : > { %v12524_v40 = vand.u32 4294901760, %v11115_v48  ;;  %v11121_v39 = vsub.f32 %v1651_v53, %v11117_v38  ;;  %v11123_v60 = vadd.f32 %v1631_v57, %v1234_v5  ;;  %v7758_v35 = vpop.f32.mrb[5].mxu1 }
 0x2f3   : > { %v1634_v47 = vpop.f32.mrb[6].mxu1 }
 0x2f4   : > { %12567 = vst [vmem:[#allocation30_spill] sm:$0xff] %v11123_v60  ;;  %v1739_v19 = vsub.f32 %v11115_v48, %v12524_v40  ;;  %v1652_v29 = vmul.f32 %v11123_v60, %v11123_v60  ;;  %v11130_v3 = vadd.f32 %v1634_v47, %v1237_v7  ;;  %v7759_v49 = vpop.f32.mrb[7].mxu1  ;;  %v12525_v36 = vand.u32 4294901760, %v11121_v39 }
 0x2f5   : > { %v12569_v40 = vmov 0.0|0.0  }
 0x2f6   : > { %12568 = vst [vmem:[#allocation31_spill] sm:$0xff] %v11130_v3  ;;  %v1740_v30 = vand.u32 4294901760, %v1739_v19  ;;  %v11133_v26 = vand.u32 4294901760, %v1652_v29  ;;  %v1653_v5 = vmul.f32 %v11130_v3, %v11130_v3  ;;  %v1749_v53 = vsub.f32 %v11121_v39, %v12525_v36 }
 0x2f8   : > { %v11141_v57 = vsub.f32 %v1652_v29, %v11133_v26  ;;  %v11143_v35 = vand.u32 4294901760, %v1653_v5  ;;  %7797 = vmatmul.mubr.f32.vlgmr.msra.gmra.mrb[24].mxu0 %v1740_v30  ;;  %v1750_v36 = vand.u32 4294901760, %v1749_v53 }
 0x2f9   : > { %9062 = vmatpush3.bf16.msra.mxu0 %v10964_v52  ;;  %v1639_v49 = vpop.f32.mrb[8].mxu1  ;;  %7799 = vmatprep.mubr.msk.f32.mxu0 %vm10357_vm2, %v10793_v18 }
 0x2fa   : > { %v11149_v7 = vsub.f32 %v1653_v5, %v11143_v35  ;;  %v11151_v47 = vadd.f32 %v1639_v49, %v1242_v42  ;;  %v7762_v19 = vpop.f32.mrb[9].mxu1  ;;  %9063 = vmatprep.subr.bf16.mxu0 %v12569_v40  ;;  %v1758_v29 = vand.u32 4294901760, %v11141_v57 }
 0x2fb   : > { %v1642_v3 = vpop.f32.mrb[10].mxu1 }
 0x2fc   : > { %v1654_v30 = vmul.f32 %v11151_v47, %v11151_v47  ;;  %v7763_v52 = vpop.f32.mrb[11].mxu1  ;;  %7800 = vmatmul.mubr.f32.gmra.mrb[26].mxu0 %v1750_v36  ;;  %v1759_v60 = vsub.f32 %v11141_v57, %v1758_v29  ;;  %v1768_v5 = vand.u32 4294901760, %v11149_v7 }
 0x2fd   : > { %9065 = vmatpush3.bf16.msra.mxu0 %v10978_v43  ;;  %7802 = vmatprep.mubr.msk.f32.mxu0 %vm10357_vm2, %v10793_v18 }
 0x2fe   : > { %v11164_v42 = vand.u32 4294901760, %v1654_v30  ;;  %9066 = vmatprep.subr.bf16.mxu0 %v12569_v40  ;;  %v1760_v3 = vand.u32 4294901760, %v1759_v60  ;;  %v1769_v36 = vsub.f32 %v11149_v7, %v1768_v5 }
 0x300   : > { %v11171_v52 = vsub.f32 %v1654_v30, %v11164_v42  ;;  %7803 = vmatmul.mubr.f32.gmra.mrb[28].mxu0 %v1760_v3  ;;  %v1770_v53 = vand.u32 4294901760, %v1769_v36  ;;  %v12570_v30 = vand.u32 4294901760, %v10930_v28  ;;  %v12571_v3 = vand.u32 4294901760, %v10932_v31 }
 0x301   : > { %9068 = vmatpush3.bf16.msra.mxu0 %v10992_v59  ;;  %7805 = vmatprep.mubr.msk.f32.mxu0 %vm10357_vm2, %v10793_v18  ;;  %v12575_v28 = vand.u32 4294901760, %v11121_v39  ;;  %v12576_v31 = vand.u32 4294901760, %v10972_v55  ;;  %v12580_v55 = vand.u32 4294901760, %v10997_v61  ;;  %v12586_v61 = vand.u32 4294901760, %v11038_v17  ;;  %v10015_v17 = vld [vmem:[#allocation10 + $0x48] sm:$0xff]  }
 0x302   : > { %9069 = vmatprep.subr.bf16.mxu0 %v12569_v40  ;;  %v12529_v49 = vand.u32 4294901760, %v11171_v52  ;;  %v11260_v36 = vpack.c.bf16 %v12571_v3, %v12570_v30 }
 0x304   : > { %7806 = vmatmul.mubr.f32.gmra.mrb[30].mxu0 %v1770_v53  ;;  %v1779_v60 = vsub.f32 %v11171_v52, %v12529_v49  ;;  %v12572_v53 = vand.u32 4294901760, %v11115_v48 }
 0x305   : > { %9071 = vmatpush3.bf16.msra.mxu0 %v11018_v13  ;;  %7808 = vmatprep.mubr.msk.f32.mxu0 %vm10357_vm2, %v10793_v18 }
 0x306   : > { %9072 = vmatprep.subr.bf16.mxu0 %v12569_v40  ;;  %v1780_v19 = vand.u32 4294901760, %v1779_v60  ;;  %v12573_v60 = vand.u32 4294901760, %v10956_v44  ;;  %v12578_v44 = vand.u32 4294901760, %v10986_v63  ;;  %v12582_v63 = vand.u32 4294901760, %v11171_v52 }
 0x308   : > { %7809 = vmatmul.mubr.f32.gmra.mrb[32].mxu0 %v1780_v19  ;;  %v12574_v19 = vand.u32 4294901760, %v10958_v45  ;;  %v12579_v45 = vand.u32 4294901760, %v10988_v1  ;;  %v12583_v1 = vand.u32 4294901760, %v11013_v11  ;;  %v12587_v11 = vand.u32 4294901760, %v11050_v21  ;;  %v10017_v21 = vld [vmem:[#allocation10 + $0x58] sm:$0xff]  }
 0x309   : > { %9074 = vmatpush3.bf16.msra.mxu0 %v11022_v54  ;;  %7843 = vmatprep.mubr.msk.f32.mxu0 %vm10357_vm2, %v10793_v18 }
 0x30a   : > { %9075 = vmatprep.subr.bf16.mxu0 %v12569_v40  ;;  %v11272_v49 = vpack.c.bf16 %v12574_v19, %v12573_v60 }
 0x30d   : > { %9077 = vmatpush3.bf16.msra.mxu0 %v11042_v10 }
 0x30e   : > { %9078 = vmatprep.subr.bf16.mxu0 %v12569_v40 }
 0x311   : > { %9080 = vmatpush3.bf16.msra.mxu0 %v11068_v33 }
 0x312   : > { %9081 = vmatprep.subr.bf16.mxu0 %v12569_v40 }
 0x315   : > { %9083 = vmatpush3.bf16.msra.mxu0 %v11070_v6 }
 0x316   : > { %9084 = vmatprep.subr.bf16.mxu0 %v12569_v40 }
 0x318   : > { %7844 = vmatmul.mubr.f32.vlgmr.msra.gmra.mrb[24].mxu0 %v11110_v46 }
 0x319   : > { %9086 = vmatpush3.bf16.msra.mxu0 %v11074_v2  ;;  %7846 = vmatprep.mubr.msk.f32.mxu0 %vm10357_vm2, %v10793_v18 }
 0x31a   : > { %9087 = vmatprep.subr.bf16.mxu0 %v12569_v40 }
 0x31c   : > { %7847 = vmatmul.mubr.f32.gmra.mrb[26].mxu0 %v11117_v38 }
 0x31d   : > { %9089 = vmatpush3.bf16.msra.mxu0 %v11078_v22  ;;  %7849 = vmatprep.mubr.msk.f32.mxu0 %vm10357_vm2, %v10793_v18 }
 0x31e   : > { %9090 = vmatprep.subr.bf16.mxu0 %v12569_v40 }
 0x320   : > { %7850 = vmatmul.mubr.f32.gmra.mrb[28].mxu0 %v11133_v26 }
 0x321   : > { %9092 = vmatpush3.bf16.msra.mxu0 %v11082_v8  ;;  %7852 = vmatprep.mubr.msk.f32.mxu0 %vm10357_vm2, %v10793_v18 }
 0x322   : > { %9093 = vmatprep.subr.bf16.mxu0 %v12569_v40 }
 0x324   : > { %7853 = vmatmul.mubr.f32.gmra.mrb[30].mxu0 %v11143_v35 }
 0x325   : > { %9095 = vmatpush3.bf16.msra.mxu0 %v11086_v23  ;;  %7855 = vmatprep.mubr.msk.f32.mxu0 %vm10357_vm2, %v10793_v18 }
 0x326   : > { %9096 = vmatprep.subr.bf16.mxu0 %v12569_v40 }
 0x328   : > { %7856 = vmatmul.mubr.f32.gmra.mrb[32].mxu0 %v11164_v42 }
 0x329   : > { %9098 = vmatpush3.bf16.msra.mxu0 %v11090_v15  ;;  %7890 = vmatprep.mubr.msk.f32.mxu0 %vm10357_vm2, %v10793_v18 }
 0x32a   : > { %9099 = vmatprep.subr.bf16.mxu0 %v12569_v40 }
 0x32d   : > { %9101 = vmatpush3.bf16.msra.mxu0 %v11094_v32 }
 0x32e   : > { %9102 = vmatprep.subr.bf16.mxu0 %v12569_v40 }
 0x331   : > { %9104 = vmatpush3.bf16.msra.mxu0 %v11098_v34 }
 0x332   : > { %9105 = vmatprep.subr.bf16.mxu0 %v12569_v40 }
 0x335   : > { %9107 = vmatpush3.bf16.msra.mxu0 %v11102_v37 }
 0x336   : > { %9108 = vmatprep.subr.bf16.mxu0 %v12569_v40 }
 0x338   : > { %7891 = vmatmul.mubr.f32.vlgmr.msra.gmra.mrb[24].mxu0 %v11115_v48  ;;  %v12577_v48 = vand.u32 4294901760, %v10974_v58  ;;  %v12581_v58 = vand.u32 4294901760, %v10999_v51  ;;  %v12585_v51 = vand.u32 4294901760, %v11033_v16  ;;  %v10014_v16 = vld [vmem:[#allocation10 + $0x40] sm:$0xff]  }
 0x339   : > { %9110 = vmatpush3.bf16.msra.mxu0 %v10887_v56  ;;  %7893 = vmatprep.mubr.msk.f32.mxu0 %vm10357_vm2, %v10793_v18 }
 0x33a   : > { %9111 = vmatprep.subr.bf16.mxu0 %v12569_v40  ;;  %v11284_v30 = vpack.c.bf16 %v12577_v48, %v12576_v31  ;;  %8047 = vmatpush3.bf16.msra.mxu1 %v10014_v16 }
 0x33c   : > { %7894 = vmatmul.mubr.f32.gmra.mrb[26].mxu0 %v11121_v39  ;;  %v11296_v39 = vpack.c.bf16 %v12579_v45, %v12578_v44 }
 0x33d   : > { %9113 = vmatpush3.bf16.msra.mxu0 %v10892_v62  ;;  %7896 = vmatprep.mubr.msk.f32.mxu0 %vm10357_vm2, %v10793_v18 }
 0x33e   : > { %9114 = vmatprep.subr.bf16.mxu0 %v12569_v40 }
 0x340   : > { %7897 = vmatmul.mubr.f32.gmra.mrb[28].mxu0 %v11141_v57  ;;  %v11308_v57 = vpack.c.bf16 %v12581_v58, %v12580_v55 }
 0x341   : > { %9116 = vmatpush3.bf16.msra.mxu0 %v10896_v4  ;;  %7899 = vmatprep.mubr.msk.f32.mxu0 %vm10357_vm2, %v10793_v18 }
 0x342   : > { %9117 = vmatprep.subr.bf16.mxu0 %v12569_v40 }
 0x344   : > { %7900 = vmatmul.mubr.f32.gmra.mrb[30].mxu0 %v11149_v7  ;;  %v12584_v7 = vand.u32 4294901760, %v11016_v12  ;;  %v12588_v12 = vand.u32 4294901760, %v11055_v0  ;;  %v10018_v0 = vld [vmem:[#allocation10 + $0x60] sm:$0xff]  }
 0x345   : > { %9119 = vmatpush3.bf16.msra.mxu0 %v10900_v9  ;;  %7902 = vmatprep.mubr.msk.f32.mxu0 %vm10357_vm2, %v10793_v18 }
 0x346   : > { %9120 = vmatprep.subr.bf16.mxu0 %v12569_v40 }
 0x348   : > { %7903 = vmatmul.mubr.f32.gmra.mrb[32].mxu0 %v11171_v52  ;;  %v11338_v52 = vpack.c.bf16 %v12588_v12, %v12587_v11 }
 0x349   : > { %9122 = vmatpush3.bf16.msra.mxu0 %v10904_v14  ;;  %7937 = vmatprep.mubr.msk.f32.mxu0 %vm10357_vm2, %v10793_v18 }
 0x34a   : > { %9123 = vmatprep.subr.bf16.mxu0 %v12569_v40 }
 0x34d   : > { %9125 = vmatpush3.bf16.msra.mxu0 %v10914_v20 }
 0x34e   : > { %9126 = vmatprep.subr.bf16.mxu0 %v12569_v40 }
 0x351   : > { %9128 = vmatpush3.bf16.msra.mxu0 %v10928_v27 }
 0x352   : > { %9129 = vmatprep.subr.bf16.mxu0 %v12569_v40 }
 0x355   : > { %9131 = vmatpush3.bf16.msra.mxu0 %v10948_v41 }
 0x356   : > { %9132 = vmatprep.subr.bf16.mxu0 %v12569_v40 }
 0x358   : > { %7938 = vmatmul.mubr.f32.vlgmr.msra.gmra.mrb[24].mxu0 %v12572_v53 }
 0x359   : > { %9134 = vmatpush3.bf16.msra.mxu0 %v11260_v36  ;;  %7940 = vmatprep.mubr.msk.f32.mxu0 %vm10357_vm2, %v10793_v18 }
 0x35a   : > { %9135 = vmatprep.subr.bf16.mxu0 %v12569_v40 }
 0x35c   : > { %7941 = vmatmul.mubr.f32.gmra.mrb[26].mxu0 %v12575_v28 }
 0x35d   : > { %9137 = vmatpush3.bf16.msra.mxu0 %v11272_v49  ;;  %7943 = vmatprep.mubr.msk.f32.mxu0 %vm10357_vm2, %v10793_v18 }
 0x35e   : > { %9138 = vmatprep.subr.bf16.mxu0 %v12569_v40 }
 0x360   : > { %7944 = vmatmul.mubr.f32.gmra.mrb[28].mxu0 %v1758_v29  ;;  %v11318_v29 = vpack.c.bf16 %v12584_v7, %v12583_v1 }
 0x361   : > { %9140 = vmatpush3.bf16.msra.mxu0 %v11284_v30  ;;  %7946 = vmatprep.mubr.msk.f32.mxu0 %vm10357_vm2, %v10793_v18 }
 0x362   : > { %9141 = vmatprep.subr.bf16.mxu0 %v12569_v40 }
 0x364   : > { %7947 = vmatmul.mubr.f32.gmra.mrb[30].mxu0 %v1768_v5  ;;  %v11330_v5 = vpack.c.bf16 %v12586_v61, %v12585_v51 }
 0x365   : > { %9143 = vmatpush3.bf16.msra.mxu0 %v11296_v39  ;;  %7949 = vmatprep.mubr.msk.f32.mxu0 %vm10357_vm2, %v10793_v18  ;;  %v11320_v18 = vld [vmem:[#allocation3] sm:$0xff] }
 0x366   : > { %9144 = vmatprep.subr.bf16.mxu0 %v12569_v40  ;;  %8048 = vmatprep.subr.bf16.mxu1 %v11320_v18 }
 0x367   : > { %8049 = vmatpush3.bf16.msra.mxu1 %v10015_v17 }
 0x368   : > { %7950 = vmatmul.mubr.f32.gmra.mrb[32].mxu0 %v12582_v63  ;;  %8050 = vmatprep.subr.bf16.mxu1 %v11320_v18 }
 0x369   : > { %9146 = vmatpush3.bf16.msra.mxu0 %v11308_v57  ;;  %7984 = vmatprep.mubr.msk.f32.mxu0 %vm10357_vm2, %v11320_v18 }
 0x36a   : > { %9147 = vmatprep.subr.bf16.mxu0 %v12569_v40 }
 0x36d   : > { %9149 = vmatpush3.bf16.msra.mxu0 %v11318_v29 }
 0x36e   : > { %9150 = vmatprep.subr.bf16.mxu0 %v12569_v40 }
 0x371   : > { %9152 = vmatpush3.bf16.msra.mxu0 %v11330_v5 }
 0x372   : > { %9153 = vmatprep.subr.bf16.mxu0 %v12569_v40 }
 0x375   : > { %9155 = vmatpush3.bf16.msra.mxu0 %v11338_v52 }
 0x376   : > { %9156 = vmatprep.subr.bf16.mxu0 %v12569_v40 }
 0x378   : > { %7985 = vmatmul.mubr.f32.vlgmr.msra.gmra.mrb[24].mxu0 %v11110_v46 }
 0x379   : > { %9158 = vmatpush3.bf16.msra.mxu0 %v10887_v56  ;;  %7987 = vmatprep.mubr.msk.f32.mxu0 %vm10357_vm2, %v11320_v18 }
 0x37a   : > { %9159 = vmatprep.subr.bf16.mxu0 %v12569_v40 }
 0x37c   : > { %7988 = vmatmul.mubr.f32.gmra.mrb[26].mxu0 %v11117_v38 }
 0x37d   : > { %9161 = vmatpush3.bf16.msra.mxu0 %v10892_v62  ;;  %7990 = vmatprep.mubr.msk.f32.mxu0 %vm10357_vm2, %v11320_v18 }
 0x37e   : > { %9162 = vmatprep.subr.bf16.mxu0 %v12569_v40 }
 0x380   : > { %7991 = vmatmul.mubr.f32.gmra.mrb[28].mxu0 %v11133_v26 }
 0x381   : > { %9164 = vmatpush3.bf16.msra.mxu0 %v10896_v4  ;;  %7993 = vmatprep.mubr.msk.f32.mxu0 %vm10357_vm2, %v11320_v18 }
 0x382   : > { %9165 = vmatprep.subr.bf16.mxu0 %v12569_v40 }
 0x384   : > { %7994 = vmatmul.mubr.f32.gmra.mrb[30].mxu0 %v11143_v35 }
 0x385   : > { %9167 = vmatpush3.bf16.msra.mxu0 %v10900_v9  ;;  %7996 = vmatprep.mubr.msk.f32.mxu0 %vm10357_vm2, %v11320_v18 }
 0x386   : > { %9168 = vmatprep.subr.bf16.mxu0 %v12569_v40 }
 0x388   : > { %7997 = vmatmul.mubr.f32.gmra.mrb[32].mxu0 %v11164_v42 }
 0x389   : > { %9170 = vmatpush3.bf16.msra.mxu0 %v10904_v14  ;;  %8031 = vmatprep.mubr.msk.f32.mxu0 %vm10357_vm2, %v11320_v18 }
 0x38a   : > { %9171 = vmatprep.subr.bf16.mxu0 %v12569_v40 }
 0x38d   : > { %9173 = vmatpush3.bf16.msra.mxu0 %v10914_v20 }
 0x38e   : > { %9174 = vmatprep.subr.bf16.mxu0 %v12569_v40 }
 0x391   : > { %9176 = vmatpush3.bf16.msra.mxu0 %v10928_v27 }
 0x392   : > { %9177 = vmatprep.subr.bf16.mxu0 %v12569_v40 }
 0x395   : > { %9179 = vmatpush3.bf16.msra.mxu0 %v10948_v41 }
 0x396   : > { %8186 = vmatprep.subr.bf16.mxu0 %v11320_v18 }
 0x398   : > { %8032 = vmatmul.mubr.f32.vlgmr.msra.gmra.mrb[24].mxu0 %v11110_v46  ;;  %v10019_v46 = vld [vmem:[#allocation10 + $0x68] sm:$0xff]  }
 0x399   : > { %8034 = vmatprep.mubr.msk.f32.mxu0 %vm10357_vm2, %v11320_v18 }
 0x39c   : > { %8035 = vmatmul.mubr.f32.gmra.mrb[26].mxu0 %v11117_v38  ;;  %v10020_v38 = vld [vmem:[#allocation10 + $0x70] sm:$0xff]  }
 0x39d   : > { %8037 = vmatprep.mubr.msk.f32.mxu0 %vm10357_vm2, %v11320_v18 }
 0x3a0   : > { %8038 = vmatmul.mubr.f32.gmra.mrb[28].mxu0 %v11133_v26  ;;  %v10016_v26 = vld [vmem:[#allocation10 + $0x50] sm:$0xff]  }
 0x3a1   : > { %8040 = vmatprep.mubr.msk.f32.mxu0 %vm10357_vm2, %v11320_v18  ;;  %8051 = vmatpush3.bf16.msra.mxu1 %v10016_v26 }
 0x3a2   : > { %8052 = vmatprep.subr.bf16.mxu1 %v11320_v18 }
 0x3a4   : > { %8041 = vmatmul.mubr.f32.gmra.mrb[30].mxu0 %v11143_v35  ;;  %v10021_v35 = vld [vmem:[#allocation10 + $0x78] sm:$0xff]  }
 0x3a5   : > { %8043 = vmatprep.mubr.msk.f32.mxu0 %vm10357_vm2, %v11320_v18  ;;  %8053 = vmatpush3.bf16.msra.mxu1 %v10017_v21 }
 0x3a6   : > { %8054 = vmatprep.subr.bf16.mxu1 %v11320_v18 }
 0x3a8   : > { %8044 = vmatmul.mubr.f32.gmra.mrb[32].mxu0 %v11164_v42 }
 0x3a9   : > { %8202 = vmatprep.mubr.msk.bf16.mxu0 %vm10357_vm2, %v11320_v18  ;;  %8055 = vmatpush3.bf16.msra.mxu1 %v10018_v0  ;;  %v12589_v0 = vld [vmem:[#allocation21_spill] sm:$0xff] }
 0x3aa   : > { %8056 = vmatprep.subr.bf16.mxu1 %v11320_v18 }
 0x3ad   : > { %8057 = vmatpush3.bf16.msra.mxu1 %v10019_v46 }
 0x3ae   : > { %8058 = vmatprep.subr.bf16.mxu1 %v11320_v18 }
 0x3b1   : > { %8059 = vmatpush3.bf16.msra.mxu1 %v10020_v38 }
 0x3b2   : > { %8060 = vmatprep.subr.bf16.mxu1 %v11320_v18 }
 0x3b5   : > { %8061 = vmatpush3.bf16.msra.mxu1 %v10021_v35 }
 0x3b6   : > { %8074 = vmatprep.subr.bf16.mxu1 %v11320_v18 }
 0x46b   : > { %v2440_v42 = vpop.f32.mrb[24].mxu0 }
 0x46c   : > { %v9509_v3 = vadd.f32 0.001, %v2440_v42  ;;  %v8033_v53 = vpop.f32.mrb[25].mxu0 }
 0x46d   : > { %v12591_v53 = vld [vmem:[#allocation23_spill] sm:$0xff] }
 0x46e   : > { %10134 = vrsqrt.f32 %v9509_v3 }
 0x46f   : > { %v2446_v60 = vpop.f32.mrb[26].mxu0 }
 0x470   : > { %v9510_v19 = vadd.f32 0.001, %v2446_v60  ;;  %v8036_v28 = vpop.f32.mrb[27].mxu0 }
 0x472   : > { %10136 = vrsqrt.f32 %v9510_v19 }
 0x473   : > { %v2452_v31 = vpop.f32.mrb[28].mxu0 }
 0x474   : > { %v9511_v48 = vadd.f32 0.001, %v2452_v31  ;;  %v8039_v44 = vpop.f32.mrb[29].mxu0 }
 0x476   : > { %10138 = vrsqrt.f32 %v9511_v48  ;;  %v12593_v48 = vld [vmem:[#allocation25_spill] sm:$0xff] }
 0x477   : > { %v2458_v45 = vpop.f32.mrb[30].mxu0 }
 0x478   : > { %v10135_v55 = vpop.eup %10134  ;;  %v9512_v58 = vadd.f32 0.001, %v2458_v45  ;;  %v8042_v63 = vpop.f32.mrb[31].mxu0 }
 0x479   : > { %v2473_v1 = vmul.f32 %v10135_v55, %v11104_v50  ;;  %v12590_v50 = vld [vmem:[#allocation30_spill] sm:$0xff]  ;;  %v10022_v63 = vld [vmem:[#allocation10] sm:$0xff]  }
 0x47a   : > { %10140 = vrsqrt.f32 %v9512_v58 }
 0x47b   : > { %v2478_v7 = vmax.f32 %v2473_v1, 0.0  ;;  %v2464_v51 = vpop.f32.mrb[32].mxu0 }
 0x47c   : > { %v10137_v61 = vpop.eup %10136  ;;  %v9513_v11 = vadd.f32 0.001, %v2464_v51  ;;  %v8045_v12 = vpop.f32.mrb[33].mxu0 }
 0x47d   : > { %v11399_v16 = vmul.f32 %v2478_v7, %v10804_v24  ;;  %v2474_v17 = vmul.f32 %v10137_v61, %v11108_v25  ;;  %v12592_v25 = vld [vmem:[#allocation31_spill] sm:$0xff]  ;;  %v10023_v12 = vld [vmem:[#allocation10 + $0x8] sm:$0xff]  }
 0x47e   : > { %10142 = vrsqrt.f32 %v9513_v11  ;;  %v12594_v61 = vld [vmem:[#allocation27_spill] sm:$0xff] }
 0x47f   : > { %2488 = vst [vmem:[#allocation4 + $0x8] sm:$0xff] %v11399_v16  ;;  %v2479_v26 = vmax.f32 %v2474_v17, 0.0 }
 0x480   : > { %v10139_v21 = vpop.eup %10138 }
 0x481   : > { %v11404_v46 = vmul.f32 %v2479_v26, %v12589_v0  ;;  %v2475_v38 = vmul.f32 %v10139_v21, %v12590_v50  ;;  %v10024_v26 = vld [vmem:[#allocation10 + $0x10] sm:$0xff]   ;;  %v10025_v50 = vld [vmem:[#allocation10 + $0x18] sm:$0xff]  }
 0x483   : > { %2489 = vst [vmem:[#allocation4 + $0x10] sm:$0xff] %v11404_v46  ;;  %v2480_v35 = vmax.f32 %v2475_v38, 0.0  ;;  %v2755_v42 = vpack.c.bf16 %v11404_v46, %v11399_v16  ;;  %v10042_v16 = vld [vmem:[#allocation10 + $0xe0] sm:$0xff]  }
 0x484   : > { %v10141_v3 = vpop.eup %10140 }
 0x485   : > { %v11411_v60 = vmul.f32 %v2480_v35, %v12591_v53  ;;  %v2476_v19 = vmul.f32 %v10141_v3, %v12592_v25  ;;  %v10026_v35 = vld [vmem:[#allocation10 + $0x20] sm:$0xff]  }
 0x486   : > { %v2517_v55 = vld [vmem:[#allocation4 + $0x7] sm:$0xff]  ;;  %v10054_v25 = vld [vmem:[#allocation8 + $0x180] sm:$0xff]  }
 0x487   : > { %2490 = vst [vmem:[#allocation4 + $0x18] sm:$0xff] %v11411_v60  ;;  %v2481_v28 = vmax.f32 %v2476_v19, 0.0  ;;  %v10027_v19 = vld [vmem:[#allocation10 + $0x28] sm:$0xff]   ;;  %8187 = vmatpush3.bf16.msra.mxu0 %v10054_v25 }
 0x488   : > { %v10143_v31 = vpop.eup %10142  ;;  %8188 = vmatprep.subr.bf16.mxu0 %v11320_v18 }
 0x489   : > { %v11416_v44 = vmul.f32 %v2481_v28, %v12593_v48  ;;  %v2477_v45 = vmul.f32 %v10143_v31, %v11151_v47  ;;  %v10055_v28 = vld [vmem:[#allocation8 + $0x188] sm:$0xff]   ;;  %v10028_v31 = vld [vmem:[#allocation10 + $0x30] sm:$0xff]  }
 0x48a   : > { %v2518_v58 = vld [vmem:[#allocation4 + $0xf] sm:$0xff] }
 0x48b   : > { %2491 = vst [vmem:[#allocation4 + $0x20] sm:$0xff] %v11416_v44  ;;  %v2482_v1 = vmax.f32 %v2477_v45, 0.0  ;;  %v2522_v7 = vpack.c.bf16 %v2518_v58, %v2517_v55  ;;  %v2756_v51 = vpack.c.bf16 %v11416_v44, %v11411_v60  ;;  %8189 = vmatpush3.bf16.msra.mxu0 %v10055_v28  ;;  %v10056_v45 = vld [vmem:[#allocation8 + $0x190] sm:$0xff]   ;;  %v10029_v55 = vld [vmem:[#allocation10 + $0x38] sm:$0xff]  }
 0x48c   : > { %8190 = vmatprep.subr.bf16.mxu0 %v11320_v18  ;;  %v10057_v58 = vld [vmem:[#allocation8 + $0x198] sm:$0xff]   ;;  %v10036_v28 = vld [vmem:[#allocation10 + $0xb0] sm:$0xff]  }
 0x48d   : > { %v11423_v11 = vmul.f32 %v2482_v1, %v12594_v61  ;;  %8063 = vmatmul.mubr.bf16.vlgmr.msra.gmra.mrb[12].mxu1 %v2522_v7  ;;  %v2493_v1 = vld [vmem:[#allocation4 + $0x6] sm:$0xff]  ;;  %v10030_v7 = vld [vmem:[#allocation10 + $0x80] sm:$0xff]   ;;  %v10045_v44 = vld [vmem:[#allocation10 + $0xf8] sm:$0xff]  }
 0x48e   : > { %8075 = vmatpush3.bf16.msra.mxu1 %v10022_v63  ;;  %8066 = vmatprep.mubr.msk.bf16.mxu1 %vm10357_vm2, %v11320_v18  ;;  %v2519_v47 = vld [vmem:[#allocation4 + $0x17] sm:$0xff]  ;;  %v2494_v63 = vld [vmem:[#allocation4 + $0xe] sm:$0xff] }
 0x48f   : > { %2492 = vst [vmem:[#allocation4 + $0x28] sm:$0xff] %v11423_v11  ;;  %8076 = vmatprep.subr.bf16.mxu1 %v11320_v18  ;;  %8191 = vmatpush3.bf16.msra.mxu0 %v10056_v45  ;;  %v10038_v45 = vld [vmem:[#allocation10 + $0xc0] sm:$0xff]   ;;  %v2757_v46 = vpack.c.bf16 %v11423_v11, %v11423_v11  ;;  %v10044_v60 = vld [vmem:[#allocation10 + $0xf0] sm:$0xff]  }
 0x490   : > { %8192 = vmatprep.subr.bf16.mxu0 %v11320_v18  ;;  %v2884_v11 = vld [vmem:[#allocation4 + $0x9] sm:$0xff] }
 0x492   : > { %8077 = vmatpush3.bf16.msra.mxu1 %v10023_v12  ;;  %v2520_v17 = vld [vmem:[#allocation4 + $0x1f] sm:$0xff]  ;;  %v2498_v12 = vpack.c.bf16 %v2494_v63, %v2493_v1  ;;  %v10041_v63 = vld [vmem:[#allocation10 + $0xd8] sm:$0xff]  }
 0x493   : > { %8078 = vmatprep.subr.bf16.mxu1 %v11320_v18  ;;  %v2523_v21 = vpack.c.bf16 %v2520_v17, %v2519_v47  ;;  %8193 = vmatpush3.bf16.msra.mxu0 %v10057_v58  ;;  %v10031_v47 = vld [vmem:[#allocation10 + $0x88] sm:$0xff]   ;;  %v10040_v58 = vld [vmem:[#allocation10 + $0xd0] sm:$0xff]   ;;  %v10046_v1 = vld [vmem:[#allocation10 + $0x100] sm:$0xff]  }
 0x494   : > { %8194 = vmatprep.subr.bf16.mxu0 %v11320_v18  ;;  %v2496_v17 = vld [vmem:[#allocation4 + $0x1e] sm:$0xff] }
 0x495   : > { %8067 = vmatmul.mubr.bf16.gmra.mrb[16].mxu1 %v2523_v21  ;;  %v10032_v21 = vld [vmem:[#allocation10 + $0x90] sm:$0xff]  }
 0x496   : > { %8079 = vmatpush3.bf16.msra.mxu1 %v10024_v26  ;;  %8070 = vmatprep.mubr.msk.bf16.mxu1 %vm10357_vm2, %v11320_v18  ;;  %v2521_v38 = vld [vmem:[#allocation4 + $0x27] sm:$0xff]  ;;  %v2495_v26 = vld [vmem:[#allocation4 + $0x16] sm:$0xff] }
 0x497   : > { %8080 = vmatprep.subr.bf16.mxu1 %v11320_v18  ;;  %v2524_v3 = vpack.c.bf16 %v2521_v38, %v2521_v38  ;;  %v10033_v38 = vld [vmem:[#allocation10 + $0x98] sm:$0xff]  }
 0x49a   : > { %8081 = vmatpush3.bf16.msra.mxu1 %v10025_v50  ;;  %v2499_v50 = vpack.c.bf16 %v2496_v17, %v2495_v26  ;;  %v2886_v17 = vld [vmem:[#allocation4 + $0x19] sm:$0xff]  ;;  %v10048_v26 = vld [vmem:[#allocation10 + $0x110] sm:$0xff]  }
 0x49b   : > { %8082 = vmatprep.subr.bf16.mxu1 %v11320_v18 }
 0x49d   : > { %8071 = vmatmul.mubr.bf16.gmra.mrb[20].mxu1 %v2524_v3  ;;  %v10034_v3 = vld [vmem:[#allocation10 + $0xa0] sm:$0xff]  }
 0x49e   : > { %8083 = vmatpush3.bf16.msra.mxu1 %v10026_v35  ;;  %8090 = vmatprep.mubr.msk.bf16.mxu1 %vm10357_vm2, %v11320_v18  ;;  %v2497_v35 = vld [vmem:[#allocation4 + $0x26] sm:$0xff] }
 0x49f   : > { %8084 = vmatprep.subr.bf16.mxu1 %v11320_v18  ;;  %v2500_v25 = vpack.c.bf16 %v2497_v35, %v2497_v35  ;;  %v10050_v35 = vld [vmem:[#allocation10 + $0x120] sm:$0xff]  }
 0x4a2   : > { %8085 = vmatpush3.bf16.msra.mxu1 %v10027_v19  ;;  %v10035_v19 = vld [vmem:[#allocation10 + $0xa8] sm:$0xff]  }
 0x4a3   : > { %8086 = vmatprep.subr.bf16.mxu1 %v11320_v18 }
 0x4a6   : > { %8087 = vmatpush3.bf16.msra.mxu1 %v10028_v31  ;;  %v10037_v31 = vld [vmem:[#allocation10 + $0xb8] sm:$0xff]  }
 0x4a7   : > { %8088 = vmatprep.subr.bf16.mxu1 %v11320_v18 }
 0x4aa   : > { %8089 = vmatpush3.bf16.msra.mxu1 %v10029_v55  ;;  %v10039_v55 = vld [vmem:[#allocation10 + $0xc8] sm:$0xff]  }
 0x4ab   : > { %8102 = vmatprep.subr.bf16.mxu1 %v11320_v18 }
 0x4ad   : > { %8091 = vmatmul.mubr.bf16.vlgmr.msra.gmra.mrb[12].mxu1 %v2498_v12  ;;  %v10047_v12 = vld [vmem:[#allocation10 + $0x108] sm:$0xff]  }
 0x4ae   : > { %8103 = vmatpush3.bf16.msra.mxu1 %v10030_v7  ;;  %8094 = vmatprep.mubr.msk.bf16.mxu1 %vm10357_vm2, %v11320_v18 }
 0x4af   : > { %8104 = vmatprep.subr.bf16.mxu1 %v11320_v18 }
 0x4b2   : > { %8105 = vmatpush3.bf16.msra.mxu1 %v10031_v47  ;;  %v2887_v47 = vld [vmem:[#allocation4 + $0x21] sm:$0xff] }
 0x4b3   : > { %8106 = vmatprep.subr.bf16.mxu1 %v11320_v18 }
 0x4b5   : > { %8095 = vmatmul.mubr.bf16.gmra.mrb[16].mxu1 %v2499_v50  ;;  %v10049_v50 = vld [vmem:[#allocation10 + $0x118] sm:$0xff]  }
 0x4b6   : > { %8107 = vmatpush3.bf16.msra.mxu1 %v10032_v21  ;;  %8098 = vmatprep.mubr.msk.bf16.mxu1 %vm10357_vm2, %v11320_v18  ;;  %v2890_v21 = vpack.c.bf16 %v2887_v47, %v2886_v17  ;;  %v12595_v17 = vld [vmem:[#allocation20_spill] sm:$0xff] }
 0x4b7   : > { %8108 = vmatprep.subr.bf16.mxu1 %v11320_v18 }
 0x4ba   : > { %8109 = vmatpush3.bf16.msra.mxu1 %v10033_v38  ;;  %v2888_v38 = vld [vmem:[#allocation4 + $0x29] sm:$0xff] }
 0x4bb   : > { %8110 = vmatprep.subr.bf16.mxu1 %v11320_v18 }
 0x4bd   : > { %8099 = vmatmul.mubr.bf16.gmra.mrb[20].mxu1 %v2500_v25  ;;  %v10051_v25 = vld [vmem:[#allocation10 + $0x128] sm:$0xff]  }
 0x4be   : > { %8111 = vmatpush3.bf16.msra.mxu1 %v10034_v3  ;;  %8118 = vmatprep.mubr.msk.bf16.mxu1 %vm10357_vm2, %v11320_v18  ;;  %v2891_v3 = vpack.c.bf16 %v2888_v38, %v2888_v38 }
 0x4bf   : > { %8112 = vmatprep.subr.bf16.mxu1 %v11320_v18 }
 0x4c2   : > { %8113 = vmatpush3.bf16.msra.mxu1 %v10035_v19  ;;  %v10052_v19 = vld [vmem:[#allocation10 + $0x130] sm:$0xff]  }
 0x4c3   : > { %8114 = vmatprep.subr.bf16.mxu1 %v11320_v18 }
 0x4c6   : > { %8115 = vmatpush3.bf16.msra.mxu1 %v10036_v28  ;;  %v10053_v28 = vld [vmem:[#allocation10 + $0x138] sm:$0xff]  }
 0x4c7   : > { %8116 = vmatprep.subr.bf16.mxu1 %v11320_v18 }
 0x4ca   : > { %8117 = vmatpush3.bf16.msra.mxu1 %v10037_v31  ;;  %v3019_v31 = vld [vmem:[#allocation4 + $0x12] sm:$0xff] }
 0x4cb   : > { %8130 = vmatprep.subr.bf16.mxu1 %v11320_v18 }
 0x4cd   : > { %8119 = vmatmul.mubr.bf16.vlgmr.msra.gmra.mrb[12].mxu1 %v2755_v42  ;;  %v10043_v42 = vld [vmem:[#allocation10 + $0xe8] sm:$0xff]  }
 0x4ce   : > { %8131 = vmatpush3.bf16.msra.mxu1 %v10038_v45  ;;  %8122 = vmatprep.mubr.msk.bf16.mxu1 %vm10357_vm2, %v11320_v18  ;;  %v3018_v45 = vld [vmem:[#allocation4 + $0xa] sm:$0xff] }
 0x4cf   : > { %8132 = vmatprep.subr.bf16.mxu1 %v11320_v18 }
 0x4d2   : > { %8133 = vmatpush3.bf16.msra.mxu1 %v10039_v55  ;;  %v3023_v55 = vpack.c.bf16 %v3019_v31, %v3018_v45 }
 0x4d3   : > { %8134 = vmatprep.subr.bf16.mxu1 %v11320_v18 }
 0x4d5   : > { %8123 = vmatmul.mubr.bf16.gmra.mrb[16].mxu1 %v2756_v51  ;;  %v2885_v51 = vld [vmem:[#allocation4 + $0x11] sm:$0xff] }
 0x4d6   : > { %8135 = vmatpush3.bf16.msra.mxu1 %v10040_v58  ;;  %8126 = vmatprep.mubr.msk.bf16.mxu1 %vm10357_vm2, %v11320_v18  ;;  %v2889_v7 = vpack.c.bf16 %v2885_v51, %v2884_v11  ;;  %v3021_v58 = vld [vmem:[#allocation4 + $0x22] sm:$0xff]  ;;  %v10061_v11 = vld [vmem:[#allocation8 + $0x1b8] sm:$0xff]  }
 0x4d7   : > { %8136 = vmatprep.subr.bf16.mxu1 %v11320_v18  ;;  %v10060_v51 = vld [vmem:[#allocation8 + $0x1b0] sm:$0xff]  }
 0x4da   : > { %8137 = vmatpush3.bf16.msra.mxu1 %v10041_v63  ;;  %v3020_v63 = vld [vmem:[#allocation4 + $0x1a] sm:$0xff] }
 0x4db   : > { %8138 = vmatprep.subr.bf16.mxu1 %v11320_v18 }
 0x4dd   : > { %8127 = vmatmul.mubr.bf16.gmra.mrb[20].mxu1 %v2757_v46  ;;  %v3022_v46 = vld [vmem:[#allocation4 + $0x2a] sm:$0xff] }
 0x4de   : > { %8139 = vmatpush3.bf16.msra.mxu1 %v10042_v16  ;;  %8146 = vmatprep.mubr.msk.bf16.mxu1 %vm10357_vm2, %v11320_v18  ;;  %v3024_v16 = vpack.c.bf16 %v3021_v58, %v3020_v63  ;;  %v12597_v58 = vld [vmem:[#allocation24_spill] sm:$0xff] }
 0x4df   : > { %8140 = vmatprep.subr.bf16.mxu1 %v11320_v18 }
 0x4e2   : > { %8141 = vmatpush3.bf16.msra.mxu1 %v10043_v42  ;;  %v3025_v42 = vpack.c.bf16 %v3022_v46, %v3022_v46 }
 0x4e3   : > { %8142 = vmatprep.subr.bf16.mxu1 %v11320_v18 }
 0x4e6   : > { %8143 = vmatpush3.bf16.msra.mxu1 %v10044_v60  ;;  %v10058_v60 = vld [vmem:[#allocation8 + $0x1a0] sm:$0xff]  }
 0x4e7   : > { %8144 = vmatprep.subr.bf16.mxu1 %v11320_v18  ;;  %8195 = vmatpush3.bf16.msra.mxu0 %v10058_v60  ;;  %v12598_v60 = vld [vmem:[#allocation26_spill] sm:$0xff] }
 0x4e8   : > { %8196 = vmatprep.subr.bf16.mxu0 %v11320_v18 }
 0x4ea   : > { %8145 = vmatpush3.bf16.msra.mxu1 %v10045_v44  ;;  %v10059_v44 = vld [vmem:[#allocation8 + $0x1a8] sm:$0xff]  }
 0x4eb   : > { %8158 = vmatprep.subr.bf16.mxu1 %v11320_v18  ;;  %8197 = vmatpush3.bf16.msra.mxu0 %v10059_v44 }
 0x4ec   : > { %8198 = vmatprep.subr.bf16.mxu0 %v11320_v18 }
 0x4ed   : > { %8147 = vmatmul.mubr.bf16.vlgmr.msra.gmra.mrb[12].mxu1 %v2889_v7 }
 0x4ee   : > { %8159 = vmatpush3.bf16.msra.mxu1 %v10046_v1  ;;  %8150 = vmatprep.mubr.msk.bf16.mxu1 %vm10357_vm2, %v11320_v18 }
 0x4ef   : > { %8160 = vmatprep.subr.bf16.mxu1 %v11320_v18  ;;  %8199 = vmatpush3.bf16.msra.mxu0 %v10060_v51 }
 0x4f0   : > { %8200 = vmatprep.subr.bf16.mxu0 %v11320_v18 }
 0x4f2   : > { %8161 = vmatpush3.bf16.msra.mxu1 %v10047_v12 }
 0x4f3   : > { %8162 = vmatprep.subr.bf16.mxu1 %v11320_v18  ;;  %8201 = vmatpush3.bf16.msra.mxu0 %v10061_v11 }
 0x4f4   : > { %8214 = vmatprep.subr.bf16.mxu0 %v11320_v18 }
 0x4f5   : > { %8151 = vmatmul.mubr.bf16.gmra.mrb[16].mxu1 %v2890_v21 }
 0x4f6   : > { %8163 = vmatpush3.bf16.msra.mxu1 %v10048_v26  ;;  %8154 = vmatprep.mubr.msk.bf16.mxu1 %vm10357_vm2, %v11320_v18 }
 0x4f7   : > { %8164 = vmatprep.subr.bf16.mxu1 %v11320_v18 }
 0x4fa   : > { %8165 = vmatpush3.bf16.msra.mxu1 %v10049_v50 }
 0x4fb   : > { %8166 = vmatprep.subr.bf16.mxu1 %v11320_v18 }
 0x4fd   : > { %8155 = vmatmul.mubr.bf16.gmra.mrb[20].mxu1 %v2891_v3 }
 0x4fe   : > { %8167 = vmatpush3.bf16.msra.mxu1 %v10050_v35  ;;  %8174 = vmatprep.mubr.msk.bf16.mxu1 %vm10357_vm2, %v11320_v18  ;;  %v12596_v35 = vld [vmem:[#allocation22_spill] sm:$0xff] }
 0x4ff   : > { %8168 = vmatprep.subr.bf16.mxu1 %v11320_v18 }
 0x502   : > { %8169 = vmatpush3.bf16.msra.mxu1 %v10051_v25 }
 0x503   : > { %8170 = vmatprep.subr.bf16.mxu1 %v11320_v18 }
 0x506   : > { %8171 = vmatpush3.bf16.msra.mxu1 %v10052_v19 }
 0x507   : > { %8172 = vmatprep.subr.bf16.mxu1 %v11320_v18 }
 0x50a   : > { %8173 = vmatpush3.bf16.msra.mxu1 %v10053_v28 }
 0x50b   : > { %9180 = vmatprep.subr.bf16.mxu1 %v12569_v40 }
 0x50d   : > { %8175 = vmatmul.mubr.bf16.vlgmr.msra.gmra.mrb[12].mxu1 %v3023_v55 }
 0x50e   : > { %8178 = vmatprep.mubr.msk.bf16.mxu1 %vm10357_vm2, %v11320_v18  ;;  %9182 = vmatpush3.bf16.msra.mxu1 %v10887_v56 }
 0x50f   : > { %9183 = vmatprep.subr.bf16.mxu1 %v12569_v40 }
 0x512   : > { %9185 = vmatpush3.bf16.msra.mxu1 %v10892_v62 }
 0x513   : > { %9186 = vmatprep.subr.bf16.mxu1 %v12569_v40 }
 0x515   : > { %8179 = vmatmul.mubr.bf16.gmra.mrb[16].mxu1 %v3024_v16 }
 0x516   : > { %8182 = vmatprep.mubr.msk.bf16.mxu1 %vm10357_vm2, %v11320_v18  ;;  %9188 = vmatpush3.bf16.msra.mxu1 %v10896_v4 }
 0x517   : > { %9189 = vmatprep.subr.bf16.mxu1 %v12569_v40 }
 0x51a   : > { %9191 = vmatpush3.bf16.msra.mxu1 %v10900_v9 }
 0x51b   : > { %9192 = vmatprep.subr.bf16.mxu1 %v12569_v40 }
 0x51d   : > { %8183 = vmatmul.mubr.bf16.gmra.mrb[20].mxu1 %v3025_v42 }
 0x51e   : > { %9194 = vmatpush3.bf16.msra.mxu1 %v10904_v14  ;;  %8358 = vmatprep.mubr.msk.f32.mxu1 %vm10357_vm2, %v11320_v18 }
 0x51f   : > { %9195 = vmatprep.subr.bf16.mxu1 %v12569_v40 }
 0x522   : > { %9197 = vmatpush3.bf16.msra.mxu1 %v10914_v20 }
 0x523   : > { %9198 = vmatprep.subr.bf16.mxu1 %v12569_v40 }
 0x526   : > { %9200 = vmatpush3.bf16.msra.mxu1 %v10928_v27 }
 0x527   : > { %9201 = vmatprep.subr.bf16.mxu1 %v12569_v40 }
 0x52a   : > { %9203 = vmatpush3.bf16.msra.mxu1 %v10948_v41 }
 0x52b   : > { %9204 = vmatprep.subr.bf16.mxu1 %v12569_v40 }
 0x5e0   : > { %v3125_v1 = vpop.f32.mrb[12].mxu1 }
 0x5e1   : > { %v3152_v7 = vmul.f32 0.1, %v3125_v1  ;;  %v8176_v12 = vpop.f32.mrb[13].mxu1 }
 0x5e2   : > { %v3128_v47 = vpop.f32.mrb[14].mxu1  ;;  %v10062_v12 = vld [vmem:[#allocation8 + $0x140] sm:$0xff]  }
 0x5e3   : > { %v11521_v26 = vadd.f32 %v3152_v7, %v12595_v17  ;;  %v3153_v21 = vmul.f32 0.1, %v3128_v47  ;;  %v8177_v50 = vpop.f32.mrb[15].mxu1 }
 0x5e5   : > { %v11525_v38 = vmul.f32 %v11521_v26, %v10804_v24  ;;  %v11528_v3 = vadd.f32 %v3153_v21, %v12596_v35 }
 0x5e7   : > { %3167 = vst [vmem:[#allocation3 + $0x8] sm:$0xff] %v11525_v38  ;;  %v11533_v25 = vmul.f32 %v11528_v3, %v12589_v0 }
 0x5e8   : > { %v3133_v19 = vpop.f32.mrb[16].mxu1 }
 0x5e9   : > { %3168 = vst [vmem:[#allocation3 + $0x10] sm:$0xff] %v11533_v25  ;;  %v3154_v28 = vmul.f32 0.1, %v3133_v19  ;;  %v8180_v31 = vpop.f32.mrb[17].mxu1  ;;  %v3435_v45 = vpack.c.bf16 %v11533_v25, %v11525_v38  ;;  %v12600_v19 = vld [vmem:[#allocation28_spill] sm:$0xff] }
 0x5ea   : > { %v3136_v55 = vpop.f32.mrb[18].mxu1  ;;  %v10082_v38 = vld [vmem:[#allocation8 + $0x220] sm:$0xff]  }
 0x5eb   : > { %v11539_v63 = vadd.f32 %v3154_v28, %v12597_v58  ;;  %v3155_v16 = vmul.f32 0.1, %v3136_v55  ;;  %v8181_v46 = vpop.f32.mrb[19].mxu1  ;;  %v10063_v55 = vld [vmem:[#allocation8 + $0x148] sm:$0xff]  }
 0x5ed   : > { %v11543_v42 = vmul.f32 %v11539_v63, %v12591_v53  ;;  %v11546_v44 = vadd.f32 %v3155_v16, %v12598_v60  ;;  %v10064_v60 = vld [vmem:[#allocation8 + $0x150] sm:$0xff]  }
 0x5ee   : > { %v3197_v1 = vld [vmem:[#allocation3 + $0x7] sm:$0xff] }
 0x5ef   : > { %12599 = vst [vmem:[#allocation21_spill] sm:$0xff] %v11546_v44  ;;  %3169 = vst [vmem:[#allocation3 + $0x18] sm:$0xff] %v11543_v42  ;;  %v11551_v51 = vmul.f32 %v11546_v44, %v12593_v48 }
 0x5f0   : > { %v3141_v11 = vpop.f32.mrb[20].mxu1  ;;  %v3198_v7 = vld [vmem:[#allocation3 + $0xf] sm:$0xff] }
 0x5f1   : > { %3170 = vst [vmem:[#allocation3 + $0x20] sm:$0xff] %v11551_v51  ;;  %v3156_v47 = vmul.f32 0.1, %v3141_v11  ;;  %v8184_v17 = vpop.f32.mrb[21].mxu1  ;;  %v3202_v21 = vpack.c.bf16 %v3198_v7, %v3197_v1  ;;  %v3436_v50 = vpack.c.bf16 %v11551_v51, %v11543_v42  ;;  %v10065_v1 = vld [vmem:[#allocation8 + $0x158] sm:$0xff]   ;;  %v10084_v42 = vld [vmem:[#allocation8 + $0x230] sm:$0xff]  }
 0x5f2   : > { %v3144_v35 = vpop.f32.mrb[22].mxu1  ;;  %v10067_v17 = vld [vmem:[#allocation8 + $0x168] sm:$0xff]   ;;  %v10085_v51 = vld [vmem:[#allocation8 + $0x238] sm:$0xff]  }
 0x5f3   : > { %v11557_v28 = vadd.f32 %v3156_v47, %v12600_v19  ;;  %v8185_v31 = vpop.f32.mrb[23].mxu1  ;;  %8203 = vmatmul.mubr.bf16.vlgmr.msra.gmra.mrb[36].mxu0 %v3202_v21  ;;  %v10068_v21 = vld [vmem:[#allocation8 + $0x170] sm:$0xff]   ;;  %v10069_v35 = vld [vmem:[#allocation8 + $0x178] sm:$0xff]  }
 0x5f4   : > { %8215 = vmatpush3.bf16.msra.mxu0 %v10062_v12  ;;  %8206 = vmatprep.mubr.msk.bf16.mxu0 %vm10357_vm2, %v11320_v18  ;;  %v10066_v12 = vld [vmem:[#allocation8 + $0x160] sm:$0xff]   ;;  %v3172_v31 = vld [vmem:[#allocation3 + $0x6] sm:$0xff] }
 0x5f5   : > { %12601 = vst [vmem:[#allocation30_spill] sm:$0xff] %v11557_v28  ;;  %v11563_v58 = vmul.f32 %v11557_v28, %v12594_v61  ;;  %8216 = vmatprep.subr.bf16.mxu0 %v11320_v18  ;;  %v3173_v19 = vld [vmem:[#allocation3 + $0xe] sm:$0xff] }
 0x5f6   : > { %v3199_v16 = vld [vmem:[#allocation3 + $0x17] sm:$0xff] }
 0x5f7   : > { %3171 = vst [vmem:[#allocation3 + $0x28] sm:$0xff] %v11563_v58  ;;  %v3437_v25 = vpack.c.bf16 %v11563_v58, %v11563_v58  ;;  %v3564_v58 = vld [vmem:[#allocation3 + $0x9] sm:$0xff] }
 0x5f8   : > { %8217 = vmatpush3.bf16.msra.mxu0 %v10063_v55  ;;  %v3200_v46 = vld [vmem:[#allocation3 + $0x1f] sm:$0xff]  ;;  %v10070_v55 = vld [vmem:[#allocation8 + $0x1c0] sm:$0xff]  }
 0x5f9   : > { %8218 = vmatprep.subr.bf16.mxu0 %v11320_v18  ;;  %v3203_v11 = vpack.c.bf16 %v3200_v46, %v3199_v16  ;;  %v3177_v16 = vpack.c.bf16 %v3173_v19, %v3172_v31  ;;  %v10071_v46 = vld [vmem:[#allocation8 + $0x1c8] sm:$0xff]   ;;  %v10076_v19 = vld [vmem:[#allocation8 + $0x1f0] sm:$0xff]   ;;  %v10077_v31 = vld [vmem:[#allocation8 + $0x1f8] sm:$0xff]  }
 0x5fb   : > { %8207 = vmatmul.mubr.bf16.gmra.mrb[40].mxu0 %v3203_v11  ;;  %v3174_v11 = vld [vmem:[#allocation3 + $0x16] sm:$0xff] }
 0x5fc   : > { %8219 = vmatpush3.bf16.msra.mxu0 %v10064_v60  ;;  %8210 = vmatprep.mubr.msk.bf16.mxu0 %vm10357_vm2, %v11320_v18  ;;  %v3175_v60 = vld [vmem:[#allocation3 + $0x1e] sm:$0xff] }
 0x5fd   : > { %8220 = vmatprep.subr.bf16.mxu0 %v11320_v18 }
 0x5fe   : > { %v3201_v7 = vld [vmem:[#allocation3 + $0x27] sm:$0xff] }
 0x5ff   : > { %v3204_v47 = vpack.c.bf16 %v3201_v7, %v3201_v7  ;;  %v3178_v7 = vpack.c.bf16 %v3175_v60, %v3174_v11  ;;  %v10081_v60 = vld [vmem:[#allocation8 + $0x218] sm:$0xff]   ;;  %v10086_v11 = vld [vmem:[#allocation8 + $0x240] sm:$0xff]  }
 0x600   : > { %8221 = vmatpush3.bf16.msra.mxu0 %v10065_v1  ;;  %v10072_v1 = vld [vmem:[#allocation8 + $0x1d0] sm:$0xff]  }
 0x601   : > { %8222 = vmatprep.subr.bf16.mxu0 %v11320_v18 }
 0x603   : > { %8211 = vmatmul.mubr.bf16.gmra.mrb[44].mxu0 %v3204_v47  ;;  %v3176_v47 = vld [vmem:[#allocation3 + $0x26] sm:$0xff] }
 0x604   : > { %8223 = vmatpush3.bf16.msra.mxu0 %v10066_v12  ;;  %8230 = vmatprep.mubr.msk.bf16.mxu0 %vm10357_vm2, %v11320_v18  ;;  %v10073_v12 = vld [vmem:[#allocation8 + $0x1d8] sm:$0xff]  }
 0x605   : > { %8224 = vmatprep.subr.bf16.mxu0 %v11320_v18 }
 0x608   : > { %8225 = vmatpush3.bf16.msra.mxu0 %v10067_v17  ;;  %v10074_v17 = vld [vmem:[#allocation8 + $0x1e0] sm:$0xff]  }
 0x609   : > { %8226 = vmatprep.subr.bf16.mxu0 %v11320_v18 }
 0x60c   : > { %8227 = vmatpush3.bf16.msra.mxu0 %v10068_v21  ;;  %v3179_v21 = vpack.c.bf16 %v3176_v47, %v3176_v47  ;;  %v3566_v47 = vld [vmem:[#allocation3 + $0x19] sm:$0xff] }
 0x60d   : > { %8228 = vmatprep.subr.bf16.mxu0 %v11320_v18 }
 0x610   : > { %8229 = vmatpush3.bf16.msra.mxu0 %v10069_v35  ;;  %v10075_v35 = vld [vmem:[#allocation8 + $0x1e8] sm:$0xff]  }
 0x611   : > { %8242 = vmatprep.subr.bf16.mxu0 %v11320_v18 }
 0x613   : > { %8231 = vmatmul.mubr.bf16.vlgmr.msra.gmra.mrb[36].mxu0 %v3177_v16  ;;  %v10079_v16 = vld [vmem:[#allocation8 + $0x208] sm:$0xff]  }
 0x614   : > { %8243 = vmatpush3.bf16.msra.mxu0 %v10070_v55  ;;  %8234 = vmatprep.mubr.msk.bf16.mxu0 %vm10357_vm2, %v11320_v18  ;;  %v10078_v55 = vld [vmem:[#allocation8 + $0x200] sm:$0xff]  }
 0x615   : > { %8244 = vmatprep.subr.bf16.mxu0 %v11320_v18 }
 0x618   : > { %8245 = vmatpush3.bf16.msra.mxu0 %v10071_v46  ;;  %v10080_v46 = vld [vmem:[#allocation8 + $0x210] sm:$0xff]  }
 0x619   : > { %8246 = vmatprep.subr.bf16.mxu0 %v11320_v18 }
 0x61b   : > { %8235 = vmatmul.mubr.bf16.gmra.mrb[40].mxu0 %v3178_v7  ;;  %v10087_v7 = vld [vmem:[#allocation8 + $0x248] sm:$0xff]  }
 0x61c   : > { %8247 = vmatpush3.bf16.msra.mxu0 %v10072_v1  ;;  %8238 = vmatprep.mubr.msk.bf16.mxu0 %vm10357_vm2, %v11320_v18 }
 0x61d   : > { %8248 = vmatprep.subr.bf16.mxu0 %v11320_v18 }
 0x620   : > { %8249 = vmatpush3.bf16.msra.mxu0 %v10073_v12  ;;  %v3567_v12 = vld [vmem:[#allocation3 + $0x21] sm:$0xff] }
 0x621   : > { %8250 = vmatprep.subr.bf16.mxu0 %v11320_v18 }
 0x623   : > { %8239 = vmatmul.mubr.bf16.gmra.mrb[44].mxu0 %v3179_v21  ;;  %v3570_v21 = vpack.c.bf16 %v3567_v12, %v3566_v47 }
 0x624   : > { %8251 = vmatpush3.bf16.msra.mxu0 %v10074_v17  ;;  %8258 = vmatprep.mubr.msk.bf16.mxu0 %vm10357_vm2, %v11320_v18  ;;  %v10088_v17 = vld [vmem:[#allocation8 + $0x250] sm:$0xff]  }
 0x625   : > { %8252 = vmatprep.subr.bf16.mxu0 %v11320_v18 }
 0x628   : > { %8253 = vmatpush3.bf16.msra.mxu0 %v10075_v35  ;;  %v10089_v35 = vld [vmem:[#allocation8 + $0x258] sm:$0xff]  }
 0x629   : > { %8254 = vmatprep.subr.bf16.mxu0 %v11320_v18 }
 0x62c   : > { %8255 = vmatpush3.bf16.msra.mxu0 %v10076_v19  ;;  %v3568_v19 = vld [vmem:[#allocation3 + $0x29] sm:$0xff] }
 0x62d   : > { %8256 = vmatprep.subr.bf16.mxu0 %v11320_v18 }
 0x630   : > { %8257 = vmatpush3.bf16.msra.mxu0 %v10077_v31  ;;  %v10090_v31 = vld [vmem:[#allocation8 + $0x260] sm:$0xff]  }
 0x631   : > { %8270 = vmatprep.subr.bf16.mxu0 %v11320_v18 }
 0x633   : > { %8259 = vmatmul.mubr.bf16.vlgmr.msra.gmra.mrb[36].mxu0 %v3435_v45  ;;  %v10083_v45 = vld [vmem:[#allocation8 + $0x228] sm:$0xff]  }
 0x634   : > { %8271 = vmatpush3.bf16.msra.mxu0 %v10078_v55  ;;  %8262 = vmatprep.mubr.msk.bf16.mxu0 %vm10357_vm2, %v11320_v18  ;;  %v3571_v55 = vpack.c.bf16 %v3568_v19, %v3568_v19 }
 0x635   : > { %8272 = vmatprep.subr.bf16.mxu0 %v11320_v18 }
 0x638   : > { %8273 = vmatpush3.bf16.msra.mxu0 %v10079_v16  ;;  %v10091_v16 = vld [vmem:[#allocation8 + $0x268] sm:$0xff]  }
 0x639   : > { %8274 = vmatprep.subr.bf16.mxu0 %v11320_v18 }
 0x63b   : > { %8263 = vmatmul.mubr.bf16.gmra.mrb[40].mxu0 %v3436_v50  ;;  %v3565_v50 = vld [vmem:[#allocation3 + $0x11] sm:$0xff] }
 0x63c   : > { %8275 = vmatpush3.bf16.msra.mxu0 %v10080_v46  ;;  %8266 = vmatprep.mubr.msk.bf16.mxu0 %vm10357_vm2, %v11320_v18  ;;  %v3569_v1 = vpack.c.bf16 %v3565_v50, %v3564_v58  ;;  %v10092_v46 = vld [vmem:[#allocation8 + $0x270] sm:$0xff]   ;;  %v3702_v58 = vld [vmem:[#allocation3 + $0x2a] sm:$0xff] }
 0x63d   : > { %8276 = vmatprep.subr.bf16.mxu0 %v11320_v18 }
 0x640   : > { %8277 = vmatpush3.bf16.msra.mxu0 %v10081_v60  ;;  %v10093_v60 = vld [vmem:[#allocation8 + $0x278] sm:$0xff]  }
 0x641   : > { %8278 = vmatprep.subr.bf16.mxu0 %v11320_v18 }
 0x643   : > { %8267 = vmatmul.mubr.bf16.gmra.mrb[44].mxu0 %v3437_v25  ;;  %v3698_v25 = vld [vmem:[#allocation3 + $0xa] sm:$0xff] }
 0x644   : > { %8279 = vmatpush3.bf16.msra.mxu0 %v10082_v38  ;;  %8286 = vmatprep.mubr.msk.bf16.mxu0 %vm10357_vm2, %v11320_v18  ;;  %v3699_v38 = vld [vmem:[#allocation3 + $0x12] sm:$0xff] }
 0x645   : > { %8280 = vmatprep.subr.bf16.mxu0 %v11320_v18 }
 0x648   : > { %8281 = vmatpush3.bf16.msra.mxu0 %v10083_v45  ;;  %v3703_v45 = vpack.c.bf16 %v3699_v38, %v3698_v25 }
 0x649   : > { %8282 = vmatprep.subr.bf16.mxu0 %v11320_v18 }
 0x64c   : > { %8283 = vmatpush3.bf16.msra.mxu0 %v10084_v42  ;;  %v3701_v42 = vld [vmem:[#allocation3 + $0x22] sm:$0xff] }
 0x64d   : > { %8284 = vmatprep.subr.bf16.mxu0 %v11320_v18 }
 0x650   : > { %8285 = vmatpush3.bf16.msra.mxu0 %v10085_v51  ;;  %v3700_v51 = vld [vmem:[#allocation3 + $0x1a] sm:$0xff] }
 0x651   : > { %8298 = vmatprep.subr.bf16.mxu0 %v11320_v18  ;;  %v3704_v50 = vpack.c.bf16 %v3701_v42, %v3700_v51 }
 0x653   : > { %8287 = vmatmul.mubr.bf16.vlgmr.msra.gmra.mrb[36].mxu0 %v3569_v1 }
 0x654   : > { %8299 = vmatpush3.bf16.msra.mxu0 %v10086_v11  ;;  %8290 = vmatprep.mubr.msk.bf16.mxu0 %vm10357_vm2, %v11320_v18  ;;  %v3705_v11 = vpack.c.bf16 %v3702_v58, %v3702_v58 }
 0x655   : > { %8300 = vmatprep.subr.bf16.mxu0 %v11320_v18 }
 0x658   : > { %8301 = vmatpush3.bf16.msra.mxu0 %v10087_v7 }
 0x659   : > { %8302 = vmatprep.subr.bf16.mxu0 %v11320_v18 }
 0x65b   : > { %8291 = vmatmul.mubr.bf16.gmra.mrb[40].mxu0 %v3570_v21 }
 0x65c   : > { %8303 = vmatpush3.bf16.msra.mxu0 %v10088_v17  ;;  %8294 = vmatprep.mubr.msk.bf16.mxu0 %vm10357_vm2, %v11320_v18 }
 0x65d   : > { %8304 = vmatprep.subr.bf16.mxu0 %v11320_v18 }
 0x660   : > { %8305 = vmatpush3.bf16.msra.mxu0 %v10089_v35 }
 0x661   : > { %8306 = vmatprep.subr.bf16.mxu0 %v11320_v18 }
 0x663   : > { %8295 = vmatmul.mubr.bf16.gmra.mrb[44].mxu0 %v3571_v55 }
 0x664   : > { %8307 = vmatpush3.bf16.msra.mxu0 %v10090_v31  ;;  %8314 = vmatprep.mubr.msk.bf16.mxu0 %vm10357_vm2, %v11320_v18 }
 0x665   : > { %8308 = vmatprep.subr.bf16.mxu0 %v11320_v18 }
 0x668   : > { %8309 = vmatpush3.bf16.msra.mxu0 %v10091_v16 }
 0x669   : > { %8310 = vmatprep.subr.bf16.mxu0 %v11320_v18 }
 0x66c   : > { %8311 = vmatpush3.bf16.msra.mxu0 %v10092_v46 }
 0x66d   : > { %8312 = vmatprep.subr.bf16.mxu0 %v11320_v18 }
 0x670   : > { %8313 = vmatpush3.bf16.msra.mxu0 %v10093_v60 }
 0x671   : > { %8608 = vmatprep.subr.bf16.mxu0 %v11320_v18 }
 0x673   : > { %8315 = vmatmul.mubr.bf16.vlgmr.msra.gmra.mrb[36].mxu0 %v3703_v45 }
 0x674   : > { %8318 = vmatprep.mubr.msk.bf16.mxu0 %vm10357_vm2, %v11320_v18 }
 0x67b   : > { %8319 = vmatmul.mubr.bf16.gmra.mrb[40].mxu0 %v3704_v50 }
 0x67c   : > { %8322 = vmatprep.mubr.msk.bf16.mxu0 %vm10357_vm2, %v11320_v18 }
 0x683   : > { %8323 = vmatmul.mubr.bf16.gmra.mrb[44].mxu0 %v3705_v11 }
 0x684   : > { %8624 = vmatprep.mubr.msk.bf16.mxu0 %vm10357_vm2, %v11320_v18 }
 0x746   : > { %v11634_v1 = vpop.f32.mrb[36].mxu0 }
 0x747   : > { %v3832_v7 = vmul.f32 %v11634_v1, %v11634_v1  ;;  %v8316_v12 = vpop.f32.mrb[37].mxu0 }
 0x748   : > { %v11638_v47 = vpop.f32.mrb[38].mxu0 }
 0x749   : > { %v11640_v17 = vand.u32 4294901760, %v3832_v7  ;;  %v3833_v21 = vmul.f32 %v11638_v47, %v11638_v47  ;;  %v8317_v35 = vpop.f32.mrb[39].mxu0 }
 0x74a   : > { %v11676_v35 = vld [vmem:[#allocation3] sm:$0xff] }
 0x74b   : > { %v11645_v19 = vsub.f32 %v3832_v7, %v11640_v17  ;;  %v11647_v31 = vand.u32 4294901760, %v3833_v21 }
 0x74d   : > { %v12531_v18 = vand.u32 4294901760, %v11645_v19  ;;  %v11651_v55 = vsub.f32 %v3833_v21, %v11647_v31  ;;  %v12602_v21 = vld [vmem:[#allocation29_spill] sm:$0xff] }
 0x74e   : > { %v11653_v16 = vpop.f32.mrb[40].mxu0 }
 0x74f   : > { %v3921_v46 = vsub.f32 %v11645_v19, %v12531_v18  ;;  %v3834_v60 = vmul.f32 %v11653_v16, %v11653_v16  ;;  %v8320_v38 = vpop.f32.mrb[41].mxu0  ;;  %v12530_v25 = vand.u32 4294901760, %v11651_v55 }
 0x750   : > { %v11661_v45 = vpop.f32.mrb[42].mxu0 }
 0x751   : > { %v3922_v42 = vand.u32 4294901760, %v3921_v46  ;;  %v11663_v51 = vand.u32 4294901760, %v3834_v60  ;;  %v3835_v50 = vmul.f32 %v11661_v45, %v11661_v45  ;;  %v8321_v58 = vpop.f32.mrb[43].mxu0  ;;  %v3931_v11 = vsub.f32 %v11651_v55, %v12530_v25 }
 0x753   : > { %v11671_v7 = vsub.f32 %v3834_v60, %v11663_v51  ;;  %v11673_v12 = vand.u32 4294901760, %v3835_v50  ;;  %8359 = vmatmul.mubr.f32.vlgmr.msra.gmra.mrb[24].mxu1 %v3922_v42  ;;  %v3932_v38 = vand.u32 4294901760, %v3931_v11 }
 0x754   : > { %9206 = vmatpush3.bf16.msra.mxu1 %v12602_v21  ;;  %8361 = vmatprep.mubr.msk.f32.mxu1 %vm10357_vm2, %v11676_v35 }
 0x755   : > { %v11681_v46 = vsub.f32 %v3835_v50, %v11673_v12  ;;  %9207 = vmatprep.subr.bf16.mxu1 %v12569_v40  ;;  %v3940_v58 = vand.u32 4294901760, %v11671_v7 }
 0x756   : > { %v11685_v60 = vpop.f32.mrb[44].mxu0 }
 0x757   : > { %v3836_v42 = vmul.f32 %v11685_v60, %v11685_v60  ;;  %v8324_v25 = vpop.f32.mrb[45].mxu0  ;;  %8362 = vmatmul.mubr.f32.gmra.mrb[26].mxu1 %v3932_v38  ;;  %v3941_v21 = vsub.f32 %v11671_v7, %v3940_v58  ;;  %v3950_v18 = vand.u32 4294901760, %v11681_v46 }
 0x758   : > { %9209 = vmatpush3.bf16.msra.mxu1 %v10978_v43  ;;  %v3824_v50 = vpop.f32.mrb[46].mxu0  ;;  %8364 = vmatprep.mubr.msk.f32.mxu1 %vm10357_vm2, %v11676_v35 }
 0x759   : > { %v11696_v11 = vand.u32 4294901760, %v3836_v42  ;;  %v8325_v28 = vpop.f32.mrb[47].mxu0  ;;  %9210 = vmatprep.subr.bf16.mxu1 %v12569_v40  ;;  %v3942_v44 = vand.u32 4294901760, %v3941_v21  ;;  %v3951_v25 = vsub.f32 %v11681_v46, %v3950_v18  ;;  %v10102_v50 = vld [vmem:[#allocation10 + $0x140] sm:$0xff]  }
 0x75b   : > { %v11703_v38 = vsub.f32 %v3836_v42, %v11696_v11  ;;  %8365 = vmatmul.mubr.f32.gmra.mrb[28].mxu1 %v3942_v44  ;;  %v3952_v43 = vand.u32 4294901760, %v3951_v25 }
 0x75c   : > { %9212 = vmatpush3.bf16.msra.mxu1 %v10992_v59  ;;  %8367 = vmatprep.mubr.msk.f32.mxu1 %vm10357_vm2, %v11676_v35 }
 0x75d   : > { %9213 = vmatprep.subr.bf16.mxu1 %v12569_v40  ;;  %v3960_v28 = vand.u32 4294901760, %v11703_v38 }
 0x75f   : > { %8368 = vmatmul.mubr.f32.gmra.mrb[30].mxu1 %v3952_v43  ;;  %v3961_v21 = vsub.f32 %v11703_v38, %v3960_v28  ;;  %v10104_v43 = vld [vmem:[#allocation10 + $0x150] sm:$0xff]  }
 0x760   : > { %9215 = vmatpush3.bf16.msra.mxu1 %v11018_v13  ;;  %8370 = vmatprep.mubr.msk.f32.mxu1 %vm10357_vm2, %v11676_v35  ;;  %v12604_v13 = vand.u32 4294901760, %v11651_v55 }
 0x761   : > { %9216 = vmatprep.subr.bf16.mxu1 %v12569_v40  ;;  %v3962_v59 = vand.u32 4294901760, %v3961_v21 }
 0x763   : > { %8371 = vmatmul.mubr.f32.gmra.mrb[32].mxu1 %v3962_v59  ;;  %v10106_v59 = vld [vmem:[#allocation10 + $0x160] sm:$0xff]  }
 0x764   : > { %9218 = vmatpush3.bf16.msra.mxu1 %v11022_v54  ;;  %8405 = vmatprep.mubr.msk.f32.mxu1 %vm10357_vm2, %v11676_v35  ;;  %v12603_v54 = vand.u32 4294901760, %v11645_v19 }
 0x765   : > { %9219 = vmatprep.subr.bf16.mxu1 %v12569_v40 }
 0x768   : > { %9221 = vmatpush3.bf16.msra.mxu1 %v11042_v10 }
 0x769   : > { %9222 = vmatprep.subr.bf16.mxu1 %v12569_v40 }
 0x76c   : > { %9224 = vmatpush3.bf16.msra.mxu1 %v11068_v33 }
 0x76d   : > { %9225 = vmatprep.subr.bf16.mxu1 %v12569_v40 }
 0x770   : > { %9227 = vmatpush3.bf16.msra.mxu1 %v11070_v6 }
 0x771   : > { %9228 = vmatprep.subr.bf16.mxu1 %v12569_v40 }
 0x773   : > { %8406 = vmatmul.mubr.f32.vlgmr.msra.gmra.mrb[24].mxu1 %v11640_v17 }
 0x774   : > { %9230 = vmatpush3.bf16.msra.mxu1 %v11074_v2  ;;  %8408 = vmatprep.mubr.msk.f32.mxu1 %vm10357_vm2, %v11676_v35 }
 0x775   : > { %9231 = vmatprep.subr.bf16.mxu1 %v12569_v40 }
 0x777   : > { %8409 = vmatmul.mubr.f32.gmra.mrb[26].mxu1 %v11647_v31 }
 0x778   : > { %9233 = vmatpush3.bf16.msra.mxu1 %v11078_v22  ;;  %8411 = vmatprep.mubr.msk.f32.mxu1 %vm10357_vm2, %v11676_v35 }
 0x779   : > { %9234 = vmatprep.subr.bf16.mxu1 %v12569_v40 }
 0x77b   : > { %8412 = vmatmul.mubr.f32.gmra.mrb[28].mxu1 %v11663_v51 }
 0x77c   : > { %9236 = vmatpush3.bf16.msra.mxu1 %v11082_v8  ;;  %8414 = vmatprep.mubr.msk.f32.mxu1 %vm10357_vm2, %v11676_v35 }
 0x77d   : > { %9237 = vmatprep.subr.bf16.mxu1 %v12569_v40 }
 0x77f   : > { %8415 = vmatmul.mubr.f32.gmra.mrb[30].mxu1 %v11673_v12 }
 0x780   : > { %9239 = vmatpush3.bf16.msra.mxu1 %v11086_v23  ;;  %8417 = vmatprep.mubr.msk.f32.mxu1 %vm10357_vm2, %v11676_v35 }
 0x781   : > { %9240 = vmatprep.subr.bf16.mxu1 %v12569_v40 }
 0x783   : > { %8418 = vmatmul.mubr.f32.gmra.mrb[32].mxu1 %v11696_v11 }
 0x784   : > { %9242 = vmatpush3.bf16.msra.mxu1 %v11090_v15  ;;  %8452 = vmatprep.mubr.msk.f32.mxu1 %vm10357_vm2, %v11676_v35 }
 0x785   : > { %9243 = vmatprep.subr.bf16.mxu1 %v12569_v40 }
 0x788   : > { %9245 = vmatpush3.bf16.msra.mxu1 %v11094_v32 }
 0x789   : > { %9246 = vmatprep.subr.bf16.mxu1 %v12569_v40 }
 0x78c   : > { %9248 = vmatpush3.bf16.msra.mxu1 %v11098_v34 }
 0x78d   : > { %9249 = vmatprep.subr.bf16.mxu1 %v12569_v40 }
 0x790   : > { %9251 = vmatpush3.bf16.msra.mxu1 %v11102_v37 }
 0x791   : > { %9252 = vmatprep.subr.bf16.mxu1 %v12569_v40 }
 0x793   : > { %8453 = vmatmul.mubr.f32.vlgmr.msra.gmra.mrb[24].mxu1 %v11645_v19 }
 0x794   : > { %9254 = vmatpush3.bf16.msra.mxu1 %v10887_v56  ;;  %8455 = vmatprep.mubr.msk.f32.mxu1 %vm10357_vm2, %v11676_v35 }
 0x795   : > { %9255 = vmatprep.subr.bf16.mxu1 %v12569_v40 }
 0x797   : > { %8456 = vmatmul.mubr.f32.gmra.mrb[26].mxu1 %v11651_v55 }
 0x798   : > { %9257 = vmatpush3.bf16.msra.mxu1 %v10892_v62  ;;  %8458 = vmatprep.mubr.msk.f32.mxu1 %vm10357_vm2, %v11676_v35 }
 0x799   : > { %9258 = vmatprep.subr.bf16.mxu1 %v12569_v40 }
 0x79b   : > { %8459 = vmatmul.mubr.f32.gmra.mrb[28].mxu1 %v11671_v7 }
 0x79c   : > { %9260 = vmatpush3.bf16.msra.mxu1 %v10896_v4  ;;  %8461 = vmatprep.mubr.msk.f32.mxu1 %vm10357_vm2, %v11676_v35 }
 0x79d   : > { %9261 = vmatprep.subr.bf16.mxu1 %v12569_v40 }
 0x79f   : > { %8462 = vmatmul.mubr.f32.gmra.mrb[30].mxu1 %v11681_v46 }
 0x7a0   : > { %9263 = vmatpush3.bf16.msra.mxu1 %v10900_v9  ;;  %8464 = vmatprep.mubr.msk.f32.mxu1 %vm10357_vm2, %v11676_v35 }
 0x7a1   : > { %9264 = vmatprep.subr.bf16.mxu1 %v12569_v40 }
 0x7a3   : > { %8465 = vmatmul.mubr.f32.gmra.mrb[32].mxu1 %v11703_v38  ;;  %v10103_v38 = vld [vmem:[#allocation10 + $0x148] sm:$0xff]  }
 0x7a4   : > { %9266 = vmatpush3.bf16.msra.mxu1 %v10904_v14  ;;  %8499 = vmatprep.mubr.msk.f32.mxu1 %vm10357_vm2, %v11676_v35 }
 0x7a5   : > { %9267 = vmatprep.subr.bf16.mxu1 %v12569_v40 }
 0x7a8   : > { %9269 = vmatpush3.bf16.msra.mxu1 %v10914_v20 }
 0x7a9   : > { %9270 = vmatprep.subr.bf16.mxu1 %v12569_v40 }
 0x7ac   : > { %9272 = vmatpush3.bf16.msra.mxu1 %v10928_v27 }
 0x7ad   : > { %9273 = vmatprep.subr.bf16.mxu1 %v12569_v40 }
 0x7b0   : > { %9275 = vmatpush3.bf16.msra.mxu1 %v10948_v41 }
 0x7b1   : > { %9276 = vmatprep.subr.bf16.mxu1 %v12569_v40 }
 0x7b3   : > { %8500 = vmatmul.mubr.f32.vlgmr.msra.gmra.mrb[24].mxu1 %v12603_v54 }
 0x7b4   : > { %9278 = vmatpush3.bf16.msra.mxu1 %v11260_v36  ;;  %8502 = vmatprep.mubr.msk.f32.mxu1 %vm10357_vm2, %v11676_v35 }
 0x7b5   : > { %9279 = vmatprep.subr.bf16.mxu1 %v12569_v40 }
 0x7b7   : > { %8503 = vmatmul.mubr.f32.gmra.mrb[26].mxu1 %v12604_v13  ;;  %v10107_v13 = vld [vmem:[#allocation10 + $0x168] sm:$0xff]  }
 0x7b8   : > { %9281 = vmatpush3.bf16.msra.mxu1 %v11272_v49  ;;  %8505 = vmatprep.mubr.msk.f32.mxu1 %vm10357_vm2, %v11676_v35 }
 0x7b9   : > { %9282 = vmatprep.subr.bf16.mxu1 %v12569_v40 }
 0x7bb   : > { %8506 = vmatmul.mubr.f32.gmra.mrb[28].mxu1 %v3940_v58 }
 0x7bc   : > { %9284 = vmatpush3.bf16.msra.mxu1 %v11284_v30  ;;  %8508 = vmatprep.mubr.msk.f32.mxu1 %vm10357_vm2, %v11676_v35 }
 0x7bd   : > { %9285 = vmatprep.subr.bf16.mxu1 %v12569_v40 }
 0x7bf   : > { %8509 = vmatmul.mubr.f32.gmra.mrb[30].mxu1 %v3950_v18 }
 0x7c0   : > { %9287 = vmatpush3.bf16.msra.mxu1 %v11296_v39  ;;  %8511 = vmatprep.mubr.msk.f32.mxu1 %vm10357_vm2, %v11676_v35 }
 0x7c1   : > { %9288 = vmatprep.subr.bf16.mxu1 %v12569_v40 }
 0x7c3   : > { %8512 = vmatmul.mubr.f32.gmra.mrb[32].mxu1 %v3960_v28 }
 0x7c4   : > { %9290 = vmatpush3.bf16.msra.mxu1 %v11308_v57  ;;  %8546 = vmatprep.mubr.msk.f32.mxu1 %vm10357_vm2, %v11676_v35 }
 0x7c5   : > { %9291 = vmatprep.subr.bf16.mxu1 %v12569_v40 }
 0x7c8   : > { %9293 = vmatpush3.bf16.msra.mxu1 %v11318_v29 }
 0x7c9   : > { %9294 = vmatprep.subr.bf16.mxu1 %v12569_v40 }
 0x7cc   : > { %9296 = vmatpush3.bf16.msra.mxu1 %v11330_v5 }
 0x7cd   : > { %9297 = vmatprep.subr.bf16.mxu1 %v12569_v40 }
 0x7d0   : > { %9299 = vmatpush3.bf16.msra.mxu1 %v11338_v52 }
 0x7d1   : > { %9300 = vmatprep.subr.bf16.mxu1 %v12569_v40 }
 0x7d3   : > { %8547 = vmatmul.mubr.f32.vlgmr.msra.gmra.mrb[24].mxu1 %v11640_v17 }
 0x7d4   : > { %9302 = vmatpush3.bf16.msra.mxu1 %v10887_v56  ;;  %8549 = vmatprep.mubr.msk.f32.mxu1 %vm10357_vm2, %v11676_v35  ;;  %v10094_v56 = vld [vmem:[#allocation10 + $0x180] sm:$0xff]  }
 0x7d5   : > { %9303 = vmatprep.subr.bf16.mxu1 %v12569_v40  ;;  %8609 = vmatpush3.bf16.msra.mxu0 %v10094_v56  ;;  %v10108_v56 = vld [vmem:[#allocation10 + $0x170] sm:$0xff]  }
 0x7d6   : > { %8610 = vmatprep.subr.bf16.mxu0 %v11676_v35 }
 0x7d7   : > { %8550 = vmatmul.mubr.f32.gmra.mrb[26].mxu1 %v11647_v31 }
 0x7d8   : > { %9305 = vmatpush3.bf16.msra.mxu1 %v10892_v62  ;;  %8552 = vmatprep.mubr.msk.f32.mxu1 %vm10357_vm2, %v11676_v35  ;;  %v10095_v62 = vld [vmem:[#allocation10 + $0x188] sm:$0xff]  }
 0x7d9   : > { %9306 = vmatprep.subr.bf16.mxu1 %v12569_v40  ;;  %8611 = vmatpush3.bf16.msra.mxu0 %v10095_v62  ;;  %v10109_v62 = vld [vmem:[#allocation10 + $0x178] sm:$0xff]  }
 0x7da   : > { %8612 = vmatprep.subr.bf16.mxu0 %v11676_v35 }
 0x7db   : > { %8553 = vmatmul.mubr.f32.gmra.mrb[28].mxu1 %v11663_v51 }
 0x7dc   : > { %9308 = vmatpush3.bf16.msra.mxu1 %v10896_v4  ;;  %8555 = vmatprep.mubr.msk.f32.mxu1 %vm10357_vm2, %v11676_v35  ;;  %v10096_v4 = vld [vmem:[#allocation10 + $0x190] sm:$0xff]  }
 0x7dd   : > { %9309 = vmatprep.subr.bf16.mxu1 %v12569_v40  ;;  %8613 = vmatpush3.bf16.msra.mxu0 %v10096_v4 }
 0x7de   : > { %8614 = vmatprep.subr.bf16.mxu0 %v11676_v35 }
 0x7df   : > { %8556 = vmatmul.mubr.f32.gmra.mrb[30].mxu1 %v11673_v12 }
 0x7e0   : > { %9311 = vmatpush3.bf16.msra.mxu1 %v10900_v9  ;;  %8558 = vmatprep.mubr.msk.f32.mxu1 %vm10357_vm2, %v11676_v35  ;;  %v10097_v9 = vld [vmem:[#allocation10 + $0x198] sm:$0xff]  }
 0x7e1   : > { %9312 = vmatprep.subr.bf16.mxu1 %v12569_v40  ;;  %8615 = vmatpush3.bf16.msra.mxu0 %v10097_v9 }
 0x7e2   : > { %8616 = vmatprep.subr.bf16.mxu0 %v11676_v35 }
 0x7e3   : > { %8559 = vmatmul.mubr.f32.gmra.mrb[32].mxu1 %v11696_v11 }
 0x7e4   : > { %9314 = vmatpush3.bf16.msra.mxu1 %v10904_v14  ;;  %8593 = vmatprep.mubr.msk.f32.mxu1 %vm10357_vm2, %v11676_v35  ;;  %v10098_v14 = vld [vmem:[#allocation10 + $0x1a0] sm:$0xff]  }
 0x7e5   : > { %9315 = vmatprep.subr.bf16.mxu1 %v12569_v40  ;;  %8617 = vmatpush3.bf16.msra.mxu0 %v10098_v14  ;;  %v10110_v14 = vld [vmem:[#allocation10 + $0x1c0] sm:$0xff]  }
 0x7e6   : > { %8618 = vmatprep.subr.bf16.mxu0 %v11676_v35 }
 0x7e8   : > { %9317 = vmatpush3.bf16.msra.mxu1 %v10914_v20  ;;  %v10099_v20 = vld [vmem:[#allocation10 + $0x1a8] sm:$0xff]  }
 0x7e9   : > { %9318 = vmatprep.subr.bf16.mxu1 %v12569_v40  ;;  %8619 = vmatpush3.bf16.msra.mxu0 %v10099_v20 }
 0x7ea   : > { %8620 = vmatprep.subr.bf16.mxu0 %v11676_v35 }
 0x7ec   : > { %9320 = vmatpush3.bf16.msra.mxu1 %v10928_v27  ;;  %v10100_v27 = vld [vmem:[#allocation10 + $0x1b0] sm:$0xff]  }
 0x7ed   : > { %9321 = vmatprep.subr.bf16.mxu1 %v12569_v40  ;;  %8621 = vmatpush3.bf16.msra.mxu0 %v10100_v27  ;;  %v10111_v27 = vld [vmem:[#allocation10 + $0x1c8] sm:$0xff]  }
 0x7ee   : > { %8622 = vmatprep.subr.bf16.mxu0 %v11676_v35 }
 0x7f0   : > { %9323 = vmatpush3.bf16.msra.mxu1 %v10948_v41  ;;  %v10101_v41 = vld [vmem:[#allocation10 + $0x1b8] sm:$0xff]  }
 0x7f1   : > { %9324 = vmatprep.subr.bf16.mxu1 %v12569_v40  ;;  %8623 = vmatpush3.bf16.msra.mxu0 %v10101_v41 }
 0x7f2   : > { %8636 = vmatprep.subr.bf16.mxu0 %v11676_v35 }
 0x7f3   : > { %8594 = vmatmul.mubr.f32.vlgmr.msra.gmra.mrb[24].mxu1 %v11640_v17 }
 0x7f4   : > { %8596 = vmatprep.mubr.msk.f32.mxu1 %vm10357_vm2, %v11676_v35 }
 0x7f7   : > { %8597 = vmatmul.mubr.f32.gmra.mrb[26].mxu1 %v11647_v31 }
 0x7f8   : > { %8599 = vmatprep.mubr.msk.f32.mxu1 %vm10357_vm2, %v11676_v35 }
 0x7fb   : > { %8600 = vmatmul.mubr.f32.gmra.mrb[28].mxu1 %v11663_v51 }
 0x7fc   : > { %8602 = vmatprep.mubr.msk.f32.mxu1 %vm10357_vm2, %v11676_v35 }
 0x7ff   : > { %8603 = vmatmul.mubr.f32.gmra.mrb[30].mxu1 %v11673_v12 }
 0x800   : > { %8605 = vmatprep.mubr.msk.f32.mxu1 %vm10357_vm2, %v11676_v35 }
 0x803   : > { %8606 = vmatmul.mubr.f32.gmra.mrb[32].mxu1 %v11696_v11 }
 0x804   : > { %8758 = vmatprep.mubr.msk.f32.mxu1 %vm10357_vm2, %v11676_v35 }
 0x8c6   : > { %v4622_v10 = vpop.f32.mrb[24].mxu1 }
 0x8c7   : > { %v9514_v8 = vadd.f32 0.001, %v4622_v10  ;;  %v8595_v33 = vpop.f32.mrb[25].mxu1 }
 0x8c9   : > { %10144 = vrsqrt.f32 %v9514_v8  ;;  %v10112_v8 = vld [vmem:[#allocation10 + $0x1d0] sm:$0xff]  }
 0x8ca   : > { %v4628_v6 = vpop.f32.mrb[26].mxu1 }
 0x8cb   : > { %v9515_v2 = vadd.f32 0.001, %v4628_v6  ;;  %v8598_v22 = vpop.f32.mrb[27].mxu1  ;;  %v10113_v6 = vld [vmem:[#allocation10 + $0x1d8] sm:$0xff]  }
 0x8cc   : > { %v10114_v22 = vld [vmem:[#allocation10 + $0x1e0] sm:$0xff]  }
 0x8cd   : > { %10146 = vrsqrt.f32 %v9515_v2 }
 0x8ce   : > { %v4634_v23 = vpop.f32.mrb[28].mxu1 }
 0x8cf   : > { %v9516_v15 = vadd.f32 0.001, %v4634_v23  ;;  %v8601_v32 = vpop.f32.mrb[29].mxu1 }
 0x8d0   : > { %v10116_v32 = vld [vmem:[#allocation10 + $0x1f0] sm:$0xff]  }
 0x8d1   : > { %10148 = vrsqrt.f32 %v9516_v15  ;;  %v10115_v15 = vld [vmem:[#allocation10 + $0x1e8] sm:$0xff]  }
 0x8d2   : > { %v4640_v34 = vpop.f32.mrb[30].mxu1 }
 0x8d3   : > { %v10145_v37 = vpop.eup %10144  ;;  %v9517_v49 = vadd.f32 0.001, %v4640_v34  ;;  %v8604_v36 = vpop.f32.mrb[31].mxu1  ;;  %v10117_v34 = vld [vmem:[#allocation10 + $0x1f8] sm:$0xff]  }
 0x8d4   : > { %v4655_v30 = vmul.f32 %v10145_v37, %v11634_v1  ;;  %v10118_v37 = vld [vmem:[#allocation10 + $0x200] sm:$0xff]   ;;  %v10120_v36 = vld [vmem:[#allocation10 + $0x210] sm:$0xff]  }
 0x8d5   : > { %10150 = vrsqrt.f32 %v9517_v49  ;;  %v10119_v49 = vld [vmem:[#allocation10 + $0x208] sm:$0xff]  }
 0x8d6   : > { %v4660_v39 = vmax.f32 %v4655_v30, 0.0  ;;  %v4646_v57 = vpop.f32.mrb[32].mxu1  ;;  %v10121_v30 = vld [vmem:[#allocation10 + $0x218] sm:$0xff]  }
 0x8d7   : > { %v10147_v29 = vpop.eup %10146  ;;  %v9518_v5 = vadd.f32 0.001, %v4646_v57  ;;  %v8607_v52 = vpop.f32.mrb[33].mxu1 }
 0x8d8   : > { %v11881_v44 = vmul.f32 %v4660_v39, %v10804_v24  ;;  %v4656_v17 = vmul.f32 %v10147_v29, %v11638_v47  ;;  %v10122_v39 = vld [vmem:[#allocation10 + $0x220] sm:$0xff]   ;;  %v10123_v29 = vld [vmem:[#allocation10 + $0x228] sm:$0xff]   ;;  %v10125_v52 = vld [vmem:[#allocation10 + $0x238] sm:$0xff]  }
 0x8d9   : > { %10152 = vrsqrt.f32 %v9518_v5  ;;  %v10124_v5 = vld [vmem:[#allocation10 + $0x230] sm:$0xff]  }
 0x8da   : > { %4670 = vst [vmem:[#allocation4 + $0x8] sm:$0xff] %v11881_v44  ;;  %v4661_v19 = vmax.f32 %v4656_v17, 0.0 }
 0x8db   : > { %v10149_v31 = vpop.eup %10148 }
 0x8dc   : > { %v11886_v18 = vmul.f32 %v4661_v19, %v12589_v0  ;;  %v4657_v1 = vmul.f32 %v10149_v31, %v11653_v16  ;;  %v10126_v19 = vld [vmem:[#allocation10 + $0x240] sm:$0xff]  }
 0x8de   : > { %4671 = vst [vmem:[#allocation4 + $0x10] sm:$0xff] %v11886_v18  ;;  %v4662_v55 = vmax.f32 %v4657_v1, 0.0  ;;  %v4938_v51 = vpack.c.bf16 %v11886_v18, %v11881_v44  ;;  %v10127_v18 = vld [vmem:[#allocation10 + $0x248] sm:$0xff]  }
 0x8df   : > { %v10151_v24 = vpop.eup %10150 }
 0x8e0   : > { %v11893_v7 = vmul.f32 %v4662_v55, %v12591_v53  ;;  %v4658_v47 = vmul.f32 %v10151_v24, %v11661_v45 }
 0x8e1   : > { %v4700_v58 = vld [vmem:[#allocation4 + $0x7] sm:$0xff] }
 0x8e2   : > { %4672 = vst [vmem:[#allocation4 + $0x18] sm:$0xff] %v11893_v7  ;;  %v4663_v12 = vmax.f32 %v4658_v47, 0.0  ;;  %v4675_v9 = vld [vmem:[#allocation4 + $0x6] sm:$0xff] }
 0x8e3   : > { %v10153_v46 = vpop.eup %10152 }
 0x8e4   : > { %v11898_v0 = vmul.f32 %v4663_v12, %v12593_v48  ;;  %v4659_v16 = vmul.f32 %v10153_v46, %v11685_v60  ;;  %v10130_v12 = vld [vmem:[#allocation10 + $0x260] sm:$0xff]  }
 0x8e5   : > { %v4701_v42 = vld [vmem:[#allocation4 + $0xf] sm:$0xff] }
 0x8e6   : > { %4673 = vst [vmem:[#allocation4 + $0x20] sm:$0xff] %v11898_v0  ;;  %v4664_v11 = vmax.f32 %v4659_v16, 0.0  ;;  %v4705_v25 = vpack.c.bf16 %v4701_v42, %v4700_v58  ;;  %v4939_v53 = vpack.c.bf16 %v11898_v0, %v11893_v7  ;;  %v4676_v4 = vld [vmem:[#allocation4 + $0xe] sm:$0xff]  ;;  %v10131_v0 = vld [vmem:[#allocation10 + $0x268] sm:$0xff]  }
 0x8e7   : > { %v4680_v20 = vpack.c.bf16 %v4676_v4, %v4675_v9  ;;  %v5067_v17 = vld [vmem:[#allocation4 + $0x9] sm:$0xff] }
 0x8e8   : > { %v11905_v45 = vmul.f32 %v4664_v11, %v12594_v61  ;;  %8625 = vmatmul.mubr.bf16.vlgmr.msra.gmra.mrb[48].mxu0 %v4705_v25  ;;  %v10105_v61 = vld [vmem:[#allocation10 + $0x158] sm:$0xff]   ;;  %v10132_v16 = vld [vmem:[#allocation10 + $0x270] sm:$0xff]  }
 0x8e9   : > { %8637 = vmatpush3.bf16.msra.mxu0 %v10102_v50  ;;  %8628 = vmatprep.mubr.msk.bf16.mxu0 %vm10357_vm2, %v11676_v35  ;;  %v4702_v48 = vld [vmem:[#allocation4 + $0x17] sm:$0xff]  ;;  %v5201_v50 = vld [vmem:[#allocation4 + $0xa] sm:$0xff] }
 0x8ea   : > { %4674 = vst [vmem:[#allocation4 + $0x28] sm:$0xff] %v11905_v45  ;;  %8638 = vmatprep.subr.bf16.mxu0 %v11676_v35  ;;  %v4677_v10 = vld [vmem:[#allocation4 + $0x16] sm:$0xff]  ;;  %v4940_v57 = vpack.c.bf16 %v11905_v45, %v11905_v45 }
 0x8eb   : > { %v5068_v44 = vld [vmem:[#allocation4 + $0x11] sm:$0xff] }
 0x8ec   : > { %v5072_v31 = vpack.c.bf16 %v5068_v44, %v5067_v17  ;;  %v10129_v7 = vld [vmem:[#allocation10 + $0x258] sm:$0xff]  }
 0x8ed   : > { %8639 = vmatpush3.bf16.msra.mxu0 %v10103_v38  ;;  %v4703_v60 = vld [vmem:[#allocation4 + $0x1f] sm:$0xff]  ;;  %v10133_v58 = vld [vmem:[#allocation10 + $0x278] sm:$0xff]  }
 0x8ee   : > { %8640 = vmatprep.subr.bf16.mxu0 %v11676_v35  ;;  %v4706_v28 = vpack.c.bf16 %v4703_v60, %v4702_v48  ;;  %v4678_v41 = vld [vmem:[#allocation4 + $0x1e] sm:$0xff]  ;;  %v5202_v42 = vld [vmem:[#allocation4 + $0x12] sm:$0xff]  ;;  %v5345_v17 = vld [vmem:[%s12486_s7] sm:$0x3] }
 0x8ef   : > { %v4681_v33 = vpack.c.bf16 %v4678_v41, %v4677_v10  ;;  %v5069_v55 = vld [vmem:[#allocation4 + $0x19] sm:$0xff]  ;;  %v5206_v11 = vpack.c.bf16 %v5202_v42, %v5201_v50  ;;  %v11978_v60 = vld [vmem:[%s12484_s5] sm:$0xff] }
 0x8f0   : > { %8629 = vmatmul.mubr.bf16.gmra.mrb[52].mxu0 %v4706_v28  ;;  %v5865_v28 = vand.u32 4294901760, %v11978_v60 }
 0x8f1   : > { %8641 = vmatpush3.bf16.msra.mxu0 %v10104_v43  ;;  %8632 = vmatprep.mubr.msk.bf16.mxu0 %vm10357_vm2, %v11676_v35  ;;  %v4704_v21 = vld [vmem:[#allocation4 + $0x27] sm:$0xff]  ;;  %v11983_v43 = vld [vmem:[%s12484_s5 + $0x8] sm:$0xff] }
 0x8f2   : > { %8642 = vmatprep.subr.bf16.mxu0 %v11676_v35  ;;  %v4707_v54 = vpack.c.bf16 %v4704_v21, %v4704_v21  ;;  %v4679_v2 = vld [vmem:[#allocation4 + $0x26] sm:$0xff] }
 0x8f3   : > { %v4682_v23 = vpack.c.bf16 %v4679_v2, %v4679_v2  ;;  %v5070_v1 = vld [vmem:[#allocation4 + $0x21] sm:$0xff]  ;;  %v5071_v47 = vld [vmem:[#allocation4 + $0x29] sm:$0xff] }
 0x8f4   : > { %v5073_v24 = vpack.c.bf16 %v5070_v1, %v5069_v55  ;;  %v5074_v46 = vpack.c.bf16 %v5071_v47, %v5071_v47  ;;  %v5204_v25 = vld [vmem:[#allocation4 + $0x22] sm:$0xff]  ;;  %v5205_v38 = vld [vmem:[#allocation4 + $0x2a] sm:$0xff]  ;;  %v5348_v1 = vsel %vm5346_vm4, %v5345_v17, 0 }
 0x8f5   : > { %8643 = vmatpush3.bf16.msra.mxu0 %v10105_v61  ;;  %v5208_v48 = vpack.c.bf16 %v5205_v38, %v5205_v38  ;;  %v5868_v61 = vand.u32 4294901760, %v11983_v43  ;;  %v11990_v21 = vld [vmem:[%s12484_s5 + $0x10] sm:$0xff]  ;;  %v12111_v47 = vand.u32 4294901760, %v5348_v1 }
 0x8f6   : > { %8644 = vmatprep.subr.bf16.mxu0 %v11676_v35 }
 0x8f7   : > { %v12117_v42 = vsub.f32 %v5348_v1, %v12111_v47 }
 0x8f8   : > { %8633 = vmatmul.mubr.bf16.gmra.mrb[56].mxu0 %v4707_v54  ;;  %v12000_v54 = vsub.f32 %v11978_v60, %v5865_v28 }
 0x8f9   : > { %8645 = vmatpush3.bf16.msra.mxu0 %v10106_v59  ;;  %8652 = vmatprep.mubr.msk.bf16.mxu0 %vm10357_vm2, %v11676_v35  ;;  %v11995_v59 = vld [vmem:[%s12484_s5 + $0x18] sm:$0xff] }
 0x8fa   : > { %8646 = vmatprep.subr.bf16.mxu0 %v11676_v35 }
 0x8fd   : > { %8647 = vmatpush3.bf16.msra.mxu0 %v10107_v13  ;;  %v12005_v13 = vsub.f32 %v11983_v43, %v5868_v61 }
 0x8fe   : > { %8648 = vmatprep.subr.bf16.mxu0 %v11676_v35 }
 0x901   : > { %8649 = vmatpush3.bf16.msra.mxu0 %v10108_v56  ;;  %v5871_v56 = vand.u32 4294901760, %v11990_v21 }
 0x902   : > { %8650 = vmatprep.subr.bf16.mxu0 %v11676_v35 }
 0x903   : > { %v12012_v4 = vsub.f32 %v11990_v21, %v5871_v56 }
 0x905   : > { %8651 = vmatpush3.bf16.msra.mxu0 %v10109_v62  ;;  %v5874_v62 = vand.u32 4294901760, %v11995_v59 }
 0x906   : > { %8664 = vmatprep.subr.bf16.mxu0 %v11676_v35 }
 0x907   : > { %v12017_v9 = vsub.f32 %v11995_v59, %v5874_v62 }
 0x908   : > { %8653 = vmatmul.mubr.bf16.vlgmr.msra.gmra.mrb[48].mxu0 %v4680_v20  ;;  %v12027_v20 = vld [vmem:[%s12484_s5 + $0x28] sm:$0xff] }
 0x909   : > { %8665 = vmatpush3.bf16.msra.mxu0 %v10110_v14  ;;  %8656 = vmatprep.mubr.msk.bf16.mxu0 %vm10357_vm2, %v11676_v35  ;;  %v12022_v14 = vld [vmem:[%s12484_s5 + $0x20] sm:$0xff]  ;;  %v5880_v41 = vand.u32 4294901760, %v12027_v20 }
 0x90a   : > { %8666 = vmatprep.subr.bf16.mxu0 %v11676_v35 }
 0x90d   : > { %8667 = vmatpush3.bf16.msra.mxu0 %v10111_v27  ;;  %v5877_v27 = vand.u32 4294901760, %v12022_v14 }
 0x90e   : > { %8668 = vmatprep.subr.bf16.mxu0 %v11676_v35 }
 0x90f   : > { %v12034_v10 = vsub.f32 %v12022_v14, %v5877_v27  ;;  %v12187_v60 = vpack.c.bf16 %v5880_v41, %v5877_v27  ;;  %v5860_v27 = vld [vmem:[%s12484_s5 + $0x60] sm:$0xff] }
 0x910   : > { %8657 = vmatmul.mubr.bf16.gmra.mrb[52].mxu0 %v4681_v33  ;;  %v12044_v33 = vld [vmem:[%s12484_s5 + $0x30] sm:$0xff] }
 0x911   : > { %8669 = vmatpush3.bf16.msra.mxu0 %v10112_v8  ;;  %8660 = vmatprep.mubr.msk.bf16.mxu0 %vm10357_vm2, %v11676_v35  ;;  %v12039_v8 = vsub.f32 %v12027_v20, %v5880_v41  ;;  %v12539_v2 = vand.u32 4294901760, %v12044_v33  ;;  %v12607_v43 = vand.u32 4294901760, %v12044_v33  ;;  %v5861_v41 = vld [vmem:[%s12484_s5 + $0x68] sm:$0xff] }
 0x912   : > { %8670 = vmatprep.subr.bf16.mxu0 %v11676_v35 }
 0x915   : > { %8671 = vmatpush3.bf16.msra.mxu0 %v10113_v6  ;;  %v12049_v6 = vld [vmem:[%s12484_s5 + $0x38] sm:$0xff] }
 0x916   : > { %8672 = vmatprep.subr.bf16.mxu0 %v11676_v35 }
 0x918   : > { %8661 = vmatmul.mubr.bf16.gmra.mrb[56].mxu0 %v4682_v23  ;;  %v12056_v23 = vsub.f32 %v12044_v33, %v12539_v2  ;;  %v5901_v33 = vand.u32 4294901760, %v5860_v27 }
 0x919   : > { %8673 = vmatpush3.bf16.msra.mxu0 %v10114_v22  ;;  %8680 = vmatprep.mubr.msk.bf16.mxu0 %vm10357_vm2, %v11676_v35  ;;  %v12538_v22 = vand.u32 4294901760, %v12049_v6 }
 0x91a   : > { %8674 = vmatprep.subr.bf16.mxu0 %v11676_v35 }
 0x91d   : > { %8675 = vmatpush3.bf16.msra.mxu0 %v10115_v15  ;;  %v12061_v15 = vsub.f32 %v12049_v6, %v12538_v22  ;;  %v12606_v22 = vld [vmem:[#allocation30_spill] sm:$0xff] }
 0x91e   : > { %8676 = vmatprep.subr.bf16.mxu0 %v11676_v35 }
 0x921   : > { %8677 = vmatpush3.bf16.msra.mxu0 %v10116_v32  ;;  %v12066_v32 = vld [vmem:[%s12484_s5 + $0x40] sm:$0xff] }
 0x922   : > { %8678 = vmatprep.subr.bf16.mxu0 %v11676_v35  ;;  %v12609_v21 = vand.u32 4294901760, %v12066_v32 }
 0x925   : > { %8679 = vmatpush3.bf16.msra.mxu0 %v10117_v34  ;;  %v12071_v34 = vld [vmem:[%s12484_s5 + $0x48] sm:$0xff] }
 0x926   : > { %8692 = vmatprep.subr.bf16.mxu0 %v11676_v35  ;;  %v12610_v59 = vand.u32 4294901760, %v12071_v34 }
 0x928   : > { %8681 = vmatmul.mubr.bf16.vlgmr.msra.gmra.mrb[48].mxu0 %v4938_v51  ;;  %v10128_v51 = vld [vmem:[#allocation10 + $0x250] sm:$0xff]  }
 0x929   : > { %8693 = vmatpush3.bf16.msra.mxu0 %v10118_v37  ;;  %8684 = vmatprep.mubr.msk.bf16.mxu0 %vm10357_vm2, %v11676_v35  ;;  %v12537_v37 = vand.u32 4294901760, %v12066_v32 }
 0x92a   : > { %8694 = vmatprep.subr.bf16.mxu0 %v11676_v35 }
 0x92d   : > { %8695 = vmatpush3.bf16.msra.mxu0 %v10119_v49  ;;  %v12536_v49 = vand.u32 4294901760, %v12071_v34 }
 0x92e   : > { %8696 = vmatprep.subr.bf16.mxu0 %v11676_v35 }
 0x930   : > { %8685 = vmatmul.mubr.bf16.gmra.mrb[52].mxu0 %v4939_v53  ;;  %v5203_v53 = vld [vmem:[#allocation4 + $0x1a] sm:$0xff] }
 0x931   : > { %8697 = vmatpush3.bf16.msra.mxu0 %v10120_v36  ;;  %8688 = vmatprep.mubr.msk.bf16.mxu0 %vm10357_vm2, %v11676_v35  ;;  %v5207_v45 = vpack.c.bf16 %v5204_v25, %v5203_v53  ;;  %v12078_v36 = vsub.f32 %v12066_v32, %v12537_v37 }
 0x932   : > { %8698 = vmatprep.subr.bf16.mxu0 %v11676_v35 }
 0x935   : > { %8699 = vmatpush3.bf16.msra.mxu0 %v10121_v30  ;;  %v12083_v30 = vsub.f32 %v12071_v34, %v12536_v49  ;;  %v5862_v34 = vld [vmem:[%s12484_s5 + $0x70] sm:$0xff] }
 0x936   : > { %8700 = vmatprep.subr.bf16.mxu0 %v11676_v35 }
 0x938   : > { %8689 = vmatmul.mubr.bf16.gmra.mrb[56].mxu0 %v4940_v57  ;;  %v12093_v57 = vld [vmem:[%s12484_s5 + $0x58] sm:$0xff] }
 0x939   : > { %8701 = vmatpush3.bf16.msra.mxu0 %v10122_v39  ;;  %8708 = vmatprep.mubr.msk.bf16.mxu0 %vm10357_vm2, %v11676_v35  ;;  %v12088_v39 = vld [vmem:[%s12484_s5 + $0x50] sm:$0xff]  ;;  %v12612_v14 = vand.u32 4294901760, %v12093_v57 }
 0x93a   : > { %8702 = vmatprep.subr.bf16.mxu0 %v11676_v35 }
 0x93d   : > { %8703 = vmatpush3.bf16.msra.mxu0 %v10123_v29  ;;  %v12535_v29 = vand.u32 4294901760, %v12088_v39 }
 0x93e   : > { %8704 = vmatprep.subr.bf16.mxu0 %v11676_v35 }
 0x941   : > { %8705 = vmatpush3.bf16.msra.mxu0 %v10124_v5  ;;  %v12534_v5 = vand.u32 4294901760, %v12093_v57 }
 0x942   : > { %8706 = vmatprep.subr.bf16.mxu0 %v11676_v35 }
 0x943   : > { %v12105_v44 = vsub.f32 %v12093_v57, %v12534_v5  ;;  %v5907_v57 = vand.u32 4294901760, %v5862_v34 }
 0x945   : > { %8707 = vmatpush3.bf16.msra.mxu0 %v10125_v52  ;;  %v12100_v52 = vsub.f32 %v12088_v39, %v12535_v29 }
 0x946   : > { %8720 = vmatprep.subr.bf16.mxu0 %v11676_v35 }
 0x948   : > { %8709 = vmatmul.mubr.bf16.vlgmr.msra.gmra.mrb[48].mxu0 %v5072_v31 }
 0x949   : > { %8721 = vmatpush3.bf16.msra.mxu0 %v10126_v19  ;;  %8712 = vmatprep.mubr.msk.bf16.mxu0 %vm10357_vm2, %v11676_v35 }
 0x94a   : > { %8722 = vmatprep.subr.bf16.mxu0 %v11676_v35 }
 0x94d   : > { %8723 = vmatpush3.bf16.msra.mxu0 %v10127_v18 }
 0x94e   : > { %8724 = vmatprep.subr.bf16.mxu0 %v11676_v35 }
 0x950   : > { %8713 = vmatmul.mubr.bf16.gmra.mrb[52].mxu0 %v5073_v24 }
 0x951   : > { %8725 = vmatpush3.bf16.msra.mxu0 %v10128_v51  ;;  %8716 = vmatprep.mubr.msk.bf16.mxu0 %vm10357_vm2, %v11676_v35 }
 0x952   : > { %8726 = vmatprep.subr.bf16.mxu0 %v11676_v35 }
 0x955   : > { %8727 = vmatpush3.bf16.msra.mxu0 %v10129_v7 }
 0x956   : > { %8728 = vmatprep.subr.bf16.mxu0 %v11676_v35 }
 0x958   : > { %8717 = vmatmul.mubr.bf16.gmra.mrb[56].mxu0 %v5074_v46 }
 0x959   : > { %8729 = vmatpush3.bf16.msra.mxu0 %v10130_v12  ;;  %8736 = vmatprep.mubr.msk.bf16.mxu0 %vm10357_vm2, %v11676_v35 }
 0x95a   : > { %8730 = vmatprep.subr.bf16.mxu0 %v11676_v35 }
 0x95d   : > { %8731 = vmatpush3.bf16.msra.mxu0 %v10131_v0 }
 0x95e   : > { %8732 = vmatprep.subr.bf16.mxu0 %v11676_v35 }
 0x961   : > { %8733 = vmatpush3.bf16.msra.mxu0 %v10132_v16 }
 0x962   : > { %8734 = vmatprep.subr.bf16.mxu0 %v11676_v35 }
 0x965   : > { %8735 = vmatpush3.bf16.msra.mxu0 %v10133_v58 }
 0x968   : > { %8737 = vmatmul.mubr.bf16.vlgmr.msra.gmra.mrb[48].mxu0 %v5206_v11 }
 0x969   : > { %8740 = vmatprep.mubr.msk.bf16.mxu0 %vm10357_vm2, %v11676_v35 }
 0x970   : > { %8741 = vmatmul.mubr.bf16.gmra.mrb[52].mxu0 %v5207_v45 }
 0x971   : > { %8744 = vmatprep.mubr.msk.bf16.mxu0 %vm10357_vm2, %v11676_v35 }
 0x978   : > { %8745 = vmatmul.mubr.bf16.gmra.mrb[56].mxu0 %v5208_v48 }
 0xa3b   : > { %v5308_v19 = vpop.f32.mrb[48].mxu0 }
 0xa3c   : > { %v5335_v31 = vmul.f32 0.1, %v5308_v19  ;;  %v8738_v18 = vpop.f32.mrb[49].mxu0 }
 0xa3d   : > { %v5311_v55 = vpop.f32.mrb[50].mxu0 }
 0xa3e   : > { %v5340_v51 = vadd.f32 %v5335_v31, %v11521_v26  ;;  %v5336_v24 = vmul.f32 0.1, %v5311_v55  ;;  %v8739_v7 = vpop.f32.mrb[51].mxu0  ;;  %v5422_v31 = vand.u32 4294901760, %v12117_v42 }
 0xa40   : > { %v5351_v12 = vand.u32 4294901760, %v5340_v51  ;;  %v5341_v46 = vadd.f32 %v5336_v24, %v11528_v3 }
 0xa42   : > { %v12114_v0 = vsub.f32 %v5340_v51, %v5351_v12  ;;  %v5354_v16 = vand.u32 4294901760, %v5341_v46  ;;  %v12605_v51 = vld [vmem:[#allocation21_spill] sm:$0xff] }
 0xa43   : > { %v5316_v58 = vpop.f32.mrb[52].mxu0 }
 0xa44   : > { %v5433_v50 = vand.u32 4294901760, %v12114_v0  ;;  %v12120_v11 = vpack.c.bf16 %v5354_v16, %v5351_v12  ;;  %v5439_v25 = vsub.f32 %v5341_v46, %v5354_v16  ;;  %v5337_v26 = vmul.f32 0.1, %v5316_v58  ;;  %v8742_v53 = vpop.f32.mrb[53].mxu0 }
 0xa45   : > { %v5319_v45 = vpop.f32.mrb[54].mxu0  ;;  %v5423_v58 = vsub.f32 %v12117_v42, %v5422_v31 }
 0xa46   : > { %v5440_v38 = vand.u32 4294901760, %v5439_v25  ;;  %v5342_v48 = vadd.f32 %v5337_v26, %v11539_v63  ;;  %v5338_v17 = vmul.f32 0.1, %v5319_v45  ;;  %v8743_v3 = vpop.f32.mrb[55].mxu0  ;;  %9326 = vmatpush3.bf16.msra.mxu1 %v12120_v11  ;;  %v5434_v19 = vsub.f32 %v12114_v0, %v5433_v50 }
 0xa47   : > { %9327 = vmatprep.subr.bf16.mxu1 %v12569_v40  ;;  %v9337_v18 = vpack.c.bf16 %v5439_v25, %v12114_v0 }
 0xa48   : > { %v5441_v1 = vsub.f32 %v5439_v25, %v5440_v38  ;;  %v5357_v55 = vand.u32 4294901760, %v5342_v48  ;;  %v5343_v24 = vadd.f32 %v5338_v17, %v12605_v51  ;;  %v9349_v7 = vpack.c.bf16 %v5440_v38, %v5433_v50 }
 0xa49   : > { %v5435_v26 = vand.u32 4294901760, %v5434_v19  ;;  %v5424_v38 = vand.u32 4294901760, %v5423_v58  ;;  %v12245_v58 = vsub.f32 %v5860_v27, %v5901_v33 }
 0xa4a   : > { %v5446_v12 = vsub.f32 %v5342_v48, %v5357_v55  ;;  %v5360_v46 = vand.u32 4294901760, %v5343_v24  ;;  %v5442_v63 = vand.u32 4294901760, %v5441_v1 }
 0xa4b   : > { %v5324_v16 = vpop.f32.mrb[56].mxu0 }
 0xa4c   : > { %v5447_v53 = vand.u32 4294901760, %v5446_v12  ;;  %v9328_v45 = vpack.c.bf16 %v5360_v46, %v5357_v55  ;;  %v5453_v3 = vsub.f32 %v5343_v24, %v5360_v46  ;;  %v5339_v5 = vmul.f32 0.1, %v5324_v16  ;;  %v8746_v29 = vpop.f32.mrb[57].mxu0 }
 0xa4d   : > { %v5327_v49 = vpop.f32.mrb[58].mxu0  ;;  %v9331_v37 = vpack.c.bf16 %v5442_v63, %v5435_v26  ;;  %v5972_v63 = vand.u32 4294901760, %v12012_v4  ;;  %v5979_v16 = vand.u32 4294901760, %v12017_v9 }
 0xa4e   : > { %v5448_v0 = vsub.f32 %v5446_v12, %v5447_v53  ;;  %v5454_v25 = vand.u32 4294901760, %v5453_v3  ;;  %v5344_v2 = vadd.f32 %v5339_v5, %v12606_v22  ;;  %v8747_v17 = vpop.f32.mrb[59].mxu0  ;;  %9329 = vmatpush3.bf16.msra.mxu1 %v9328_v45  ;;  %v9340_v50 = vpack.c.bf16 %v5453_v3, %v5446_v12 }
 0xa4f   : > { %8756 = vmatprep.subr.mxu1 %v11676_v35 }
 0xa50   : > { %v5455_v48 = vsub.f32 %v5453_v3, %v5454_v25  ;;  %v5363_v1 = vand.u32 4294901760, %v5344_v2  ;;  %v9352_v19 = vpack.c.bf16 %v5454_v25, %v5447_v53  ;;  %v5449_v55 = vand.u32 4294901760, %v5448_v0 }
 0xa51   : > { %v12249_v53 = vsub.f32 %v5862_v34, %v5907_v57  ;;  %v5973_v0 = vsub.f32 %v12012_v4, %v5972_v63  ;;  %v5980_v25 = vsub.f32 %v12017_v9, %v5979_v16  ;;  %v6028_v34 = vand.u32 4294901760, %v12100_v52 }
 0xa52   : > { %v5460_v51 = vsub.f32 %v5344_v2, %v5363_v1  ;;  %8757 = vmatpush3.msra.mxu1 %v5363_v1  ;;  %v5456_v24 = vand.u32 4294901760, %v5455_v48  ;;  %v12151_v2 = vld [vmem:[#allocation3] sm:$0xff]  ;;  %v5993_v48 = vand.u32 4294901760, %v12039_v8 }
 0xa53   : > { %9330 = vmatprep.subr.bf16.mxu1 %v12569_v40  ;;  %8759 = vmatmul.mubr.f32.vlgmr.msra.gmra.mrb[34].mxu1 %v5424_v38  ;;  %v5974_v17 = vand.u32 4294901760, %v5973_v0  ;;  %v5986_v38 = vand.u32 4294901760, %v12034_v10 }
 0xa54   : > { %v5461_v49 = vand.u32 4294901760, %v5460_v51  ;;  %9332 = vmatpush3.bf16.msra.mxu1 %v9331_v37  ;;  %v9334_v29 = vpack.c.bf16 %v5456_v24, %v5449_v55  ;;  %8771 = vmatprep.mubr.msk.f32.mxu1 %vm10357_vm2, %v11676_v35  ;;  %v12177_v37 = vpack.c.bf16 %v5874_v62, %v5871_v56  ;;  %v12203_v56 = vpack.c.bf16 %v12610_v59, %v12609_v21 }
 0xa55   : > { %9333 = vmatprep.subr.bf16.mxu1 %v12569_v40  ;;  %v12611_v62 = vand.u32 4294901760, %v12088_v39  ;;  %v5863_v39 = vld [vmem:[%s12484_s5 + $0x78] sm:$0xff]  ;;  %v6014_v59 = vand.u32 4294901760, %v12078_v36 }
 0xa56   : > { %v5462_v22 = vsub.f32 %v5460_v51, %v5461_v49 }
 0xa57   : > { %v12211_v20 = vpack.c.bf16 %v12612_v14, %v12611_v62  ;;  %v6021_v62 = vand.u32 4294901760, %v12083_v30  ;;  %v6015_v27 = vsub.f32 %v12078_v36, %v6014_v59 }
 0xa58   : > { %9335 = vmatpush3.bf16.msra.mxu1 %v9334_v29  ;;  %v5463_v5 = vand.u32 4294901760, %v5462_v22  ;;  %v6007_v29 = vand.u32 4294901760, %v12061_v15 }
 0xa59   : > { %8769 = vmatprep.subr.mxu1 %v11676_v35 }
 0xa5c   : > { %8770 = vmatpush3.msra.mxu1 %v5463_v5 }
 0xa5d   : > { %9336 = vmatprep.subr.bf16.mxu1 %v12569_v40  ;;  %8772 = vmatmul.mubr.f32.vlgmr.msra.gmra.mrb[34].mxu1 %v12111_v47 }
 0xa5e   : > { %9338 = vmatpush3.bf16.msra.mxu1 %v9337_v18  ;;  %8784 = vmatprep.mubr.msk.f32.mxu1 %vm10357_vm2, %v11676_v35 }
 0xa5f   : > { %9339 = vmatprep.subr.bf16.mxu1 %v12569_v40 }
 0xa62   : > { %9341 = vmatpush3.bf16.msra.mxu1 %v9340_v50  ;;  %v5981_v50 = vand.u32 4294901760, %v5980_v25 }
 0xa63   : > { %8782 = vmatprep.subr.mxu1 %v11676_v35 }
 0xa66   : > { %8783 = vmatpush3.msra.mxu1 %v5460_v51  ;;  %v5994_v51 = vsub.f32 %v12039_v8, %v5993_v48 }
 0xa67   : > { %9342 = vmatprep.subr.bf16.mxu1 %v12569_v40  ;;  %8785 = vmatmul.mubr.f32.vlgmr.msra.gmra.mrb[34].mxu1 %v12117_v42  ;;  %v5958_v42 = vand.u32 4294901760, %v12000_v54 }
 0xa68   : > { %9344 = vmatpush3.bf16.msra.mxu1 %v12120_v11  ;;  %8797 = vmatprep.mubr.msk.f32.mxu1 %vm10357_vm2, %v11676_v35  ;;  %v5995_v24 = vand.u32 4294901760, %v5994_v51 }
 0xa69   : > { %9345 = vmatprep.subr.bf16.mxu1 %v12569_v40  ;;  %v5959_v18 = vsub.f32 %v12000_v54, %v5958_v42 }
 0xa6b   : > { %v5960_v12 = vand.u32 4294901760, %v5959_v18 }
 0xa6c   : > { %9347 = vmatpush3.bf16.msra.mxu1 %v9328_v45 }
 0xa6d   : > { %8795 = vmatprep.subr.mxu1 %v11676_v35  ;;  %v12168_v35 = vpack.c.bf16 %v5868_v61, %v5865_v28  ;;  %v12608_v28 = vand.u32 4294901760, %v12049_v6  ;;  %v5904_v6 = vand.u32 4294901760, %v5861_v41 }
 0xa6f   : > { %v12195_v61 = vpack.c.bf16 %v12608_v28, %v12607_v43  ;;  %v12222_v32 = vpack.c.bf16 %v5904_v6, %v5901_v33  ;;  %v12247_v26 = vsub.f32 %v5861_v41, %v5904_v6  ;;  %v6008_v43 = vsub.f32 %v12061_v15, %v6007_v29 }
 0xa70   : > { %8796 = vmatpush3.msra.mxu1 %v5363_v1  ;;  %v6022_v41 = vsub.f32 %v12083_v30, %v6021_v62  ;;  %v6016_v33 = vand.u32 4294901760, %v6015_v27 }
 0xa71   : > { %9348 = vmatprep.subr.bf16.mxu1 %v12569_v40  ;;  %8798 = vmatmul.mubr.f32.vlgmr.msra.gmra.mrb[34].mxu1 %v5422_v31  ;;  %v6009_v21 = vand.u32 4294901760, %v6008_v43  ;;  %v6049_v0 = vand.u32 4294901760, %v12247_v26 }
 0xa72   : > { %9350 = vmatpush3.bf16.msra.mxu1 %v9349_v7  ;;  %8810 = vmatprep.mubr.msk.f32.mxu1 %vm10357_vm2, %v12151_v2  ;;  %v6023_v6 = vand.u32 4294901760, %v6022_v41 }
 0xa73   : > { %9351 = vmatprep.subr.bf16.mxu1 %v12569_v40 }
 0xa76   : > { %9353 = vmatpush3.bf16.msra.mxu1 %v9352_v19  ;;  %v5987_v19 = vsub.f32 %v12034_v10, %v5986_v38 }
 0xa77   : > { %8808 = vmatprep.subr.mxu1 %v12151_v2 }
 0xa78   : > { %v5988_v55 = vand.u32 4294901760, %v5987_v19 }
 0xa7a   : > { %8809 = vmatpush3.msra.mxu1 %v5461_v49  ;;  %v6000_v49 = vand.u32 4294901760, %v12056_v23  ;;  %v9391_v22 = vpack.c.bf16 %v5995_v24, %v5988_v55  ;;  %v6056_v55 = vand.u32 4294901760, %v12249_v53 }
 0xa7b   : > { %9354 = vmatprep.subr.bf16.mxu1 %v12569_v40  ;;  %8811 = vmatmul.mubr.f32.vlgmr.msra.gmra.mrb[34].mxu1 %v12111_v47 }
 0xa7c   : > { %9356 = vmatpush3.bf16.msra.mxu1 %v12120_v11  ;;  %8823 = vmatprep.mubr.msk.f32.mxu1 %vm10357_vm2, %v12151_v2  ;;  %v5965_v11 = vand.u32 4294901760, %v12005_v13  ;;  %v6001_v5 = vsub.f32 %v12056_v23, %v6000_v49  ;;  %v6057_v43 = vsub.f32 %v12249_v53, %v6056_v55 }
 0xa7d   : > { %9357 = vmatprep.subr.bf16.mxu1 %v12569_v40 }
 0xa7e   : > { %v5966_v7 = vsub.f32 %v12005_v13, %v5965_v11  ;;  %v6002_v28 = vand.u32 4294901760, %v6001_v5 }
 0xa80   : > { %9359 = vmatpush3.bf16.msra.mxu1 %v9328_v45  ;;  %v5967_v46 = vand.u32 4294901760, %v5966_v7  ;;  %v9394_v14 = vpack.c.bf16 %v6009_v21, %v6002_v28  ;;  %v6058_v21 = vand.u32 4294901760, %v6057_v43 }
 0xa81   : > { %8821 = vmatprep.subr.mxu1 %v12151_v2 }
 0xa82   : > { %v12254_v3 = vpack.c.bf16 %v5967_v46, %v5960_v12  ;;  %v6042_v46 = vand.u32 4294901760, %v12245_v58 }
 0xa84   : > { %8822 = vmatpush3.msra.mxu1 %v5363_v1  ;;  %v9388_v1 = vpack.c.bf16 %v5981_v50, %v5974_v17  ;;  %v6043_v17 = vsub.f32 %v12245_v58, %v6042_v46  ;;  %v6050_v50 = vsub.f32 %v12247_v26, %v6049_v0 }
 0xa85   : > { %8824 = vmatmul.mubr.f32.vlgmr.msra.gmra.mrb[34].mxu1 %v12111_v47  ;;  %9360 = vmatprep.subr.bf16.mxu1 %v12569_v40  ;;  %v5910_v47 = vand.u32 4294901760, %v5863_v39 }
 0xa86   : > { %9362 = vmatpush3.bf16.msra.mxu1 %v12168_v35  ;;  %8858 = vmatprep.mubr.msk.f32.mxu1 %vm10357_vm2, %v12151_v2  ;;  %v6044_v19 = vand.u32 4294901760, %v6043_v17  ;;  %v6051_v51 = vand.u32 4294901760, %v6050_v50  ;;  %v9427_v17 = vpack.c.bf16 %v12247_v26, %v12245_v58 }
 0xa87   : > { %9363 = vmatprep.subr.bf16.mxu1 %v12569_v40  ;;  %v12234_v31 = vpack.c.bf16 %v5910_v47, %v5907_v57  ;;  %v12251_v45 = vsub.f32 %v5863_v39, %v5910_v47  ;;  %v6035_v39 = vand.u32 4294901760, %v12105_v44  ;;  %v9397_v57 = vpack.c.bf16 %v6023_v6, %v6016_v33 }
 0xa88   : > { %v6029_v47 = vsub.f32 %v12100_v52, %v6028_v34  ;;  %v9403_v5 = vpack.c.bf16 %v6051_v51, %v6044_v19  ;;  %v9409_v33 = vpack.c.bf16 %v12005_v13, %v12000_v54  ;;  %v9412_v6 = vpack.c.bf16 %v12017_v9, %v12012_v4 }
 0xa89   : > { %v6036_v18 = vsub.f32 %v12105_v44, %v6035_v39  ;;  %v12540_v24 = vand.u32 4294901760, %v12251_v45  ;;  %v9430_v50 = vpack.c.bf16 %v12251_v45, %v12249_v53  ;;  %v9463_v54 = vpack.c.bf16 %v5993_v48, %v5986_v38 }
 0xa8a   : > { %9365 = vmatpush3.bf16.msra.mxu1 %v12177_v37  ;;  %v6030_v7 = vand.u32 4294901760, %v6029_v47  ;;  %v9415_v47 = vpack.c.bf16 %v12039_v8, %v12034_v10  ;;  %v9466_v13 = vpack.c.bf16 %v6007_v29, %v6000_v49  ;;  %v9469_v4 = vpack.c.bf16 %v6021_v62, %v6014_v59 }
 0xa8b   : > { %9366 = vmatprep.subr.bf16.mxu1 %v12569_v40  ;;  %v6037_v12 = vand.u32 4294901760, %v6036_v18  ;;  %v6064_v28 = vsub.f32 %v12251_v45, %v12540_v24  ;;  %v9418_v18 = vpack.c.bf16 %v12061_v15, %v12056_v23  ;;  %v9472_v9 = vpack.c.bf16 %v6035_v39, %v6028_v34 }
 0xa8c   : > { %v9475_v10 = vpack.c.bf16 %v6049_v0, %v6042_v46  ;;  %v12613_v8 = vand.u32 4294901760, %v12251_v45 }
 0xa8d   : > { %v9400_v25 = vpack.c.bf16 %v6037_v12, %v6030_v7  ;;  %v6065_v27 = vand.u32 4294901760, %v6064_v28  ;;  %v9421_v7 = vpack.c.bf16 %v12083_v30, %v12078_v36  ;;  %v9424_v12 = vpack.c.bf16 %v12105_v44, %v12100_v52 }
 0xa8e   : > { %9368 = vmatpush3.bf16.msra.mxu1 %v12187_v60  ;;  %v9478_v23 = vpack.c.bf16 %v12613_v8, %v6056_v55 }
 0xa8f   : > { %9369 = vmatprep.subr.bf16.mxu1 %v12569_v40  ;;  %v9406_v41 = vpack.c.bf16 %v6065_v27, %v6058_v21 }
 0xa92   : > { %9371 = vmatpush3.bf16.msra.mxu1 %v12195_v61 }
 0xa93   : > { %9372 = vmatprep.subr.bf16.mxu1 %v12569_v40 }
 0xa96   : > { %9374 = vmatpush3.bf16.msra.mxu1 %v12203_v56 }
 0xa97   : > { %9375 = vmatprep.subr.bf16.mxu1 %v12569_v40 }
 0xa9a   : > { %9377 = vmatpush3.bf16.msra.mxu1 %v12211_v20 }
 0xa9b   : > { %9378 = vmatprep.subr.bf16.mxu1 %v12569_v40 }
 0xa9e   : > { %9380 = vmatpush3.bf16.msra.mxu1 %v12222_v32 }
 0xa9f   : > { %9381 = vmatprep.subr.bf16.mxu1 %v12569_v40 }
 0xaa2   : > { %9383 = vmatpush3.bf16.msra.mxu1 %v12234_v31 }
 0xaa3   : > { %9384 = vmatprep.subr.bf16.mxu1 %v12569_v40 }
 0xb58   : > { %v5844_v19 = vpop.f32.mrb[34].mxu1 }
 0xb59   : > { %v12326_v51 = vand.u32 4294901760, %v5844_v19  ;;  %v8825_v43 = vpop.f32.mrb[35].mxu1 }
 0xb5b   : > { %v5946_v28 = vsub.f32 %v5844_v19, %v12326_v51 }
 0xb5d   : > { %v5947_v21 = vand.u32 4294901760, %v5946_v28 }
 0xb5f   : > { %v5948_v27 = vsub.f32 %v5946_v28, %v5947_v21 }
 0xb61   : > { %v5949_v24 = vand.u32 4294901760, %v5948_v27 }
 0xb63   : > { %8859 = vmatmul.mubr.f32.vlgmr.msra.gmra.mrb[36].mxu1 %v5949_v24 }
 0xb64   : > { %9386 = vmatpush3.bf16.msra.mxu1 %v12254_v3  ;;  %8893 = vmatprep.mubr.msk.f32.mxu1 %vm10357_vm2, %v12151_v2  ;;  %v9457_v3 = vpack.c.bf16 %v5965_v11, %v5958_v42 }
 0xb65   : > { %9387 = vmatprep.subr.bf16.mxu1 %v12569_v40 }
 0xb68   : > { %9389 = vmatpush3.bf16.msra.mxu1 %v9388_v1  ;;  %v9460_v1 = vpack.c.bf16 %v5979_v16, %v5972_v63 }
 0xb69   : > { %9390 = vmatprep.subr.bf16.mxu1 %v12569_v40 }
 0xb6c   : > { %9392 = vmatpush3.bf16.msra.mxu1 %v9391_v22 }
 0xb6d   : > { %9393 = vmatprep.subr.bf16.mxu1 %v12569_v40 }
 0xb70   : > { %9395 = vmatpush3.bf16.msra.mxu1 %v9394_v14 }
 0xb71   : > { %9396 = vmatprep.subr.bf16.mxu1 %v12569_v40 }
 0xb74   : > { %9398 = vmatpush3.bf16.msra.mxu1 %v9397_v57 }
 0xb75   : > { %9399 = vmatprep.subr.bf16.mxu1 %v12569_v40 }
 0xb78   : > { %9401 = vmatpush3.bf16.msra.mxu1 %v9400_v25 }
 0xb79   : > { %9402 = vmatprep.subr.bf16.mxu1 %v12569_v40 }
 0xb7c   : > { %9404 = vmatpush3.bf16.msra.mxu1 %v9403_v5 }
 0xb7d   : > { %9405 = vmatprep.subr.bf16.mxu1 %v12569_v40 }
 0xb80   : > { %9407 = vmatpush3.bf16.msra.mxu1 %v9406_v41 }
 0xb81   : > { %9408 = vmatprep.subr.bf16.mxu1 %v12569_v40 }
 0xb83   : > { %8894 = vmatmul.mubr.f32.vlgmr.msra.gmra.mrb[36].mxu1 %v12326_v51 }
 0xb84   : > { %9410 = vmatpush3.bf16.msra.mxu1 %v9409_v33  ;;  %8928 = vmatprep.mubr.msk.f32.mxu1 %vm10357_vm2, %v12151_v2 }
 0xb85   : > { %9411 = vmatprep.subr.bf16.mxu1 %v12569_v40 }
 0xb88   : > { %9413 = vmatpush3.bf16.msra.mxu1 %v9412_v6 }
 0xb89   : > { %9414 = vmatprep.subr.bf16.mxu1 %v12569_v40 }
 0xb8c   : > { %9416 = vmatpush3.bf16.msra.mxu1 %v9415_v47 }
 0xb8d   : > { %9417 = vmatprep.subr.bf16.mxu1 %v12569_v40 }
 0xb90   : > { %9419 = vmatpush3.bf16.msra.mxu1 %v9418_v18 }
 0xb91   : > { %9420 = vmatprep.subr.bf16.mxu1 %v12569_v40 }
 0xb94   : > { %9422 = vmatpush3.bf16.msra.mxu1 %v9421_v7 }
 0xb95   : > { %9423 = vmatprep.subr.bf16.mxu1 %v12569_v40 }
 0xb98   : > { %9425 = vmatpush3.bf16.msra.mxu1 %v9424_v12 }
 0xb99   : > { %9426 = vmatprep.subr.bf16.mxu1 %v12569_v40 }
 0xb9c   : > { %9428 = vmatpush3.bf16.msra.mxu1 %v9427_v17 }
 0xb9d   : > { %9429 = vmatprep.subr.bf16.mxu1 %v12569_v40 }
 0xba0   : > { %9431 = vmatpush3.bf16.msra.mxu1 %v9430_v50 }
 0xba1   : > { %9432 = vmatprep.subr.bf16.mxu1 %v12569_v40 }
 0xba3   : > { %8929 = vmatmul.mubr.f32.vlgmr.msra.gmra.mrb[36].mxu1 %v5946_v28 }
 0xba4   : > { %9434 = vmatpush3.bf16.msra.mxu1 %v12168_v35  ;;  %8963 = vmatprep.mubr.msk.f32.mxu1 %vm10357_vm2, %v12151_v2 }
 0xba5   : > { %9435 = vmatprep.subr.bf16.mxu1 %v12569_v40 }
 0xba8   : > { %9437 = vmatpush3.bf16.msra.mxu1 %v12177_v37 }
 0xba9   : > { %9438 = vmatprep.subr.bf16.mxu1 %v12569_v40 }
 0xbac   : > { %9440 = vmatpush3.bf16.msra.mxu1 %v12187_v60 }
 0xbad   : > { %9441 = vmatprep.subr.bf16.mxu1 %v12569_v40 }
 0xbb0   : > { %9443 = vmatpush3.bf16.msra.mxu1 %v12195_v61 }
 0xbb1   : > { %9444 = vmatprep.subr.bf16.mxu1 %v12569_v40 }
 0xbb4   : > { %9446 = vmatpush3.bf16.msra.mxu1 %v12203_v56 }
 0xbb5   : > { %9447 = vmatprep.subr.bf16.mxu1 %v12569_v40 }
 0xbb8   : > { %9449 = vmatpush3.bf16.msra.mxu1 %v12211_v20 }
 0xbb9   : > { %9450 = vmatprep.subr.bf16.mxu1 %v12569_v40 }
 0xbbc   : > { %9452 = vmatpush3.bf16.msra.mxu1 %v12222_v32 }
 0xbbd   : > { %9453 = vmatprep.subr.bf16.mxu1 %v12569_v40 }
 0xbc0   : > { %9455 = vmatpush3.bf16.msra.mxu1 %v12234_v31 }
 0xbc1   : > { %9456 = vmatprep.subr.bf16.mxu1 %v12569_v40 }
 0xbc3   : > { %8964 = vmatmul.mubr.f32.vlgmr.msra.gmra.mrb[36].mxu1 %v5947_v21 }
 0xbc4   : > { %9458 = vmatpush3.bf16.msra.mxu1 %v9457_v3  ;;  %8998 = vmatprep.mubr.msk.f32.mxu1 %vm10357_vm2, %v12151_v2 }
 0xbc5   : > { %9459 = vmatprep.subr.bf16.mxu1 %v12569_v40 }
 0xbc8   : > { %9461 = vmatpush3.bf16.msra.mxu1 %v9460_v1 }
 0xbc9   : > { %9462 = vmatprep.subr.bf16.mxu1 %v12569_v40 }
 0xbcc   : > { %9464 = vmatpush3.bf16.msra.mxu1 %v9463_v54 }
 0xbcd   : > { %9465 = vmatprep.subr.bf16.mxu1 %v12569_v40 }
 0xbd0   : > { %9467 = vmatpush3.bf16.msra.mxu1 %v9466_v13 }
 0xbd1   : > { %9468 = vmatprep.subr.bf16.mxu1 %v12569_v40 }
 0xbd4   : > { %9470 = vmatpush3.bf16.msra.mxu1 %v9469_v4 }
 0xbd5   : > { %9471 = vmatprep.subr.bf16.mxu1 %v12569_v40 }
 0xbd8   : > { %9473 = vmatpush3.bf16.msra.mxu1 %v9472_v9 }
 0xbd9   : > { %9474 = vmatprep.subr.bf16.mxu1 %v12569_v40 }
 0xbdc   : > { %9476 = vmatpush3.bf16.msra.mxu1 %v9475_v10 }
 0xbdd   : > { %9477 = vmatprep.subr.bf16.mxu1 %v12569_v40 }
 0xbe0   : > { %9479 = vmatpush3.bf16.msra.mxu1 %v9478_v23 }
 0xbe1   : > { %9480 = vmatprep.subr.bf16.mxu1 %v12569_v40 }
 0xbe3   : > { %8999 = vmatmul.mubr.f32.vlgmr.msra.gmra.mrb[36].mxu1 %v12326_v51 }
 0xbe4   : > { %9482 = vmatpush3.bf16.msra.mxu1 %v12168_v35  ;;  %9033 = vmatprep.mubr.msk.f32.mxu1 %vm10357_vm2, %v12151_v2 }
 0xbe5   : > { %9483 = vmatprep.subr.bf16.mxu1 %v12569_v40 }
 0xbe8   : > { %9485 = vmatpush3.bf16.msra.mxu1 %v12177_v37 }
 0xbe9   : > { %9486 = vmatprep.subr.bf16.mxu1 %v12569_v40 }
 0xbec   : > { %9488 = vmatpush3.bf16.msra.mxu1 %v12187_v60 }
 0xbed   : > { %9489 = vmatprep.subr.bf16.mxu1 %v12569_v40 }
 0xbf0   : > { %9491 = vmatpush3.bf16.msra.mxu1 %v12195_v61 }
 0xbf1   : > { %9492 = vmatprep.subr.bf16.mxu1 %v12569_v40 }
 0xbf4   : > { %9494 = vmatpush3.bf16.msra.mxu1 %v12203_v56 }
 0xbf5   : > { %9495 = vmatprep.subr.bf16.mxu1 %v12569_v40 }
 0xbf8   : > { %9497 = vmatpush3.bf16.msra.mxu1 %v12211_v20 }
 0xbf9   : > { %9498 = vmatprep.subr.bf16.mxu1 %v12569_v40 }
 0xbfc   : > { %9500 = vmatpush3.bf16.msra.mxu1 %v12222_v32 }
 0xbfd   : > { %9501 = vmatprep.subr.bf16.mxu1 %v12569_v40 }
 0xc00   : > { %9503 = vmatpush3.bf16.msra.mxu1 %v12234_v31 }
 0xc03   : > { %9034 = vmatmul.mubr.f32.vlgmr.msra.gmra.mrb[36].mxu1 %v12326_v51 }
 0xcd6   : > { %v6501_v40 = vpop.f32.mrb[36].mxu1 }
 0xcd7   : > { %6506 = vst.msk [vmem:[%s368_s18] sm:$0x3] %vm6505_vm5, %v6501_v40  ;;  %v9035_v15 = vpop.f32.mrb[37].mxu1 }
 0xcd8   : > { %10285 = shalt.err (!%p10282_p4)
}
 0xcd9   : > { %s10286_s22 = scalar_lea.hbm %s12435_s21, 32  ;;  %s10290_s24 = scalar_lea.hbm %s12487_s8, 64 }
 0xcda   : > { %p10287_p9 = scmp.ne.s32.totalorder %s12435_s21, %s10286_s22  ;;  %p10291_p8 = scmp.lt.u32.totalorder %s12435_s21, %s12487_s8 }
 0xcdb   : > { %p10292_p13 = scmp.lt.u32.totalorder %s10290_s24, %s10286_s22  ;;  %p10294_p10 = scmp.lt.u32.totalorder %s10286_s22, %s12435_s21 }
 0xcdc   : > { %p10288_p0 = pnand %p10287_p9, %p10554_p5 }
 0xcdd   : > { %p10293_p6 = por %p10292_p13, %p10291_p8 }
 0xcde   : > { %p10289_p11 = pneg %p10288_p0 }
 0xcdf   : > { %p10295_p3 = por %p10294_p10, %p10293_p6 }
 0xce1   : > { %p10296_p7 = pnand %p10295_p3, %p10289_p11 }
 0xce3   : > { %10299 = shalt.err (!%p10296_p7)
}
 0xce4   : > { %9881 = dma.vmem_to_hbm [thread:$0]  (%p10554_p5), %s12437_s26, 32, %s12435_s21, %s6508_s12  }
 0xce5 PF: > { %s12614_s18 = sld [smem:[#allocation18_spill]]  ;;  %s12615_s17 = sld [smem:[#allocation19_spill]] }
 0xce6   : > { %p12617_p2 = scmp.ge.s32.totalorder %s10346_s30, 2 }
 0xceb   : > { %s6533_s19 = sand.u32 1, %s12614_s18   ;;  %p12616_p12 = scmp.ne.s32.totalorder %s12615_s17, 0 }
 0xcec   : > { %s6534_s25 = scalar_lea.sflag [#allocation7], %s6533_s19 }
 0xced   : > { %p9898_p1 = pnand %p12617_p2, %p12616_p12 }
 0xcef   : > { %10329 = dma.done.wait (!%p9898_p1), %s6534_s25, 32  }
 0xcf0   : > { %10331 = vsyncadd (!%p9898_p1), %s6534_s25, 4294967264  ;;  %s12618_s9 = smov %s10540_s27  ;;  %p23_p4 = scmp.ge.s32.totalorder %s10540_s27, 4  }
 0xcf1   : > { %s12619_s27 = smov %s10338_s28  ;;  %s12620_s28 = smov %s10342_s29 }
 0xcf2   : > { %s12621_s29 = smov %s10550_s23  ;;  %s12622_s30 = smov %s12618_s9 }
 0xcf3   :  { %25 = sbr.rel (!%p23_p4) target bundleno = 7 (0x7), region = 132 }
 0xcfa   :  { %6539 = vsyncpa [#allocation6], 1 }
 0xcfb   :  { %6541 = vsyncpa [#allocation6 + $0x1], 1 }
 0xcfc   :  { %6542 = vsyncpa [#allocation9], 1 }
 0xcfd   :  { %6543 = vsyncpa [#allocation12], 1 }
 0xcfe   :  { %6544 = vsyncpa [#allocation7], 1 }
 0xcff   :  { %6546 = vsyncpa [#allocation7 + $0x1], 1 }

</bundles_post_ra>
